<compile_context>
chip_gen: v7x
topology: tpu7x:2x2x1
jax: 0.10.0
libtpu: 0.0.40
codegen_flags: <defaults>
</compile_context>

<pallas_src>
import math
import numpy as np
import jax
import jax.numpy as jnp
from jax.experimental import pallas as pl
from jax.experimental.pallas import tpu as pltpu

BN_EPS = 1e-5


def _round_up(v, m):
    return (v + m - 1) // m * m


def _vmem_limit_bytes():
    """Generation-aware scoped-VMEM limit (headroom below physical capacity)."""
    try:
        cap = int(pltpu.get_tpu_info().vmem_capacity_bytes)
        return max(32 << 20, min(cap - (8 << 20), 100 << 20))
    except Exception:
        return 48 << 20          # safe everywhere (v7x physical VMEM = 64 MiB)


def _exp_in_bf16():
    """bf16 exp only where the EUP has a bf16 path (v6e / v7x)."""
    try:
        kind = jax.devices()[0].device_kind.lower()
        return ("v6" in kind) or ("v7" in kind)
    except Exception:
        return False


def _choose_tq(n):
    """Query-tile size: whole extent when small, else a 128-multiple divisor."""
    if n <= 512:
        return n
    for cand in (512, 384, 256, 128):
        if n % cand == 0:
            return cand
    return n                     # fall back to a single tile


# ---------------------------------------------------------------------------
# Pass 1: fused q|v projection, tiled attention (+ folded column renorm),
#         trans_conv, per-batch BN partial sums.  Grid = (batch, query_tiles).
# ---------------------------------------------------------------------------
def _make_pass1_kernel(C, N, C4P, TQ, exp_bf16):
    def kernel(x_ref, wqv_ref, bqv_ref, wt_ref, bt_ref,
               t_ref, tsum_ref, tsq_ref,
               qv_sc, xr_sc, cs_sc):
        qt = pl.program_id(1)
        n_qt = pl.num_programs(1)

        # ---- per-batch init: one fused [q ; v] matmul, zero the accumulators
        @pl.when(qt == 0)
        def _init():
            xb = x_ref[0].astype(jnp.bfloat16)                      # (C, N)
            qv = jnp.dot(wqv_ref[...], xb,
                         preferred_element_type=jnp.float32) + bqv_ref[...]
            qv_sc[...] = qv.astype(jnp.bfloat16)                    # (C4P+C, N)
            xr_sc[...] = jnp.zeros(xr_sc.shape, xr_sc.dtype)
            cs_sc[...] = jnp.zeros(cs_sc.shape, cs_sc.dtype)

        # ---- per query tile: scores, row softmax, accumulate colsum & x_r
        start = pl.multiple_of(qt * TQ, TQ)
        q_full = qv_sc[pl.ds(0, C4P), :]                            # keys   (C4P, N)
        q_tile = qv_sc[pl.ds(0, C4P), pl.ds(start, TQ)]             # queries(C4P, TQ)
        v_tile = qv_sc[pl.ds(C4P, C), pl.ds(start, TQ)]             # values (C,  TQ)

        # energy[i, j] = <q_:,i , q_:,j>   (contract the projection dim)
        energy = jax.lax.dot_general(q_tile, q_full,
                                     (((0,), (0,)), ((), ())),
                                     preferred_element_type=jnp.float32)  # (TQ, N)
        z = energy - jnp.max(energy, axis=-1, keepdims=True)
        if exp_bf16:  # bf16 EUP on v6e/v7x roughly doubles exp throughput
            e = jnp.exp(z.astype(jnp.bfloat16)).astype(jnp.float32)
        else:
            e = jnp.exp(z)
        att = e * pl.reciprocal(jnp.sum(e, axis=-1, keepdims=True), approx=True)

        cs_sc[...] += jnp.sum(att, axis=0, keepdims=True)           # (1, N)
        xr_sc[...] += jnp.dot(v_tile, att.astype(jnp.bfloat16),
                              preferred_element_type=jnp.float32)   # (C, N)

        # ---- finalize on the last tile: column renorm (as a per-column scale
        #      of x_r), trans_conv, BN partial sums, lane-dense stores.
        @pl.when(qt == n_qt - 1)
        def _fin():
            x = x_ref[0]                                            # (C, N) f32
            inv_col = pl.reciprocal(1e-9 + cs_sc[...], approx=True) # (1, N)
            x_r = xr_sc[...] * inv_col
            d = (x - x_r).astype(jnp.bfloat16)
            t = jnp.dot(wt_ref[...], d,
                        preferred_element_type=jnp.float32) + bt_ref[...]
            t_ref[0] = t.astype(t_ref.dtype)
            tsum_ref[0] = jnp.sum(t, axis=1, keepdims=True)         # (C, 1)
            tsq_ref[0] = jnp.sum(t * t, axis=1, keepdims=True)      # (C, 1)

    return kernel


# ---------------------------------------------------------------------------
# Pass 2: BatchNorm (precomputed scale/shift) + ReLU + residual, (C, N) layout.
# ---------------------------------------------------------------------------
def sa_pass2_kernel(x_ref, t_ref, scale_ref, shift_ref, out_ref):
    t = t_ref[...].astype(jnp.float32)                              # (Bb, C, N)
    y = jnp.maximum(t * scale_ref[...] + shift_ref[...], 0.0)
    out_ref[...] = (x_ref[...] + y).astype(out_ref.dtype)


def sa_layer_impl(x_bcn, params):
    """SA_Layer forward. x_bcn: (B, C, N) float32 -> (B, C, N) float32."""
    wq, wv, bv, wt, bt, gamma, beta = params
    B, C, N = x_bcn.shape
    C4 = C // 4
    C4P = _round_up(max(C4, 8), 8)       # q rows padded to a sublane multiple
    TQ = _choose_tq(N)
    if N % TQ:
        TQ = N
    n_qt = N // TQ

    # Fused [q ; v] conv weight (zero rows C4..C4P contribute nothing) + bias.
    wqv = jnp.zeros((C4P + C, C), jnp.bfloat16)
    wqv = wqv.at[:C4, :].set(wq.astype(jnp.bfloat16))
    wqv = wqv.at[C4P:, :].set(wv.astype(jnp.bfloat16))
    bqv = jnp.zeros((C4P + C, 1), jnp.float32).at[C4P:, 0].set(
        bv.astype(jnp.float32))
    wt_b = wt.astype(jnp.bfloat16)
    bt_c = bt.reshape(C, 1).astype(jnp.float32)

    x_spec = pl.BlockSpec((1, C, N), lambda b, q: (b, 0, 0))
    t_spec = pl.BlockSpec((1, C, N), lambda b, q: (b, 0, 0))
    stat_spec = pl.BlockSpec((1, C, 1), lambda b, q: (b, 0, 0))

    def w_full(a):
        return pl.BlockSpec(a.shape, lambda b, q, _nd=a.ndim: (0,) * _nd)

    t, tsum, tsq = pl.pallas_call(
        _make_pass1_kernel(C, N, C4P, TQ, _exp_in_bf16()),
        out_shape=(jax.ShapeDtypeStruct((B, C, N), jnp.bfloat16),
                   jax.ShapeDtypeStruct((B, C, 1), jnp.float32),
                   jax.ShapeDtypeStruct((B, C, 1), jnp.float32)),
        grid=(B, n_qt),
        in_specs=[x_spec, w_full(wqv), w_full(bqv), w_full(wt_b), w_full(bt_c)],
        out_specs=(t_spec, stat_spec, stat_spec),
        scratch_shapes=[pltpu.VMEM((C4P + C, N), jnp.bfloat16),   # q|v proj
                        pltpu.VMEM((C, N), jnp.float32),          # x_r accum
                        pltpu.VMEM((1, N), jnp.float32)],         # col sums
        compiler_params=pltpu.CompilerParams(
            dimension_semantics=("parallel", "arbitrary"),
            vmem_limit_bytes=_vmem_limit_bytes()),
    )(x_bcn, wqv, bqv, wt_b, bt_c)

    # BatchNorm1d (training mode): stats over (batch, points), biased variance.
    # Tiny cross-batch combine runs in XLA.
    cnt = jnp.float32(B * N)
    mean = jnp.sum(tsum[:, :, 0], axis=0) / cnt
    var = jnp.maximum(jnp.sum(tsq[:, :, 0], axis=0) / cnt - mean * mean, 0.0)
    inv = jax.lax.rsqrt(var + BN_EPS)
    scale = (gamma * inv).reshape(1, C, 1).astype(jnp.float32)
    shift = (beta - mean * gamma * inv).reshape(1, C, 1).astype(jnp.float32)

    # Pass 2: pick the largest batch block that stays comfortably in VMEM.
    per_b = C * N * (4 + 4 + 2) * 2      # x + out (f32) + t (bf16), double buf
    BB = 1
    for cand in range(B, 0, -1):
        if B % cand == 0 and cand * per_b <= (8 << 20):
            BB = cand
            break

    blk = pl.BlockSpec((BB, C, N), lambda i: (i, 0, 0))
    vec = pl.BlockSpec((1, C, 1), lambda i: (0, 0, 0))
    out = pl.pallas_call(
        sa_pass2_kernel,
        out_shape=jax.ShapeDtypeStruct((B, C, N), x_bcn.dtype),
        grid=(B // BB,),
        in_specs=[blk, blk, vec, vec],
        out_specs=blk,
        compiler_params=pltpu.CompilerParams(
            dimension_semantics=("parallel",)),
    )(x_bcn, t, scale, shift)

    return out


sa_layer = jax.jit(sa_layer_impl)


def init_params(key, C):
    """Deterministic synthetic parameters (shapes from SA_Layer.__init__)."""
    keys = iter(jax.random.split(key, 16))

    def unif(shape, fan_in):
        b = 1.0 / math.sqrt(fan_in)
        return jax.random.uniform(next(keys), shape, jnp.float32, -b, b)

    wq = unif((C // 4, C), C)            # q_conv weight == k_conv weight (tied)
    wv = unif((C, C), C)                 # v_conv weight
    bv = unif((C,), C)                   # v_conv bias
    wt = unif((C, C), C)                 # trans_conv weight
    bt = unif((C,), C)                   # trans_conv bias
    gamma = 1.0 + 0.1 * jax.random.normal(next(keys), (C,), jnp.float32)
    beta = 0.1 * jax.random.normal(next(keys), (C,), jnp.float32)
    return (wq, wv, bv, wt, bt, gamma, beta)


def reference(x_bcn, params):
    """Pure-JAX reference mirroring the PyTorch forward in (B, C, N) layout."""
    wq, wv, bv, wt, bt, gamma, beta = params
    P = jax.lax.Precision.HIGHEST

    def conv1d(h, w, b=None):
        y = jnp.einsum('oc,bcn->bon', w, h, precision=P)
        return y if b is None else y + b[None, :, None]

    x_k = conv1d(x_bcn, wq)                          # (B, C//4, N)
    x_q = jnp.swapaxes(x_k, 1, 2)                    # (B, N, C//4) shared weight
    x_v = conv1d(x_bcn, wv, bv)                      # (B, C, N)
    energy = jnp.einsum('bnd,bdm->bnm', x_q, x_k, precision=P)
    att = jax.nn.softmax(energy, axis=-1)
    att = att / (1e-9 + jnp.sum(att, axis=1, keepdims=True))
    x_r = jnp.einsum('bcm,bmn->bcn', x_v, att, precision=P)
    t = conv1d(x_bcn - x_r, wt, bt)
    mean = jnp.mean(t, axis=(0, 2), keepdims=True)
    var = jnp.mean((t - mean) ** 2, axis=(0, 2), keepdims=True)
    tn = (t - mean) / jnp.sqrt(var + BN_EPS) * gamma[None, :, None] \
        + beta[None, :, None]
    return x_bcn + jnp.maximum(tn, 0.0)


if __name__ == "__main__":
    B, C, N = 4, 64, 256                 # batch, channels (div by 4), points
    key = jax.random.PRNGKey(0)
    kx, kp = jax.random.split(key)
    x = jax.random.normal(kx, (B, C, N), jnp.float32)   # PyTorch (B, C, N) layout
    params = init_params(kp, C)

    out = jax.block_until_ready(sa_layer(x, params))

    ref = reference(x, params)
    np.testing.assert_allclose(np.asarray(out), np.asarray(ref),
                               rtol=5e-2, atol=5e-2)
    print("KERNEL_OK")
</pallas_src>

<mosaic_0001>
module attributes {stable_mosaic.version = 11 : i64} {
  func.func @kernel(%arg0: i32, %arg1: i32, %arg2: memref<1x64x256xf32, #tpu.memory_space<vmem>>, %arg3: memref<80x64xbf16, #tpu.memory_space<vmem>>, %arg4: memref<80x1xf32, #tpu.memory_space<vmem>>, %arg5: memref<64x64xbf16, #tpu.memory_space<vmem>>, %arg6: memref<64x1xf32, #tpu.memory_space<vmem>>, %arg7: memref<1x64x256xbf16, #tpu.memory_space<vmem>>, %arg8: memref<1x64x1xf32, #tpu.memory_space<vmem>>, %arg9: memref<1x64x1xf32, #tpu.memory_space<vmem>>, %arg10: memref<80x256xbf16, #tpu.memory_space<vmem>>, %arg11: memref<64x256xf32, #tpu.memory_space<vmem>>, %arg12: memref<1x256xf32, #tpu.memory_space<vmem>>) attributes {dimension_semantics = [#tpu.dimension_semantics<parallel>, #tpu.dimension_semantics<arbitrary>], iteration_bounds = array<i64: 4, 1>, scalar_prefetch = 0 : i64, scratch_operands = 3 : i64, tpu.core_type = #tpu.core_type<tc>, window_params = [{transform_indices = @transform_0, window_bounds = array<i64: 1, 64, 256>}, {pipeline_mode = #tpu.pipeline_mode<synchronous>, transform_indices = @transform_1, window_bounds = array<i64: 80, 64>}, {pipeline_mode = #tpu.pipeline_mode<synchronous>, transform_indices = @transform_2, window_bounds = array<i64: 80, 1>}, {pipeline_mode = #tpu.pipeline_mode<synchronous>, transform_indices = @transform_3, window_bounds = array<i64: 64, 64>}, {pipeline_mode = #tpu.pipeline_mode<synchronous>, transform_indices = @transform_4, window_bounds = array<i64: 64, 1>}, {transform_indices = @transform_5, window_bounds = array<i64: 1, 64, 256>}, {transform_indices = @transform_6, window_bounds = array<i64: 1, 64, 1>}, {transform_indices = @transform_7, window_bounds = array<i64: 1, 64, 1>}]} {
    %c0_i32 = arith.constant 0 : i32
    %0 = arith.cmpi eq, %arg1, %c0_i32 : i32
    %1 = arith.extui %0 : i1 to i32
    %c0_i32_0 = arith.constant 0 : i32
    %2 = arith.cmpi ne, %1, %c0_i32_0 : i32
    scf.if %2 {
      %c0_17 = arith.constant 0 : index
      %c0_18 = arith.constant 0 : index
      %c0_19 = arith.constant 0 : index
      %34 = vector.load %arg2[%c0_17, %c0_18, %c0_19] : memref<1x64x256xf32, #tpu.memory_space<vmem>>, vector<1x64x256xf32>
      %35 = vector.shape_cast %34 : vector<1x64x256xf32> to vector<64x256xf32>
      %36 = arith.truncf %35 : vector<64x256xf32> to vector<64x256xbf16>
      %c0_20 = arith.constant 0 : index
      %c0_21 = arith.constant 0 : index
      %37 = vector.load %arg3[%c0_20, %c0_21] : memref<80x64xbf16, #tpu.memory_space<vmem>>, vector<80x64xbf16>
      %cst_22 = arith.constant dense<0.000000e+00> : vector<80x256xf32>
      %38 = tpu.matmul %37, %36, %cst_22 {dimension_numbers = #tpu.dot_dimension_numbers<[1], [0], [0], [1], [0, 0, 1, 1], [], []>} : vector<80x64xbf16>, vector<64x256xbf16>, vector<80x256xf32> -> vector<80x256xf32>
      %c0_23 = arith.constant 0 : index
      %c0_24 = arith.constant 0 : index
      %39 = vector.load %arg4[%c0_23, %c0_24] : memref<80x1xf32, #tpu.memory_space<vmem>>, vector<80x1xf32>
      %40 = vector.broadcast %39 : vector<80x1xf32> to vector<80x256xf32>
      %41 = arith.addf %38, %40 : vector<80x256xf32>
      %42 = arith.truncf %41 : vector<80x256xf32> to vector<80x256xbf16>
      %c0_25 = arith.constant 0 : index
      %c0_26 = arith.constant 0 : index
      %43 = vector.load %arg10[%c0_25, %c0_26] : memref<80x256xbf16, #tpu.memory_space<vmem>>, vector<80x256xbf16>
      tpu.vector_store %arg10[%c0_25, %c0_26], %42 {strides = array<i32>} : memref<80x256xbf16, #tpu.memory_space<vmem>>, vector<80x256xbf16>,
      %cst_27 = arith.constant 0.000000e+00 : f32
      %44 = vector.broadcast %cst_27 : f32 to vector<64x256xf32>
      %c0_28 = arith.constant 0 : index
      %c0_29 = arith.constant 0 : index
      %45 = vector.load %arg11[%c0_28, %c0_29] : memref<64x256xf32, #tpu.memory_space<vmem>>, vector<64x256xf32>
      tpu.vector_store %arg11[%c0_28, %c0_29], %44 {strides = array<i32>} : memref<64x256xf32, #tpu.memory_space<vmem>>, vector<64x256xf32>,
      %cst_30 = arith.constant 0.000000e+00 : f32
      %46 = vector.broadcast %cst_30 : f32 to vector<1x256xf32>
      %c0_31 = arith.constant 0 : index
      %c0_32 = arith.constant 0 : index
      %47 = vector.load %arg12[%c0_31, %c0_32] : memref<1x256xf32, #tpu.memory_space<vmem>>, vector<1x256xf32>
      tpu.vector_store %arg12[%c0_31, %c0_32], %46 {strides = array<i32>} : memref<1x256xf32, #tpu.memory_space<vmem>>, vector<1x256xf32>,
    } else {
    }
    %c256_i32 = arith.constant 256 : i32
    %3 = arith.muli %arg1, %c256_i32 : i32
    %4 = tpu.assume_multiple %3, 256 : i32
    %c0 = arith.constant 0 : index
    %c0_1 = arith.constant 0 : index
    %5 = vector.load %arg10[%c0, %c0_1] : memref<80x256xbf16, #tpu.memory_space<vmem>>, vector<16x256xbf16>
    %c0_2 = arith.constant 0 : index
    %6 = arith.index_cast %4 : i32 to index
    %7 = vector.load %arg10[%c0_2, %6] : memref<80x256xbf16, #tpu.memory_space<vmem>>, vector<16x256xbf16>
    %c16 = arith.constant 16 : index
    %8 = arith.index_cast %4 : i32 to index
    %9 = vector.load %arg10[%c16, %8] : memref<80x256xbf16, #tpu.memory_space<vmem>>, vector<64x256xbf16>
    %cst = arith.constant dense<0.000000e+00> : vector<256x256xf32>
    %10 = tpu.matmul %7, %5, %cst {dimension_numbers = #tpu.dot_dimension_numbers<[0], [0], [1], [1], [0, 1, 1, 1], [], []>} : vector<16x256xbf16>, vector<16x256xbf16>, vector<256x256xf32> -> vector<256x256xf32>
    %cst_3 = arith.constant dense<0xFF800000> : vector<256xf32>
    %11 = vector.multi_reduction <maximumf>, %10, %cst_3 [1] : vector<256x256xf32> to vector<256xf32>
    %12 = vector.shape_cast %11 : vector<256xf32> to vector<256x1xf32>
    %13 = vector.broadcast %12 : vector<256x1xf32> to vector<256x256xf32>
    %14 = arith.subf %10, %13 : vector<256x256xf32>
    %15 = math.exp %14 : vector<256x256xf32>
    %cst_4 = arith.constant dense<0.000000e+00> : vector<256xf32>
    %16 = vector.multi_reduction <add>, %15, %cst_4 [1] : vector<256x256xf32> to vector<256xf32>
    %17 = vector.shape_cast %16 : vector<256xf32> to vector<256x1xf32>
    %18 = tpu.reciprocal %17 {approx = true} : vector<256x1xf32> -> vector<256x1xf32>
    %19 = vector.broadcast %18 : vector<256x1xf32> to vector<256x256xf32>
    %20 = arith.mulf %15, %19 : vector<256x256xf32>
    %c0_5 = arith.constant 0 : index
    %c0_6 = arith.constant 0 : index
    %21 = vector.load %arg12[%c0_5, %c0_6] : memref<1x256xf32, #tpu.memory_space<vmem>>, vector<1x256xf32>
    %cst_7 = arith.constant dense<0.000000e+00> : vector<256xf32>
    %22 = vector.multi_reduction <add>, %20, %cst_7 [0] : vector<256x256xf32> to vector<256xf32>
    %23 = vector.shape_cast %22 : vector<256xf32> to vector<1x256xf32>
    %24 = arith.addf %21, %23 : vector<1x256xf32>
    %c0_8 = arith.constant 0 : index
    %c0_9 = arith.constant 0 : index
    %25 = vector.load %arg12[%c0_8, %c0_9] : memref<1x256xf32, #tpu.memory_space<vmem>>, vector<1x256xf32>
    tpu.vector_store %arg12[%c0_8, %c0_9], %24 {strides = array<i32>} : memref<1x256xf32, #tpu.memory_space<vmem>>, vector<1x256xf32>,
    %c0_10 = arith.constant 0 : index
    %c0_11 = arith.constant 0 : index
    %26 = vector.load %arg11[%c0_10, %c0_11] : memref<64x256xf32, #tpu.memory_space<vmem>>, vector<64x256xf32>
    %27 = arith.truncf %20 : vector<256x256xf32> to vector<256x256xbf16>
    %cst_12 = arith.constant dense<0.000000e+00> : vector<64x256xf32>
    %28 = tpu.matmul %9, %27, %cst_12 {dimension_numbers = #tpu.dot_dimension_numbers<[1], [0], [0], [1], [0, 0, 1, 1], [], []>} : vector<64x256xbf16>, vector<256x256xbf16>, vector<64x256xf32> -> vector<64x256xf32>
    %29 = arith.addf %26, %28 : vector<64x256xf32>
    %c0_13 = arith.constant 0 : index
    %c0_14 = arith.constant 0 : index
    %30 = vector.load %arg11[%c0_13, %c0_14] : memref<64x256xf32, #tpu.memory_space<vmem>>, vector<64x256xf32>
    tpu.vector_store %arg11[%c0_13, %c0_14], %29 {strides = array<i32>} : memref<64x256xf32, #tpu.memory_space<vmem>>, vector<64x256xf32>,
    %c0_i32_15 = arith.constant 0 : i32
    %31 = arith.cmpi eq, %arg1, %c0_i32_15 : i32
    %32 = arith.extui %31 : i1 to i32
    %c0_i32_16 = arith.constant 0 : i32
    %33 = arith.cmpi ne, %32, %c0_i32_16 : i32
    scf.if %33 {
      %c0_17 = arith.constant 0 : index
      %c0_18 = arith.constant 0 : index
      %c0_19 = arith.constant 0 : index
      %34 = vector.load %arg2[%c0_17, %c0_18, %c0_19] : memref<1x64x256xf32, #tpu.memory_space<vmem>>, vector<1x64x256xf32>
      %35 = vector.shape_cast %34 : vector<1x64x256xf32> to vector<64x256xf32>
      %c0_20 = arith.constant 0 : index
      %c0_21 = arith.constant 0 : index
      %36 = vector.load %arg12[%c0_20, %c0_21] : memref<1x256xf32, #tpu.memory_space<vmem>>, vector<1x256xf32>
      %cst_22 = arith.constant 9.99999971E-10 : f32
      %37 = vector.broadcast %cst_22 : f32 to vector<1x256xf32>
      %38 = arith.addf %37, %36 : vector<1x256xf32>
      %39 = tpu.reciprocal %38 {approx = true} : vector<1x256xf32> -> vector<1x256xf32>
      %c0_23 = arith.constant 0 : index
      %c0_24 = arith.constant 0 : index
      %40 = vector.load %arg11[%c0_23, %c0_24] : memref<64x256xf32, #tpu.memory_space<vmem>>, vector<64x256xf32>
      %41 = vector.broadcast %39 : vector<1x256xf32> to vector<64x256xf32>
      %42 = arith.mulf %40, %41 : vector<64x256xf32>
      %43 = arith.subf %35, %42 : vector<64x256xf32>
      %44 = arith.truncf %43 : vector<64x256xf32> to vector<64x256xbf16>
      %c0_25 = arith.constant 0 : index
      %c0_26 = arith.constant 0 : index
      %45 = vector.load %arg5[%c0_25, %c0_26] : memref<64x64xbf16, #tpu.memory_space<vmem>>, vector<64x64xbf16>
      %cst_27 = arith.constant dense<0.000000e+00> : vector<64x256xf32>
      %46 = tpu.matmul %45, %44, %cst_27 {dimension_numbers = #tpu.dot_dimension_numbers<[1], [0], [0], [1], [0, 0, 1, 1], [], []>} : vector<64x64xbf16>, vector<64x256xbf16>, vector<64x256xf32> -> vector<64x256xf32>
      %c0_28 = arith.constant 0 : index
      %c0_29 = arith.constant 0 : index
      %47 = vector.load %arg6[%c0_28, %c0_29] : memref<64x1xf32, #tpu.memory_space<vmem>>, vector<64x1xf32>
      %48 = vector.broadcast %47 : vector<64x1xf32> to vector<64x256xf32>
      %49 = arith.addf %46, %48 : vector<64x256xf32>
      %50 = arith.truncf %49 : vector<64x256xf32> to vector<64x256xbf16>
      %c0_30 = arith.constant 0 : index
      %c0_31 = arith.constant 0 : index
      %c0_32 = arith.constant 0 : index
      %51 = vector.load %arg7[%c0_30, %c0_31, %c0_32] : memref<1x64x256xbf16, #tpu.memory_space<vmem>>, vector<1x64x256xbf16>
      %52 = vector.shape_cast %51 : vector<1x64x256xbf16> to vector<64x256xbf16>
      %53 = vector.shape_cast %50 : vector<64x256xbf16> to vector<1x64x256xbf16>
      tpu.vector_store %arg7[%c0_30, %c0_31, %c0_32], %53 {strides = array<i32>} : memref<1x64x256xbf16, #tpu.memory_space<vmem>>, vector<1x64x256xbf16>,
      %cst_33 = arith.constant dense<0.000000e+00> : vector<64xf32>
      %54 = vector.multi_reduction <add>, %49, %cst_33 [1] : vector<64x256xf32> to vector<64xf32>
      %55 = vector.shape_cast %54 : vector<64xf32> to vector<64x1xf32>
      %c0_34 = arith.constant 0 : index
      %c0_35 = arith.constant 0 : index
      %c0_36 = arith.constant 0 : index
      %56 = vector.load %arg8[%c0_34, %c0_35, %c0_36] : memref<1x64x1xf32, #tpu.memory_space<vmem>>, vector<1x64x1xf32>
      %57 = vector.shape_cast %56 : vector<1x64x1xf32> to vector<64x1xf32>
      %58 = vector.shape_cast %55 : vector<64x1xf32> to vector<1x64x1xf32>
      tpu.vector_store %arg8[%c0_34, %c0_35, %c0_36], %58 {strides = array<i32>} : memref<1x64x1xf32, #tpu.memory_space<vmem>>, vector<1x64x1xf32>,
      %59 = arith.mulf %49, %49 : vector<64x256xf32>
      %cst_37 = arith.constant dense<0.000000e+00> : vector<64xf32>
      %60 = vector.multi_reduction <add>, %59, %cst_37 [1] : vector<64x256xf32> to vector<64xf32>
      %61 = vector.shape_cast %60 : vector<64xf32> to vector<64x1xf32>
      %c0_38 = arith.constant 0 : index
      %c0_39 = arith.constant 0 : index
      %c0_40 = arith.constant 0 : index
      %62 = vector.load %arg9[%c0_38, %c0_39, %c0_40] : memref<1x64x1xf32, #tpu.memory_space<vmem>>, vector<1x64x1xf32>
      %63 = vector.shape_cast %62 : vector<1x64x1xf32> to vector<64x1xf32>
      %64 = vector.shape_cast %61 : vector<64x1xf32> to vector<1x64x1xf32>
      tpu.vector_store %arg9[%c0_38, %c0_39, %c0_40], %64 {strides = array<i32>} : memref<1x64x1xf32, #tpu.memory_space<vmem>>, vector<1x64x1xf32>,
    } else {
    }
    return
  }
  func.func @transform_0(%arg0: i32, %arg1: i32) -> (i32, i32, i32) {
    %c0_i32 = arith.constant 0 : i32
    %c0_i32_0 = arith.constant 0 : i32
    %c0_i32_1 = arith.constant 0 : i32
    return %arg0, %c0_i32, %c0_i32_0 : i32, i32, i32
  }
  func.func @transform_1(%arg0: i32, %arg1: i32) -> (i32, i32) {
    %c0_i32 = arith.constant 0 : i32
    %c0_i32_0 = arith.constant 0 : i32
    %c0_i32_1 = arith.constant 0 : i32
    return %c0_i32, %c0_i32_0 : i32, i32
  }
  func.func @transform_2(%arg0: i32, %arg1: i32) -> (i32, i32) {
    %c0_i32 = arith.constant 0 : i32
    %c0_i32_0 = arith.constant 0 : i32
    %c0_i32_1 = arith.constant 0 : i32
    return %c0_i32, %c0_i32_0 : i32, i32
  }
  func.func @transform_3(%arg0: i32, %arg1: i32) -> (i32, i32) {
    %c0_i32 = arith.constant 0 : i32
    %c0_i32_0 = arith.constant 0 : i32
    %c0_i32_1 = arith.constant 0 : i32
    return %c0_i32, %c0_i32_0 : i32, i32
  }
  func.func @transform_4(%arg0: i32, %arg1: i32) -> (i32, i32) {
    %c0_i32 = arith.constant 0 : i32
    %c0_i32_0 = arith.constant 0 : i32
    %c0_i32_1 = arith.constant 0 : i32
    return %c0_i32, %c0_i32_0 : i32, i32
  }
  func.func @transform_5(%arg0: i32, %arg1: i32) -> (i32, i32, i32) {
    %c0_i32 = arith.constant 0 : i32
    %c0_i32_0 = arith.constant 0 : i32
    %c0_i32_1 = arith.constant 0 : i32
    return %arg0, %c0_i32, %c0_i32_0 : i32, i32, i32
  }
  func.func @transform_6(%arg0: i32, %arg1: i32) -> (i32, i32, i32) {
    %c0_i32 = arith.constant 0 : i32
    %c0_i32_0 = arith.constant 0 : i32
    %c0_i32_1 = arith.constant 0 : i32
    return %arg0, %c0_i32, %c0_i32_0 : i32, i32, i32
  }
  func.func @transform_7(%arg0: i32, %arg1: i32) -> (i32, i32, i32) {
    %c0_i32 = arith.constant 0 : i32
    %c0_i32_0 = arith.constant 0 : i32
    %c0_i32_1 = arith.constant 0 : i32
    return %arg0, %c0_i32, %c0_i32_0 : i32, i32, i32
  }
}

module attributes {stable_mosaic.version = 11 : i64} {
  func.func @sa_pass2_kernel(%arg0: i32, %arg1: memref<4x64x256xf32, #tpu.memory_space<vmem>>, %arg2: memref<4x64x256xbf16, #tpu.memory_space<vmem>>, %arg3: memref<1x64x1xf32, #tpu.memory_space<vmem>>, %arg4: memref<1x64x1xf32, #tpu.memory_space<vmem>>, %arg5: memref<4x64x256xf32, #tpu.memory_space<vmem>>) attributes {dimension_semantics = [#tpu.dimension_semantics<parallel>], iteration_bounds = array<i64: 1>, scalar_prefetch = 0 : i64, scratch_operands = 0 : i64, tpu.core_type = #tpu.core_type<tc>, window_params = [{transform_indices = @transform_0, window_bounds = array<i64: 4, 64, 256>}, {transform_indices = @transform_1, window_bounds = array<i64: 4, 64, 256>}, {pipeline_mode = #tpu.pipeline_mode<synchronous>, transform_indices = @transform_2, window_bounds = array<i64: 1, 64, 1>}, {pipeline_mode = #tpu.pipeline_mode<synchronous>, transform_indices = @transform_3, window_bounds = array<i64: 1, 64, 1>}, {transform_indices = @transform_4, window_bounds = array<i64: 4, 64, 256>}]} {
    %c0 = arith.constant 0 : index
    %c0_0 = arith.constant 0 : index
    %c0_1 = arith.constant 0 : index
    %0 = vector.load %arg2[%c0, %c0_0, %c0_1] : memref<4x64x256xbf16, #tpu.memory_space<vmem>>, vector<4x64x256xbf16>
    %1 = arith.extf %0 : vector<4x64x256xbf16> to vector<4x64x256xf32>
    %c0_2 = arith.constant 0 : index
    %c0_3 = arith.constant 0 : index
    %c0_4 = arith.constant 0 : index
    %2 = vector.load %arg3[%c0_2, %c0_3, %c0_4] : memref<1x64x1xf32, #tpu.memory_space<vmem>>, vector<1x64x1xf32>
    %3 = vector.broadcast %2 : vector<1x64x1xf32> to vector<4x64x256xf32>
    %4 = arith.mulf %1, %3 : vector<4x64x256xf32>
    %c0_5 = arith.constant 0 : index
    %c0_6 = arith.constant 0 : index
    %c0_7 = arith.constant 0 : index
    %5 = vector.load %arg4[%c0_5, %c0_6, %c0_7] : memref<1x64x1xf32, #tpu.memory_space<vmem>>, vector<1x64x1xf32>
    %6 = vector.broadcast %5 : vector<1x64x1xf32> to vector<4x64x256xf32>
    %7 = arith.addf %4, %6 : vector<4x64x256xf32>
    %cst = arith.constant 0.000000e+00 : f32
    %8 = vector.broadcast %cst : f32 to vector<4x64x256xf32>
    %9 = arith.maximumf %7, %8 : vector<4x64x256xf32>
    %c0_8 = arith.constant 0 : index
    %c0_9 = arith.constant 0 : index
    %c0_10 = arith.constant 0 : index
    %10 = vector.load %arg1[%c0_8, %c0_9, %c0_10] : memref<4x64x256xf32, #tpu.memory_space<vmem>>, vector<4x64x256xf32>
    %11 = arith.addf %10, %9 : vector<4x64x256xf32>
    %c0_11 = arith.constant 0 : index
    %c0_12 = arith.constant 0 : index
    %c0_13 = arith.constant 0 : index
    %12 = vector.load %arg5[%c0_11, %c0_12, %c0_13] : memref<4x64x256xf32, #tpu.memory_space<vmem>>, vector<4x64x256xf32>
    tpu.vector_store %arg5[%c0_11, %c0_12, %c0_13], %11 {strides = array<i32>} : memref<4x64x256xf32, #tpu.memory_space<vmem>>, vector<4x64x256xf32>,
    return
  }
  func.func @transform_0(%arg0: i32) -> (i32, i32, i32) {
    %c0_i32 = arith.constant 0 : i32
    %c0_i32_0 = arith.constant 0 : i32
    %c0_i32_1 = arith.constant 0 : i32
    return %arg0, %c0_i32, %c0_i32_0 : i32, i32, i32
  }
  func.func @transform_1(%arg0: i32) -> (i32, i32, i32) {
    %c0_i32 = arith.constant 0 : i32
    %c0_i32_0 = arith.constant 0 : i32
    %c0_i32_1 = arith.constant 0 : i32
    return %arg0, %c0_i32, %c0_i32_0 : i32, i32, i32
  }
  func.func @transform_2(%arg0: i32) -> (i32, i32, i32) {
    %c0_i32 = arith.constant 0 : i32
    %c0_i32_0 = arith.constant 0 : i32
    %c0_i32_1 = arith.constant 0 : i32
    %c0_i32_2 = arith.constant 0 : i32
    return %c0_i32, %c0_i32_0, %c0_i32_1 : i32, i32, i32
  }
  func.func @transform_3(%arg0: i32) -> (i32, i32, i32) {
    %c0_i32 = arith.constant 0 : i32
    %c0_i32_0 = arith.constant 0 : i32
    %c0_i32_1 = arith.constant 0 : i32
    %c0_i32_2 = arith.constant 0 : i32
    return %c0_i32, %c0_i32_0, %c0_i32_1 : i32, i32, i32
  }
  func.func @transform_4(%arg0: i32) -> (i32, i32, i32) {
    %c0_i32 = arith.constant 0 : i32
    %c0_i32_0 = arith.constant 0 : i32
    %c0_i32_1 = arith.constant 0 : i32
    return %arg0, %c0_i32, %c0_i32_0 : i32, i32, i32
  }
}

</mosaic_0001>

<bundles_post_ra>
// kernel: sa_layer_impl.3
= control target key start
LH: loop header
LB: loop body
LE: loop exit
PB: predicated region body
PF: predicated region fallthrough
CT: control target
= control target key end

     0   :  { %v640_v2 = vmov 0   ;;  %s1448_s0 = inlined_call_operand.vmem [shape: f32[4,64,256], index: 0, kind: input, shape index: {}]   ;;  %s1449_s1 = inlined_call_operand.vmem [shape: bf16[4,64,256], index: 1, kind: input, shape index: {}]   ;;  %s1450_s2 = inlined_call_operand.vmem [shape: f32[1,64,1], index: 2, kind: input, shape index: {}]   ;;  %s1451_s3 = inlined_call_operand.vmem [shape: f32[1,64,1], index: 3, kind: input, shape index: {}]   ;;  %s1452_s4 = inlined_call_operand.hbm [shape: f32[4,64,256], index: 4, kind: output, shape index: {}]  }
   0x1   :  { %v116_v0 = vld [vmem:[%s1450_s2 + $0x10] sm:$0xff]  ;;  %v114_v1 = vld [vmem:[%s1450_s2] sm:$0xff]  ;;  %615 = vset.pattern.permute.xlu1 %v640_v2  ;;  %614 = vset.pattern.permute.xlu0 %v640_v2  ;;  %v117_v3 = vld [vmem:[%s1450_s2 + $0x18] sm:$0xff] }
   0x2   :  { %134 = vperm.xlu1 %615, %v116_v0   ;;  %124 = vperm.xlu0 %614, %v114_v1   ;;  %v115_v4 = vld [vmem:[%s1450_s2 + $0x8] sm:$0xff]  ;;  %v118_v6 = vld [vmem:[%s1450_s2 + $0x20] sm:$0xff]  ;;  %v121_v7 = vld [vmem:[%s1450_s2 + $0x38] sm:$0xff] }
   0x3   :  { %v119_v5 = vld [vmem:[%s1450_s2 + $0x28] sm:$0xff]  ;;  %v120_v8 = vld [vmem:[%s1450_s2 + $0x30] sm:$0xff]  ;;  %v226_v10 = vld [vmem:[%s1451_s3] sm:$0xff] }
   0x4   :  { %v227_v9 = vld [vmem:[%s1451_s3 + $0x8] sm:$0xff] }
   0x6   :  { %139 = vperm.xlu1 %615, %v117_v3   ;;  %129 = vperm.xlu0 %614, %v115_v4  }
   0xa   :  { %149 = vperm.xlu1 %615, %v119_v5   ;;  %144 = vperm.xlu0 %614, %v118_v6  }
   0xe   :  { %159 = vperm.xlu1 %615, %v121_v7   ;;  %154 = vperm.xlu0 %614, %v120_v8  }
   0xf   :  { %9 = vsyncpa [#allocation3], 0  ;;  %v229_v11 = vld [vmem:[%s1451_s3 + $0x18] sm:$0xff]  ;;  %v228_v12 = vld [vmem:[%s1451_s3 + $0x10] sm:$0xff]  ;;  %s641_s8 = smov [#allocation2]  }
  0x10   :  { %v231_v13 = vld [vmem:[%s1451_s3 + $0x28] sm:$0xff]  ;;  %v230_v14 = vld [vmem:[%s1451_s3 + $0x20] sm:$0xff]  ;;  %v233_v15 = vld [vmem:[%s1451_s3 + $0x38] sm:$0xff]  ;;  %s599_s9 = sshll.u32 %s641_s8, 4  ;;  %s1429_s9 = int_to_ptr.vmem [resolvable:$true] %s599_s9 }
  0x11   :  { %v232_v16 = vld [vmem:[%s1451_s3 + $0x30] sm:$0xff]  ;;  %v740_v21 = vld [vmem:[%s1449_s1] sm:$0xff]  ;;  %v768_v33 = vld [vmem:[%s1449_s1 + $0x18] sm:$0xff]  ;;  %p621_p1 = scmp.lt.s32.totalorder %s1429_s9, %s1429_s9 }
  0x12   :  { %241 = vperm.xlu1 %615, %v227_v9   ;;  %236 = vperm.xlu0 %614, %v226_v10   ;;  %v720_v17 = vld [vmem:[%s1449_s1 + $0x10] sm:$0xff]  ;;  %v745_v22 = vld [vmem:[%s1449_s1 + $0x40] sm:$0xff]  ;;  %v773_v34 = vld [vmem:[%s1449_s1 + $0x58] sm:$0xff]  ;;  %v50_v35 = vunpack.c.l.bf16 %v740_v21  ;;  %v51_v36 = vunpack.c.h.bf16 %v740_v21  ;;  %v56_v47 = vunpack.c.l.bf16 %v768_v33  ;;  %v57_v48 = vunpack.c.h.bf16 %v768_v33 }
  0x13   :  { %v725_v18 = vld [vmem:[%s1449_s1 + $0x50] sm:$0xff]  ;;  %v54_v23 = vunpack.c.l.bf16 %v720_v17  ;;  %v55_v24 = vunpack.c.h.bf16 %v720_v17  ;;  %v754_v27 = vld [vmem:[%s1449_s1 + $0x80] sm:$0xff]  ;;  %v66_v37 = vunpack.c.l.bf16 %v745_v22  ;;  %v67_v38 = vunpack.c.h.bf16 %v745_v22  ;;  %v782_v39 = vld [vmem:[%s1449_s1 + $0x98] sm:$0xff] }
  0x14   :  { %v730_v19 = vld [vmem:[%s1449_s1 + $0x90] sm:$0xff]  ;;  %v70_v25 = vunpack.c.l.bf16 %v725_v18  ;;  %v71_v26 = vunpack.c.h.bf16 %v725_v18  ;;  %v759_v28 = vld [vmem:[%s1449_s1 + $0xc0] sm:$0xff]  ;;  %v787_v40 = vld [vmem:[%s1449_s1 + $0xd8] sm:$0xff]  ;;  %v82_v41 = vunpack.c.l.bf16 %v754_v27  ;;  %v83_v42 = vunpack.c.h.bf16 %v754_v27 }
  0x15   :  { %v735_v20 = vld [vmem:[%s1449_s1 + $0xd0] sm:$0xff]  ;;  %v86_v29 = vunpack.c.l.bf16 %v730_v19  ;;  %v87_v30 = vunpack.c.h.bf16 %v730_v19  ;;  %v98_v43 = vunpack.c.l.bf16 %v759_v28  ;;  %v99_v44 = vunpack.c.h.bf16 %v759_v28  ;;  %v796_v45 = vld [vmem:[%s1449_s1 + $0x8] sm:$0xff]  ;;  %v852_v5 = vld [vmem:[%s1449_s1 + $0x20] sm:$0xff] }
  0x16   :  { %251 = vperm.xlu1 %615, %v229_v11   ;;  %246 = vperm.xlu0 %614, %v228_v12   ;;  %v102_v31 = vunpack.c.l.bf16 %v735_v20  ;;  %v103_v32 = vunpack.c.h.bf16 %v735_v20  ;;  %v801_v46 = vld [vmem:[%s1449_s1 + $0x48] sm:$0xff]  ;;  %v72_v49 = vunpack.c.l.bf16 %v773_v34  ;;  %v73_v50 = vunpack.c.h.bf16 %v773_v34  ;;  %v857_v6 = vld [vmem:[%s1449_s1 + $0x60] sm:$0xff]  ;;  %v880_v10 = vld [vmem:[%s1449_s1 + $0x38] sm:$0xff] }
  0x17   :  { %v810_v51 = vld [vmem:[%s1449_s1 + $0x88] sm:$0xff]  ;;  %v88_v53 = vunpack.c.l.bf16 %v782_v39  ;;  %v866_v11 = vld [vmem:[%s1449_s1 + $0xa0] sm:$0xff]  ;;  %v885_v9 = vld [vmem:[%s1449_s1 + $0x78] sm:$0xff]  ;;  %v1454_v33 = vunpack.c.l.bf16 %v787_v40  ;;  %v1456_v34 = vunpack.c.l.bf16 %v796_v45  ;;  %v1475_v60 = vunpack.c.h.bf16 %v852_v5 }
  0x18   :  { %v815_v52 = vld [vmem:[%s1449_s1 + $0xc8] sm:$0xff]  ;;  %v871_v12 = vld [vmem:[%s1449_s1 + $0xe0] sm:$0xff]  ;;  %v899_v7 = vld [vmem:[%s1449_s1 + $0xf8] sm:$0xff] }
  0x19   :  { %v824_v57 = vld [vmem:[%s1449_s1 + $0x28] sm:$0xff]  ;;  %v913_v3 = vld [vmem:[%s1449_s1 + $0x70] sm:$0xff] }
  0x1a   :  { %261 = vperm.xlu1 %615, %v231_v13   ;;  %256 = vperm.xlu0 %614, %v230_v14   ;;  %v829_v58 = vld [vmem:[%s1449_s1 + $0x68] sm:$0xff]  ;;  %v922_v14 = vld [vmem:[%s1449_s1 + $0xb0] sm:$0xff]  ;;  %v1464_v4 = vunpack.c.l.bf16 %v824_v57  ;;  %v1479_v13 = vunpack.c.h.bf16 %v857_v6 }
  0x1b   :  { %v838_v63 = vld [vmem:[%s1449_s1 + $0xa8] sm:$0xff]  ;;  %v927_v1 = vld [vmem:[%s1449_s1 + $0xf0] sm:$0xff] }
  0x1c   :  { %v843_v0 = vld [vmem:[%s1449_s1 + $0xe8] sm:$0xff] }
  0x1d   :  { %v1471_v62 = vunpack.c.h.bf16 %v843_v0 }
  0x1e   :  { %271 = vperm.xlu1 %615, %v233_v15   ;;  %266 = vperm.xlu0 %614, %v232_v16   ;;  %v894_v16 = vld [vmem:[%s1449_s1 + $0xb8] sm:$0xff]  ;;  %v908_v15 = vld [vmem:[%s1449_s1 + $0x30] sm:$0xff] }
  0x81   :  { %v135_v56 = vpop.permute.xlu1 %134  ;;  %v125_v55 = vpop.permute.xlu0 %124 }
  0x82   :  { %v943_v8 = vmul.f32 %v135_v56, %v54_v23  ;;  %v947_v61 = vmul.f32 %v135_v56, %v55_v24  ;;  %v951_v59 = vmul.f32 %v135_v56, %v70_v25  ;;  %v955_v54 = vmul.f32 %v135_v56, %v71_v26 }
  0x83   :  { %v959_v2 = vmul.f32 %v135_v56, %v86_v29  ;;  %v963_v23 = vmul.f32 %v135_v56, %v87_v30  ;;  %v967_v17 = vmul.f32 %v135_v56, %v102_v31  ;;  %v971_v24 = vmul.f32 %v135_v56, %v103_v32 }
  0x84   :  { %v975_v18 = vmul.f32 %v125_v55, %v50_v35  ;;  %v979_v25 = vmul.f32 %v125_v55, %v51_v36  ;;  %v983_v19 = vmul.f32 %v125_v55, %v66_v37  ;;  %v987_v26 = vmul.f32 %v125_v55, %v67_v38 }
  0x85   :  { %v991_v20 = vmul.f32 %v125_v55, %v82_v41  ;;  %v995_v29 = vmul.f32 %v125_v55, %v83_v42  ;;  %v999_v21 = vmul.f32 %v125_v55, %v98_v43  ;;  %v1003_v30 = vmul.f32 %v125_v55, %v99_v44  ;;  %v140_v31 = vpop.permute.xlu1 %139  ;;  %v130_v22 = vpop.permute.xlu0 %129 }
  0x86   :  { %v1007_v32 = vmul.f32 %v140_v31, %v56_v47  ;;  %v1011_v35 = vmul.f32 %v140_v31, %v57_v48  ;;  %v1015_v27 = vmul.f32 %v140_v31, %v72_v49  ;;  %v1019_v36 = vmul.f32 %v140_v31, %v73_v50 }
  0x87   :  { %v1023_v28 = vmul.f32 %v140_v31, %v88_v53  ;;  %v1453_v37 = vunpack.c.h.bf16 %v782_v39  ;;  %v1031_v41 = vmul.f32 %v140_v31, %v1454_v33  ;;  %v1455_v42 = vunpack.c.h.bf16 %v787_v40 }
  0x88   :  { %v164_v44 = vmul.f32 %v130_v22, %v1456_v34  ;;  %v1457_v47 = vunpack.c.h.bf16 %v796_v45  ;;  %v1458_v49 = vunpack.c.l.bf16 %v801_v46  ;;  %v1459_v39 = vunpack.c.h.bf16 %v801_v46 }
  0x89   :  { %v1027_v38 = vmul.f32 %v140_v31, %v1453_v37  ;;  %v1035_v43 = vmul.f32 %v140_v31, %v1455_v42  ;;  %v1460_v55 = vunpack.c.l.bf16 %v810_v51  ;;  %v1461_v37 = vunpack.c.h.bf16 %v810_v51  ;;  %v150_v45 = vpop.permute.xlu1 %149 }
  0x8a   :  { %v165_v48 = vmul.f32 %v130_v22, %v1457_v47  ;;  %v180_v50 = vmul.f32 %v130_v22, %v1458_v49  ;;  %v181_v53 = vmul.f32 %v130_v22, %v1459_v39  ;;  %v1462_v31 = vunpack.c.l.bf16 %v815_v52  ;;  %v145_v47 = vpop.permute.xlu0 %144 }
  0x8b   :  { %v196_v56 = vmul.f32 %v130_v22, %v1460_v55  ;;  %v197_v40 = vmul.f32 %v130_v22, %v1461_v37  ;;  %v1463_v42 = vunpack.c.h.bf16 %v815_v52  ;;  %v1055_v49 = vmul.f32 %v150_v45, %v1464_v4 }
  0x8c   :  { %v212_v33 = vmul.f32 %v130_v22, %v1462_v31  ;;  %v1465_v46 = vunpack.c.h.bf16 %v824_v57  ;;  %v1466_v55 = vunpack.c.l.bf16 %v829_v58  ;;  %v1467_v37 = vunpack.c.h.bf16 %v829_v58 }
  0x8d   :  { %v213_v34 = vmul.f32 %v130_v22, %v1463_v42  ;;  %v1468_v52 = vunpack.c.l.bf16 %v838_v63  ;;  %v1469_v42 = vunpack.c.h.bf16 %v838_v63  ;;  %v1470_v57 = vunpack.c.l.bf16 %v843_v0 }
  0x8e   :  { %v1059_v39 = vmul.f32 %v150_v45, %v1465_v46  ;;  %v1063_v51 = vmul.f32 %v150_v45, %v1466_v55  ;;  %v1067_v31 = vmul.f32 %v150_v45, %v1467_v37  ;;  %v1083_v55 = vmul.f32 %v150_v45, %v1471_v62 }
  0x8f   :  { %v1071_v22 = vmul.f32 %v150_v45, %v1468_v52  ;;  %v1075_v4 = vmul.f32 %v150_v45, %v1469_v42  ;;  %v1079_v46 = vmul.f32 %v150_v45, %v1470_v57  ;;  %v1473_v58 = vunpack.c.l.bf16 %v852_v5 }
  0x90   :  { %1472 = vst [vmem:[#allocation5_spill] sm:$0xff] %v1083_v55  ;;  %v1091_v52 = vmul.f32 %v145_v47, %v1475_v60  ;;  %v1477_v63 = vunpack.c.l.bf16 %v857_v6  ;;  %v1099_v57 = vmul.f32 %v145_v47, %v1479_v13  ;;  %v1481_v0 = vunpack.c.l.bf16 %v866_v11  ;;  %v155_v6 = vpop.permute.xlu0 %154 }
  0x91   :  { %v1087_v37 = vmul.f32 %v145_v47, %v1473_v58  ;;  %v1483_v45 = vunpack.c.h.bf16 %v866_v11  ;;  %v1485_v5 = vunpack.c.l.bf16 %v871_v12  ;;  %v1489_v13 = vunpack.c.l.bf16 %v880_v10 }
  0x92   :  { %1476 = vst [vmem:[#allocation7_spill] sm:$0xff] %v1091_v52  ;;  %v1095_v42 = vmul.f32 %v145_v47, %v1477_v63  ;;  %1480 = vst [vmem:[#allocation9_spill] sm:$0xff] %v1099_v57  ;;  %v1103_v62 = vmul.f32 %v145_v47, %v1481_v0  ;;  %v1487_v52 = vunpack.c.h.bf16 %v871_v12  ;;  %v1491_v0 = vunpack.c.h.bf16 %v880_v10 }
  0x93   :  { %1474 = vst [vmem:[#allocation6_spill] sm:$0xff] %v1087_v37  ;;  %v1107_v58 = vmul.f32 %v145_v47, %v1483_v45  ;;  %v1111_v60 = vmul.f32 %v145_v47, %v1485_v5  ;;  %v1493_v11 = vunpack.c.l.bf16 %v885_v9  ;;  %v1495_v5 = vunpack.c.h.bf16 %v885_v9 }
  0x94   :  { %1478 = vst [vmem:[#allocation8_spill] sm:$0xff] %v1095_v42  ;;  %1482 = vst [vmem:[#allocation10_spill] sm:$0xff] %v1103_v62  ;;  %v1115_v63 = vmul.f32 %v145_v47, %v1487_v52  ;;  %v160_v42 = vpop.permute.xlu1 %159  ;;  %v1497_v12 = vunpack.c.l.bf16 %v894_v16  ;;  %v1499_v52 = vunpack.c.h.bf16 %v894_v16  ;;  %v1501_v10 = vunpack.c.l.bf16 %v899_v7 }
  0x95   :  { %1484 = vst [vmem:[#allocation11_spill] sm:$0xff] %v1107_v58  ;;  %1486 = vst [vmem:[#allocation12_spill] sm:$0xff] %v1111_v60  ;;  %v1119_v57 = vmul.f32 %v160_v42, %v1489_v13  ;;  %v1123_v62 = vmul.f32 %v160_v42, %v1491_v0  ;;  %v1127_v45 = vmul.f32 %v160_v42, %v1493_v11  ;;  %v1505_v9 = vunpack.c.l.bf16 %v908_v15 }
  0x96   :  { %1488 = vst [vmem:[#allocation13_spill] sm:$0xff] %v1115_v63  ;;  %v1131_v60 = vmul.f32 %v160_v42, %v1495_v5  ;;  %v1135_v47 = vmul.f32 %v160_v42, %v1497_v12  ;;  %v1139_v13 = vmul.f32 %v160_v42, %v1499_v52  ;;  %v1143_v0 = vmul.f32 %v160_v42, %v1501_v10 }
  0x97   :  { %1490 = vst [vmem:[#allocation14_spill] sm:$0xff] %v1119_v57  ;;  %1492 = vst [vmem:[#allocation15_spill] sm:$0xff] %v1123_v62  ;;  %v1503_v62 = vunpack.c.h.bf16 %v899_v7  ;;  %v1151_v5 = vmul.f32 %v155_v6, %v1505_v9  ;;  %v1509_v16 = vunpack.c.l.bf16 %v913_v3  ;;  %v1513_v7 = vunpack.c.l.bf16 %v922_v14 }
  0x98   :  { %1494 = vst [vmem:[#allocation16_spill] sm:$0xff] %v1127_v45  ;;  %1496 = vst [vmem:[#allocation17_spill] sm:$0xff] %v1131_v60  ;;  %v1507_v60 = vunpack.c.h.bf16 %v908_v15  ;;  %v1517_v15 = vunpack.c.l.bf16 %v927_v1 }
  0x99   :  { %1498 = vst [vmem:[#allocation18_spill] sm:$0xff] %v1135_v47  ;;  %1500 = vst [vmem:[#allocation19_spill] sm:$0xff] %v1139_v13  ;;  %v1147_v11 = vmul.f32 %v160_v42, %v1503_v62  ;;  %v1159_v52 = vmul.f32 %v155_v6, %v1509_v16  ;;  %v1511_v13 = vunpack.c.h.bf16 %v913_v3  ;;  %v1167_v42 = vmul.f32 %v155_v6, %v1513_v7  ;;  %v404_v3 = vld [vmem:[%s1448_s0 + $0x10] sm:$0xff] }
  0x9a   :  { %1502 = vst [vmem:[#allocation20_spill] sm:$0xff] %v1143_v0  ;;  %1506 = vst [vmem:[#allocation22_spill] sm:$0xff] %v1151_v5  ;;  %v1155_v12 = vmul.f32 %v155_v6, %v1507_v60  ;;  %v242_v0 = vpop.permute.xlu1 %241  ;;  %v1515_v62 = vunpack.c.h.bf16 %v922_v14  ;;  %v1175_v60 = vmul.f32 %v155_v6, %v1517_v15  ;;  %v1519_v16 = vunpack.c.h.bf16 %v927_v1  ;;  %v420_v14 = vld [vmem:[%s1448_s0 + $0x90] sm:$0xff]  ;;  %v421_v1 = vld [vmem:[%s1448_s0 + $0x98] sm:$0xff] }
  0x9b   :  { %1504 = vst [vmem:[#allocation21_spill] sm:$0xff] %v1147_v11  ;;  %1510 = vst [vmem:[#allocation24_spill] sm:$0xff] %v1159_v52  ;;  %v1163_v10 = vmul.f32 %v155_v6, %v1511_v13  ;;  %v405_v13 = vld [vmem:[%s1448_s0 + $0x18] sm:$0xff]  ;;  %v276_v7 = vadd.f32 %v242_v0, %v164_v44  ;;  %v292_v15 = vadd.f32 %v242_v0, %v180_v50  ;;  %v452_v44 = vld [vmem:[%s1448_s0 + $0x190] sm:$0xff] }
  0x9c   :  { %1508 = vst [vmem:[#allocation23_spill] sm:$0xff] %v1155_v12  ;;  %1514 = vst [vmem:[#allocation26_spill] sm:$0xff] %v1167_v42  ;;  %v1171_v9 = vmul.f32 %v155_v6, %v1515_v62  ;;  %v1179_v52 = vmul.f32 %v155_v6, %v1519_v16  ;;  %v277_v62 = vadd.f32 %v242_v0, %v165_v48  ;;  %v436_v6 = vld [vmem:[%s1448_s0 + $0x110] sm:$0xff]  ;;  %v437_v16 = vld [vmem:[%s1448_s0 + $0x118] sm:$0xff] }
  0x9d   :  { %1512 = vst [vmem:[#allocation25_spill] sm:$0xff] %v1163_v10  ;;  %1518 = vst [vmem:[#allocation28_spill] sm:$0xff] %v1175_v60  ;;  %v293_v60 = vadd.f32 %v242_v0, %v181_v53  ;;  %v324_v42 = vadd.f32 %v242_v0, %v212_v33  ;;  %v325_v10 = vadd.f32 %v242_v0, %v213_v34  ;;  %v453_v48 = vld [vmem:[%s1448_s0 + $0x198] sm:$0xff]  ;;  %v340_v50 = vmax.f32 %v276_v7, 0.0 }
  0x9e   :  { %1516 = vst [vmem:[#allocation27_spill] sm:$0xff] %v1171_v9  ;;  %1520 = vst [vmem:[#allocation29_spill] sm:$0xff] %v1179_v52  ;;  %v308_v52 = vadd.f32 %v242_v0, %v196_v56  ;;  %v309_v9 = vadd.f32 %v242_v0, %v197_v40  ;;  %v341_v53 = vmax.f32 %v277_v62, 0.0  ;;  %v356_v12 = vmax.f32 %v292_v15, 0.0  ;;  %v237_v56 = vpop.permute.xlu0 %236  ;;  %v252_v7 = vpop.permute.xlu1 %251 }
  0x9f   :  { %v357_v5 = vmax.f32 %v293_v60, 0.0  ;;  %v388_v45 = vmax.f32 %v324_v42, 0.0  ;;  %v389_v57 = vmax.f32 %v325_v10, 0.0  ;;  %v468_v40 = vadd.f32 %v404_v3, %v340_v50  ;;  %v403_v10 = vld [vmem:[%s1448_s0 + $0x8] sm:$0xff]  ;;  %v434_v42 = vld [vmem:[%s1448_s0 + $0x100] sm:$0xff]  ;;  %v409_v50 = vld [vmem:[%s1448_s0 + $0x38] sm:$0xff] }
  0xa0   :  { %v372_v11 = vmax.f32 %v308_v52, 0.0  ;;  %v373_v47 = vmax.f32 %v309_v9, 0.0  ;;  %v469_v33 = vadd.f32 %v405_v13, %v341_v53  ;;  %v484_v34 = vadd.f32 %v420_v14, %v356_v12  ;;  %v402_v52 = vld [vmem:[%s1448_s0] sm:$0xff]  ;;  %v419_v12 = vld [vmem:[%s1448_s0 + $0x88] sm:$0xff]  ;;  %v424_v53 = vld [vmem:[%s1448_s0 + $0xb0] sm:$0xff] }
  0xa1   :  { %v485_v0 = vadd.f32 %v421_v1, %v357_v5  ;;  %v516_v37 = vadd.f32 %v452_v44, %v388_v45  ;;  %v517_v55 = vadd.f32 %v453_v48, %v389_v57  ;;  %532 = vst [vmem:[#allocation2 + $0x10] sm:$0xff] %v468_v40  ;;  %v418_v5 = vld [vmem:[%s1448_s0 + $0x80] sm:$0xff]  ;;  %v275_v57 = vadd.f32 %v237_v56, %v979_v25  ;;  %v408_v48 = vld [vmem:[%s1448_s0 + $0x30] sm:$0xff] }
  0xa2   :  { %v500_v63 = vadd.f32 %v436_v6, %v372_v11  ;;  %v501_v58 = vadd.f32 %v437_v16, %v373_v47  ;;  %533 = vst [vmem:[#allocation2 + $0x18] sm:$0xff] %v469_v33  ;;  %548 = vst [vmem:[#allocation2 + $0x90] sm:$0xff] %v484_v34  ;;  %v274_v47 = vadd.f32 %v237_v56, %v975_v18  ;;  %v435_v18 = vld [vmem:[%s1448_s0 + $0x108] sm:$0xff] }
  0xa3   :  { %549 = vst [vmem:[#allocation2 + $0x98] sm:$0xff] %v485_v0  ;;  %v290_v45 = vadd.f32 %v237_v56, %v983_v19  ;;  %v291_v11 = vadd.f32 %v237_v56, %v987_v26  ;;  %580 = vst [vmem:[#allocation2 + $0x190] sm:$0xff] %v516_v37  ;;  %v306_v25 = vadd.f32 %v237_v56, %v991_v20  ;;  %v450_v37 = vld [vmem:[%s1448_s0 + $0x180] sm:$0xff]  ;;  %v339_v9 = vmax.f32 %v275_v57, 0.0  ;;  %v425_v0 = vld [vmem:[%s1448_s0 + $0xb8] sm:$0xff] }
  0xa4   :  { %564 = vst [vmem:[#allocation2 + $0x110] sm:$0xff] %v500_v63  ;;  %565 = vst [vmem:[#allocation2 + $0x118] sm:$0xff] %v501_v58  ;;  %v307_v19 = vadd.f32 %v237_v56, %v995_v29  ;;  %v322_v26 = vadd.f32 %v237_v56, %v999_v21  ;;  %v451_v58 = vld [vmem:[%s1448_s0 + $0x188] sm:$0xff]  ;;  %v338_v63 = vmax.f32 %v274_v47, 0.0  ;;  %v281_v40 = vadd.f32 %v252_v7, %v1011_v35  ;;  %v457_v47 = vld [vmem:[%s1448_s0 + $0x1b8] sm:$0xff] }
  0xa5   :  { %581 = vst [vmem:[#allocation2 + $0x198] sm:$0xff] %v517_v55  ;;  %v323_v55 = vadd.f32 %v237_v56, %v1003_v30  ;;  %v354_v60 = vmax.f32 %v290_v45, 0.0  ;;  %v355_v3 = vmax.f32 %v291_v11, 0.0  ;;  %v370_v13 = vmax.f32 %v306_v25, 0.0  ;;  %v247_v25 = vpop.permute.xlu0 %246 }
  0xa6   :  { %v371_v20 = vmax.f32 %v307_v19, 0.0  ;;  %v386_v14 = vmax.f32 %v322_v26, 0.0  ;;  %v466_v21 = vadd.f32 %v402_v52, %v338_v63  ;;  %v467_v62 = vadd.f32 %v403_v10, %v339_v9  ;;  %v440_v52 = vld [vmem:[%s1448_s0 + $0x130] sm:$0xff]  ;;  %v406_v9 = vld [vmem:[%s1448_s0 + $0x20] sm:$0xff] }
  0xa7   :  { %v387_v29 = vmax.f32 %v323_v55, 0.0  ;;  %v482_v30 = vadd.f32 %v418_v5, %v354_v60  ;;  %v483_v15 = vadd.f32 %v419_v12, %v355_v3  ;;  %v498_v1 = vadd.f32 %v434_v42, %v370_v13  ;;  %v456_v5 = vld [vmem:[%s1448_s0 + $0x1b0] sm:$0xff]  ;;  %v407_v60 = vld [vmem:[%s1448_s0 + $0x28] sm:$0xff]  ;;  %v422_v3 = vld [vmem:[%s1448_s0 + $0xa0] sm:$0xff] }
  0xa8   :  { %v499_v6 = vadd.f32 %v435_v18, %v371_v20  ;;  %v514_v16 = vadd.f32 %v450_v37, %v386_v14  ;;  %530 = vst [vmem:[#allocation2] sm:$0xff] %v466_v21  ;;  %531 = vst [vmem:[#allocation2 + $0x8] sm:$0xff] %v467_v62  ;;  %v280_v56 = vadd.f32 %v252_v7, %v1007_v32  ;;  %v441_v32 = vld [vmem:[%s1448_s0 + $0x138] sm:$0xff]  ;;  %v345_v45 = vmax.f32 %v281_v40, 0.0  ;;  %v438_v21 = vld [vmem:[%s1448_s0 + $0x120] sm:$0xff] }
  0xa9   :  { %v515_v44 = vadd.f32 %v451_v58, %v387_v29  ;;  %546 = vst [vmem:[#allocation2 + $0x80] sm:$0xff] %v482_v30  ;;  %547 = vst [vmem:[#allocation2 + $0x88] sm:$0xff] %v483_v15  ;;  %v296_v33 = vadd.f32 %v252_v7, %v1015_v27  ;;  %v297_v34 = vadd.f32 %v252_v7, %v1019_v36  ;;  %v454_v30 = vld [vmem:[%s1448_s0 + $0x1a0] sm:$0xff]  ;;  %v455_v15 = vld [vmem:[%s1448_s0 + $0x1a8] sm:$0xff] }
  0xaa   :  { %562 = vst [vmem:[#allocation2 + $0x100] sm:$0xff] %v498_v1  ;;  %563 = vst [vmem:[#allocation2 + $0x108] sm:$0xff] %v499_v6  ;;  %v312_v35 = vadd.f32 %v252_v7, %v1023_v28  ;;  %v313_v27 = vadd.f32 %v252_v7, %v1027_v38  ;;  %v328_v36 = vadd.f32 %v252_v7, %v1031_v41  ;;  %v344_v57 = vmax.f32 %v280_v56, 0.0 }
  0xab   :  { %578 = vst [vmem:[#allocation2 + $0x180] sm:$0xff] %v514_v16  ;;  %579 = vst [vmem:[#allocation2 + $0x188] sm:$0xff] %v515_v44  ;;  %v329_v10 = vadd.f32 %v252_v7, %v1035_v43  ;;  %v360_v11 = vmax.f32 %v296_v33, 0.0  ;;  %v361_v12 = vmax.f32 %v297_v34, 0.0  ;;  %v473_v19 = vadd.f32 %v409_v50, %v345_v45  ;;  %v423_v7 = vld [vmem:[%s1448_s0 + $0xa8] sm:$0xff]  ;;  %v444_v45 = vld [vmem:[%s1448_s0 + $0x150] sm:$0xff] }
  0xac   :  { %v376_v42 = vmax.f32 %v312_v35, 0.0  ;;  %v377_v28 = vmax.f32 %v313_v27, 0.0  ;;  %v392_v18 = vmax.f32 %v328_v36, 0.0  ;;  %v472_v41 = vadd.f32 %v408_v48, %v344_v57  ;;  %v413_v35 = vld [vmem:[%s1448_s0 + $0x58] sm:$0xff]  ;;  %v428_v27 = vld [vmem:[%s1448_s0 + $0xd0] sm:$0xff] }
  0xad   :  { %v393_v38 = vmax.f32 %v329_v10, 0.0  ;;  %v488_v43 = vadd.f32 %v424_v53, %v360_v11  ;;  %v489_v26 = vadd.f32 %v425_v0, %v361_v12  ;;  %537 = vst [vmem:[#allocation2 + $0x38] sm:$0xff] %v473_v19  ;;  %v278_v13 = vadd.f32 %v247_v25, %v943_v8  ;;  %v262_v53 = vpop.permute.xlu1 %261  ;;  %v429_v57 = vld [vmem:[%s1448_s0 + $0xd8] sm:$0xff]  ;;  %v1521_v11 = vld [vmem:[#allocation5_spill] sm:$0xff] }
  0xae   :  { %v504_v55 = vadd.f32 %v440_v52, %v376_v42  ;;  %v505_v37 = vadd.f32 %v441_v32, %v377_v28  ;;  %v520_v58 = vadd.f32 %v456_v5, %v392_v18  ;;  %536 = vst [vmem:[#allocation2 + $0x30] sm:$0xff] %v472_v41  ;;  %v279_v20 = vadd.f32 %v247_v25, %v947_v61  ;;  %v439_v61 = vld [vmem:[%s1448_s0 + $0x128] sm:$0xff]  ;;  %v412_v32 = vld [vmem:[%s1448_s0 + $0x50] sm:$0xff]  ;;  %v461_v28 = vld [vmem:[%s1448_s0 + $0x1d8] sm:$0xff] }
  0xaf   :  { %v521_v63 = vadd.f32 %v457_v47, %v393_v38  ;;  %552 = vst [vmem:[#allocation2 + $0xb0] sm:$0xff] %v488_v43  ;;  %553 = vst [vmem:[#allocation2 + $0xb8] sm:$0xff] %v489_v26  ;;  %v294_v14 = vadd.f32 %v247_v25, %v951_v59  ;;  %v295_v29 = vadd.f32 %v247_v25, %v955_v54  ;;  %v342_v1 = vmax.f32 %v278_v13, 0.0  ;;  %v460_v42 = vld [vmem:[%s1448_s0 + $0x1d0] sm:$0xff]  ;;  %v257_v26 = vpop.permute.xlu0 %256  ;;  %v410_v13 = vld [vmem:[%s1448_s0 + $0x40] sm:$0xff] }
  0xb0   :  { %568 = vst [vmem:[#allocation2 + $0x130] sm:$0xff] %v504_v55  ;;  %569 = vst [vmem:[#allocation2 + $0x138] sm:$0xff] %v505_v37  ;;  %v310_v59 = vadd.f32 %v247_v25, %v959_v2  ;;  %v311_v54 = vadd.f32 %v247_v25, %v963_v23  ;;  %v326_v8 = vadd.f32 %v247_v25, %v967_v17  ;;  %v343_v6 = vmax.f32 %v279_v20, 0.0  ;;  %v411_v20 = vld [vmem:[%s1448_s0 + $0x48] sm:$0xff] }
  0xb1   :  { %584 = vst [vmem:[#allocation2 + $0x1b0] sm:$0xff] %v520_v58  ;;  %585 = vst [vmem:[#allocation2 + $0x1b8] sm:$0xff] %v521_v63  ;;  %v327_v62 = vadd.f32 %v247_v25, %v971_v24  ;;  %v358_v16 = vmax.f32 %v294_v14, 0.0  ;;  %v359_v44 = vmax.f32 %v295_v29, 0.0  ;;  %v470_v17 = vadd.f32 %v406_v9, %v342_v1  ;;  %v426_v14 = vld [vmem:[%s1448_s0 + $0xc0] sm:$0xff]  ;;  %v1522_v29 = vld [vmem:[#allocation6_spill] sm:$0xff] }
  0xb2   :  { %v374_v48 = vmax.f32 %v310_v59, 0.0  ;;  %v375_v2 = vmax.f32 %v311_v54, 0.0  ;;  %v390_v50 = vmax.f32 %v326_v8, 0.0  ;;  %v471_v56 = vadd.f32 %v407_v60, %v343_v6  ;;  %v1524_v59 = vld [vmem:[#allocation8_spill] sm:$0xff]  ;;  %v1525_v8 = vld [vmem:[#allocation9_spill] sm:$0xff]  ;;  %v443_v1 = vld [vmem:[%s1448_s0 + $0x148] sm:$0xff] }
  0xb3   :  { %v391_v23 = vmax.f32 %v327_v62, 0.0  ;;  %v486_v24 = vadd.f32 %v422_v3, %v358_v16  ;;  %v487_v40 = vadd.f32 %v423_v7, %v359_v44  ;;  %534 = vst [vmem:[#allocation2 + $0x20] sm:$0xff] %v470_v17  ;;  %v284_v36 = vadd.f32 %v262_v53, %v1055_v49  ;;  %v445_v49 = vld [vmem:[%s1448_s0 + $0x158] sm:$0xff]  ;;  %v1526_v6 = vld [vmem:[#allocation10_spill] sm:$0xff]  ;;  %v1527_v44 = vld [vmem:[#allocation11_spill] sm:$0xff] }
  0xb4   :  { %v502_v33 = vadd.f32 %v438_v21, %v374_v48  ;;  %v503_v34 = vadd.f32 %v439_v61, %v375_v2  ;;  %v518_v0 = vadd.f32 %v454_v30, %v390_v50  ;;  %535 = vst [vmem:[#allocation2 + $0x28] sm:$0xff] %v471_v56  ;;  %v285_v10 = vadd.f32 %v262_v53, %v1059_v39  ;;  %v1523_v21 = vld [vmem:[#allocation7_spill] sm:$0xff]  ;;  %v427_v30 = vld [vmem:[%s1448_s0 + $0xc8] sm:$0xff]  ;;  %v1528_v2 = vld [vmem:[#allocation12_spill] sm:$0xff] }
  0xb5   :  { %v519_v52 = vadd.f32 %v455_v15, %v391_v23  ;;  %550 = vst [vmem:[#allocation2 + $0xa0] sm:$0xff] %v486_v24  ;;  %551 = vst [vmem:[#allocation2 + $0xa8] sm:$0xff] %v487_v40  ;;  %v300_v5 = vadd.f32 %v262_v53, %v1063_v51  ;;  %v301_v47 = vadd.f32 %v262_v53, %v1067_v31  ;;  %v348_v18 = vmax.f32 %v284_v36, 0.0  ;;  %v442_v15 = vld [vmem:[%s1448_s0 + $0x140] sm:$0xff]  ;;  %v459_v56 = vld [vmem:[%s1448_s0 + $0x1c8] sm:$0xff] }
  0xb6   :  { %566 = vst [vmem:[#allocation2 + $0x120] sm:$0xff] %v502_v33  ;;  %567 = vst [vmem:[#allocation2 + $0x128] sm:$0xff] %v503_v34  ;;  %v316_v39 = vadd.f32 %v262_v53, %v1071_v22  ;;  %v317_v51 = vadd.f32 %v262_v53, %v1075_v4  ;;  %v332_v31 = vadd.f32 %v262_v53, %v1079_v46  ;;  %v349_v38 = vmax.f32 %v285_v10, 0.0  ;;  %v1529_v23 = vld [vmem:[#allocation13_spill] sm:$0xff] }
  0xb7   :  { %582 = vst [vmem:[#allocation2 + $0x1a0] sm:$0xff] %v518_v0  ;;  %583 = vst [vmem:[#allocation2 + $0x1a8] sm:$0xff] %v519_v52  ;;  %v333_v12 = vadd.f32 %v262_v53, %v1521_v11  ;;  %v364_v25 = vmax.f32 %v300_v5, 0.0  ;;  %v365_v41 = vmax.f32 %v301_v47, 0.0  ;;  %v476_v46 = vadd.f32 %v412_v32, %v348_v18  ;;  %v458_v17 = vld [vmem:[%s1448_s0 + $0x1c0] sm:$0xff]  ;;  %v432_v11 = vld [vmem:[%s1448_s0 + $0xf0] sm:$0xff] }
  0xb8   :  { %v380_v19 = vmax.f32 %v316_v39, 0.0  ;;  %v381_v22 = vmax.f32 %v317_v51, 0.0  ;;  %v396_v43 = vmax.f32 %v332_v31, 0.0  ;;  %v477_v55 = vadd.f32 %v413_v35, %v349_v38  ;;  %v416_v51 = vld [vmem:[%s1448_s0 + $0x70] sm:$0xff]  ;;  %v417_v31 = vld [vmem:[%s1448_s0 + $0x78] sm:$0xff] }
  0xb9   :  { %v397_v4 = vmax.f32 %v333_v12, 0.0  ;;  %v492_v37 = vadd.f32 %v428_v27, %v364_v25  ;;  %v493_v58 = vadd.f32 %v429_v57, %v365_v41  ;;  %540 = vst [vmem:[#allocation2 + $0x50] sm:$0xff] %v476_v46  ;;  %v282_v7 = vadd.f32 %v257_v26, %v1522_v29  ;;  %v272_v27 = vpop.permute.xlu1 %271  ;;  %v1530_v12 = vld [vmem:[#allocation14_spill] sm:$0xff]  ;;  %v1532_v38 = vld [vmem:[#allocation16_spill] sm:$0xff]  ;;  %v1533_v41 = vld [vmem:[#allocation17_spill] sm:$0xff] }
  0xba   :  { %v508_v63 = vadd.f32 %v444_v45, %v380_v19  ;;  %v509_v9 = vadd.f32 %v445_v49, %v381_v22  ;;  %v524_v60 = vadd.f32 %v460_v42, %v396_v43  ;;  %541 = vst [vmem:[#allocation2 + $0x58] sm:$0xff] %v477_v55  ;;  %v283_v61 = vadd.f32 %v257_v26, %v1523_v21  ;;  %v433_v22 = vld [vmem:[%s1448_s0 + $0xf8] sm:$0xff]  ;;  %v448_v43 = vld [vmem:[%s1448_s0 + $0x170] sm:$0xff] }
  0xbb   :  { %v525_v3 = vadd.f32 %v461_v28, %v397_v4  ;;  %556 = vst [vmem:[#allocation2 + $0xd0] sm:$0xff] %v492_v37  ;;  %557 = vst [vmem:[#allocation2 + $0xd8] sm:$0xff] %v493_v58  ;;  %v298_v54 = vadd.f32 %v257_v26, %v1524_v59  ;;  %v299_v62 = vadd.f32 %v257_v26, %v1525_v8  ;;  %v346_v24 = vmax.f32 %v282_v7, 0.0  ;;  %v1531_v28 = vld [vmem:[#allocation15_spill] sm:$0xff]  ;;  %v449_v4 = vld [vmem:[%s1448_s0 + $0x178] sm:$0xff]  ;;  %v267_v8 = vpop.permute.xlu0 %266 }
  0xbc   :  { %572 = vst [vmem:[#allocation2 + $0x150] sm:$0xff] %v508_v63  ;;  %573 = vst [vmem:[#allocation2 + $0x158] sm:$0xff] %v509_v9  ;;  %v314_v16 = vadd.f32 %v257_v26, %v1526_v6  ;;  %v315_v48 = vadd.f32 %v257_v26, %v1527_v44  ;;  %v330_v50 = vadd.f32 %v257_v26, %v1528_v2  ;;  %v347_v40 = vmax.f32 %v283_v61, 0.0  ;;  %v1535_v55 = vld [vmem:[#allocation19_spill] sm:$0xff]  ;;  %v1536_v58 = vld [vmem:[#allocation20_spill] sm:$0xff] }
  0xbd   :  { %588 = vst [vmem:[#allocation2 + $0x1d0] sm:$0xff] %v524_v60  ;;  %589 = vst [vmem:[#allocation2 + $0x1d8] sm:$0xff] %v525_v3  ;;  %v331_v53 = vadd.f32 %v257_v26, %v1529_v23  ;;  %v362_v33 = vmax.f32 %v298_v54, 0.0  ;;  %v363_v34 = vmax.f32 %v299_v62, 0.0  ;;  %v474_v36 = vadd.f32 %v410_v13, %v346_v24  ;;  %v1534_v26 = vld [vmem:[#allocation18_spill] sm:$0xff]  ;;  %v1537_v9 = vld [vmem:[#allocation21_spill] sm:$0xff] }
  0xbe   :  { %v378_v0 = vmax.f32 %v314_v16, 0.0  ;;  %v379_v52 = vmax.f32 %v315_v48, 0.0  ;;  %v394_v32 = vmax.f32 %v330_v50, 0.0  ;;  %v475_v10 = vadd.f32 %v411_v20, %v347_v40  ;;  %v464_v3 = vld [vmem:[%s1448_s0 + $0x1f0] sm:$0xff]  ;;  %v465_v13 = vld [vmem:[%s1448_s0 + $0x1f8] sm:$0xff]  ;;  %v414_v2 = vld [vmem:[%s1448_s0 + $0x60] sm:$0xff] }
  0xbf   :  { %v395_v35 = vmax.f32 %v331_v53, 0.0  ;;  %v490_v5 = vadd.f32 %v426_v14, %v362_v33  ;;  %v491_v47 = vadd.f32 %v427_v30, %v363_v34  ;;  %538 = vst [vmem:[#allocation2 + $0x40] sm:$0xff] %v474_v36  ;;  %v288_v42 = vadd.f32 %v272_v27, %v1530_v12  ;;  %v415_v50 = vld [vmem:[%s1448_s0 + $0x68] sm:$0xff]  ;;  %v430_v23 = vld [vmem:[%s1448_s0 + $0xe0] sm:$0xff]  ;;  %v1540_v40 = vld [vmem:[#allocation24_spill] sm:$0xff] }
  0xc0   :  { %v506_v57 = vadd.f32 %v442_v15, %v378_v0  ;;  %v507_v45 = vadd.f32 %v443_v1, %v379_v52  ;;  %v522_v49 = vadd.f32 %v458_v17, %v394_v32  ;;  %539 = vst [vmem:[#allocation2 + $0x48] sm:$0xff] %v475_v10  ;;  %v289_v18 = vadd.f32 %v272_v27, %v1531_v28  ;;  %v1538_v53 = vld [vmem:[#allocation22_spill] sm:$0xff]  ;;  %v1541_v34 = vld [vmem:[#allocation25_spill] sm:$0xff]  ;;  %v1543_v10 = vld [vmem:[#allocation27_spill] sm:$0xff] }
  0xc1   :  { %v523_v39 = vadd.f32 %v459_v56, %v395_v35  ;;  %554 = vst [vmem:[#allocation2 + $0xc0] sm:$0xff] %v490_v5  ;;  %555 = vst [vmem:[#allocation2 + $0xc8] sm:$0xff] %v491_v47  ;;  %v304_v25 = vadd.f32 %v272_v27, %v1532_v38  ;;  %v305_v19 = vadd.f32 %v272_v27, %v1533_v41  ;;  %v352_v20 = vmax.f32 %v288_v42, 0.0  ;;  %v1539_v56 = vld [vmem:[#allocation23_spill] sm:$0xff]  ;;  %v431_v52 = vld [vmem:[%s1448_s0 + $0xe8] sm:$0xff] }
  0xc2   :  { %570 = vst [vmem:[#allocation2 + $0x140] sm:$0xff] %v506_v57  ;;  %571 = vst [vmem:[#allocation2 + $0x148] sm:$0xff] %v507_v45  ;;  %v320_v46 = vadd.f32 %v272_v27, %v1534_v26  ;;  %v321_v37 = vadd.f32 %v272_v27, %v1535_v55  ;;  %v336_v63 = vadd.f32 %v272_v27, %v1536_v58  ;;  %v353_v14 = vmax.f32 %v289_v18, 0.0  ;;  %v446_v32 = vld [vmem:[%s1448_s0 + $0x160] sm:$0xff]  ;;  %v447_v35 = vld [vmem:[%s1448_s0 + $0x168] sm:$0xff] }
  0xc3   :  { %586 = vst [vmem:[#allocation2 + $0x1c0] sm:$0xff] %v522_v49  ;;  %587 = vst [vmem:[#allocation2 + $0x1c8] sm:$0xff] %v523_v39  ;;  %v337_v60 = vadd.f32 %v272_v27, %v1537_v9  ;;  %v368_v29 = vmax.f32 %v304_v25, 0.0  ;;  %v369_v7 = vmax.f32 %v305_v19, 0.0  ;;  %v480_v62 = vadd.f32 %v416_v51, %v352_v20  ;;  %v1542_v27 = vld [vmem:[#allocation26_spill] sm:$0xff]  ;;  %v1544_v47 = vld [vmem:[#allocation28_spill] sm:$0xff] }
  0xc4   :  { %v384_v21 = vmax.f32 %v320_v46, 0.0  ;;  %v385_v61 = vmax.f32 %v321_v37, 0.0  ;;  %v400_v59 = vmax.f32 %v336_v63, 0.0  ;;  %v481_v30 = vadd.f32 %v417_v31, %v353_v14  ;;  %v1545_v45 = vld [vmem:[#allocation29_spill] sm:$0xff]  ;;  %v463_v51 = vld [vmem:[%s1448_s0 + $0x1e8] sm:$0xff] }
  0xc5   :  { %v401_v54 = vmax.f32 %v337_v60, 0.0  ;;  %v496_v15 = vadd.f32 %v432_v11, %v368_v29  ;;  %v497_v1 = vadd.f32 %v433_v22, %v369_v7  ;;  %544 = vst [vmem:[#allocation2 + $0x70] sm:$0xff] %v480_v62  ;;  %v286_v17 = vadd.f32 %v267_v8, %v1538_v53  ;;  %v462_v39 = vld [vmem:[%s1448_s0 + $0x1e0] sm:$0xff]  ;;  %s616_s0 = scalar_lea.vmem %s1429_s9, 8192 }
  0xc6   :  { %v512_v6 = vadd.f32 %v448_v43, %v384_v21  ;;  %v513_v16 = vadd.f32 %v449_v4, %v385_v61  ;;  %v528_v44 = vadd.f32 %v464_v3, %v400_v59  ;;  %545 = vst [vmem:[#allocation2 + $0x78] sm:$0xff] %v481_v30  ;;  %v287_v24 = vadd.f32 %v267_v8, %v1539_v56  ;;  %p617_p0 = scmp.ne.s32.totalorder %s1429_s9, %s616_s0  ;;  %p622_p2 = scmp.lt.s32.totalorder %s616_s0, %s616_s0 }
  0xc7   :  { %v529_v48 = vadd.f32 %v465_v13, %v401_v54  ;;  %560 = vst [vmem:[#allocation2 + $0xf0] sm:$0xff] %v496_v15  ;;  %561 = vst [vmem:[#allocation2 + $0xf8] sm:$0xff] %v497_v1  ;;  %v302_v33 = vadd.f32 %v267_v8, %v1540_v40  ;;  %v303_v0 = vadd.f32 %v267_v8, %v1541_v34  ;;  %v350_v31 = vmax.f32 %v286_v17, 0.0 }
  0xc8   :  { %576 = vst [vmem:[#allocation2 + $0x170] sm:$0xff] %v512_v6  ;;  %577 = vst [vmem:[#allocation2 + $0x178] sm:$0xff] %v513_v16  ;;  %v318_v36 = vadd.f32 %v267_v8, %v1542_v27  ;;  %v319_v5 = vadd.f32 %v267_v8, %v1543_v10  ;;  %v334_v57 = vadd.f32 %v267_v8, %v1544_v47  ;;  %v351_v11 = vmax.f32 %v287_v24, 0.0  ;;  %p623_p3 = por %p622_p2, %p621_p1 }
  0xc9   :  { %592 = vst [vmem:[#allocation2 + $0x1f0] sm:$0xff] %v528_v44  ;;  %593 = vst [vmem:[#allocation2 + $0x1f8] sm:$0xff] %v529_v48  ;;  %v335_v49 = vadd.f32 %v267_v8, %v1545_v45  ;;  %v366_v12 = vmax.f32 %v302_v33, 0.0  ;;  %v367_v42 = vmax.f32 %v303_v0, 0.0  ;;  %v478_v41 = vadd.f32 %v414_v2, %v350_v31 }
  0xca   :  { %v382_v28 = vmax.f32 %v318_v36, 0.0  ;;  %v383_v18 = vmax.f32 %v319_v5, 0.0  ;;  %v398_v38 = vmax.f32 %v334_v57, 0.0  ;;  %v479_v19 = vadd.f32 %v415_v50, %v351_v11  ;;  %p624_p4 = pnand %p623_p3, %p617_p0 }
  0xcb   :  { %v399_v25 = vmax.f32 %v335_v49, 0.0  ;;  %v494_v22 = vadd.f32 %v430_v23, %v366_v12  ;;  %v495_v43 = vadd.f32 %v431_v52, %v367_v42  ;;  %542 = vst [vmem:[#allocation2 + $0x60] sm:$0xff] %v478_v41 }
  0xcc   :  { %v510_v4 = vadd.f32 %v446_v32, %v382_v28  ;;  %v511_v26 = vadd.f32 %v447_v35, %v383_v18  ;;  %v526_v46 = vadd.f32 %v462_v39, %v398_v38  ;;  %543 = vst [vmem:[#allocation2 + $0x68] sm:$0xff] %v479_v19 }
  0xcd   :  { %v527_v55 = vadd.f32 %v463_v51, %v399_v25  ;;  %558 = vst [vmem:[#allocation2 + $0xe0] sm:$0xff] %v494_v22  ;;  %559 = vst [vmem:[#allocation2 + $0xe8] sm:$0xff] %v495_v43 }
  0xce   :  { %574 = vst [vmem:[#allocation2 + $0x160] sm:$0xff] %v510_v4  ;;  %575 = vst [vmem:[#allocation2 + $0x168] sm:$0xff] %v511_v26 }
  0xcf   :  { %590 = vst [vmem:[#allocation2 + $0x1e0] sm:$0xff] %v526_v46  ;;  %591 = vst [vmem:[#allocation2 + $0x1e8] sm:$0xff] %v527_v55 }
  0xd0   :  { %627 = shalt.err (!%p624_p4)
}
  0xd1   :  { %s628_s15 = scalar_lea.hbm %s1452_s4, 8192 }
  0xd2   :  { %p629_p5 = scmp.ne.s32.totalorder %s1452_s4, %s628_s15  ;;  %p632_p6 = scmp.lt.u32.totalorder %s628_s15, %s1452_s4 }
  0xd4   :  { %p634_p7 = pnand %p632_p6, %p629_p5 }
  0xd6   :  { %637 = shalt.err (!%p634_p7)
}
  0xd7   :  { %s642_s20 = smov 256   ;;  %s643_s21 = smov 16  }
  0xd8   :  { %605 = dma.vmem_to_hbm [thread:$0]  %s1429_s9, 8192, %s1452_s4, [#allocation3], %s642_s20, %s642_s20, %s643_s21  }
  0xd9   :  { %638 = dma.done.wait [#allocation3], 8192  }
  0xda   :  { %639 = vsyncadd [#allocation3], 4294959104 }
  0xdb   :  { %609 = vsyncpa [#allocation3], 1 }

// kernel: sa_layer_impl.2
= control target key start
LH: loop header
LB: loop body
LE: loop exit
PB: predicated region body
PF: predicated region fallthrough
CT: control target
= control target key end

     0   :  { %s2490_s24 = smov 0   ;;  %s2492_s25 = smov 0   ;;  %s3334_s0 = inlined_call_operand.vmem [shape: f32[4,64,256], index: 0, kind: input, shape index: {}]   ;;  %s3335_s1 = inlined_call_operand.vmem [shape: bf16[80,64], index: 1, kind: input, shape index: {}]   ;;  %s3336_s2 = inlined_call_operand.vmem [shape: f32[80,1], index: 2, kind: input, shape index: {}]   ;;  %s3337_s3 = inlined_call_operand.vmem [shape: bf16[64,64], index: 3, kind: input, shape index: {}]   ;;  %s3338_s4 = inlined_call_operand.vmem [shape: f32[64,1], index: 4, kind: input, shape index: {}]   ;;  %s3339_s5 = inlined_call_operand.vmem [shape: bf16[4,64,256], index: 5, kind: output, shape index: {0}]   ;;  %s3340_s6 = inlined_call_operand.vmem [shape: f32[4,64,1], index: 6, kind: output, shape index: {1}]   ;;  %s3341_s7 = inlined_call_operand.vmem [shape: f32[4,64,1], index: 7, kind: output, shape index: {2}]  }
   0x1   :  { %s2494_s26 = smov 0  }
   0x2 LB: > { %s30_s27 = sadd.s32 1, %s2441_s25  ;;  %p2126_p0 = scmp.ge.s32.totalorder %s2445_s26, 1  ;;  %s2445_s26 = sphi %s2494_s26, %s18_s26   ;;  %s2441_s25 = sphi %s2492_s25, %s3488_s25   ;;  %s2437_s24 = sphi %s2490_s24, %s3487_s24  }
   0x3   : > { %p32_p1 = scmp.ge.s32.totalorder %s30_s27, 4  ;;  %p254_p2 = scmp.lt.s32.totalorder %s2445_s26, 5 }
   0x5   : > { %s3490_s27 = smov (%p32_p1, %s30_s27), 0  ;;  %p255_p3 = pnand %p2126_p0, %p254_p2 }
   0x7   : > { %258 = sbr.rel (%p255_p3) target bundleno = 1656 (0x678), region = 40 }
   0xe   : > { %p296_p4 = scmp.lt.s32.totalorder %s2437_s24, 3  ;;  %v3342_v0 = vmov 0   ;;  %v355_v1 = vld [vmem:[%s3336_s2] sm:$0xff]  ;;  %v356_v2 = vld [vmem:[%s3336_s2 + $0x8] sm:$0xff]  ;;  %vm440_vm0 = vcmask 523264   ;;  %vm629_vm1 = vcmask 130048  }
   0xf   : > { %488 = vmatprep.mubr.bf16.mxu0 %v3342_v0  ;;  %2218 = vset.pattern.permute.xlu0 %v3342_v0  ;;  %v2220_v27 = vld [vmem:[%s3335_s1] sm:$0xff]   ;;  %v2221_v56 = vld [vmem:[%s3335_s1 + $0x8] sm:$0xff]   ;;  %vm1934_vm3 = vcmask 7168  }
  0x10   : > { %s3492_s24 = smov (!%p296_p4, %s2437_s24), 3  ;;  %367 = vperm.xlu0 %2218, %v355_v1   ;;  %710 = vmatprep.mubr.bf16.mxu1 %v3342_v0 }
  0x11   : > { %s2179_s9 = sshll.u32 %s3492_s24, 7  ;;  %s3285_s30 = sshll.u32 %s3492_s24, 6 }
  0x12   : > { %s2523_s12 = scalar_lea.vmem %s3334_s0, %s2179_s9  ;;  %s3291_s10 = scalar_lea.vmem %s3339_s5, %s3285_s30 }
  0x13   : > { %v322_v3 = vld [vmem:[%s2523_s12 + $0x8] sm:$0xff]  ;;  %v324_v4 = vld [vmem:[%s2523_s12 + $0x18] sm:$0xff]  ;;  %v321_v5 = vld [vmem:[%s2523_s12] sm:$0xff]  ;;  %s310_s13 = scalar_lea.vmem %s3340_s6, %s3285_s30  ;;  %s315_s16 = scalar_lea.vmem %s3341_s7, %s3285_s30 }
  0x14   : > { %372 = vperm.xlu0 %2218, %v356_v2   ;;  %v338_v6 = vpack.c.bf16 %v324_v4, %v322_v3  ;;  %v323_v7 = vld [vmem:[%s2523_s12 + $0x10] sm:$0xff]  ;;  %v326_v8 = vld [vmem:[%s2523_s12 + $0x28] sm:$0xff]  ;;  %v328_v9 = vld [vmem:[%s2523_s12 + $0x38] sm:$0xff] }
  0x15   : > { %v337_v10 = vpack.c.bf16 %v323_v7, %v321_v5  ;;  %v340_v11 = vpack.c.bf16 %v328_v9, %v326_v8  ;;  %v325_v12 = vld [vmem:[%s2523_s12 + $0x20] sm:$0xff]  ;;  %v327_v13 = vld [vmem:[%s2523_s12 + $0x30] sm:$0xff]  ;;  %v330_v14 = vld [vmem:[%s2523_s12 + $0x48] sm:$0xff] }
  0x16   : > { %456 = vmatprep.subr.bf16.mxu0 %v338_v6  ;;  %v332_v15 = vld [vmem:[%s2523_s12 + $0x58] sm:$0xff]  ;;  %v339_v16 = vpack.c.bf16 %v327_v13, %v325_v12  ;;  %v329_v17 = vld [vmem:[%s2523_s12 + $0x40] sm:$0xff]  ;;  %v331_v18 = vld [vmem:[%s2523_s12 + $0x50] sm:$0xff] }
  0x17   : > { %457 = vmatpush1.bf16.msra.mxu0 %v337_v10  ;;  %v334_v19 = vld [vmem:[%s2523_s12 + $0x68] sm:$0xff]  ;;  %v342_v20 = vpack.c.bf16 %v332_v15, %v330_v14  ;;  %v336_v21 = vld [vmem:[%s2523_s12 + $0x78] sm:$0xff]  ;;  %v341_v22 = vpack.c.bf16 %v331_v18, %v329_v17  ;;  %v333_v24 = vld [vmem:[%s2523_s12 + $0x60] sm:$0xff] }
  0x18   : > { %458 = vmatprep.subr.bf16.mxu0 %v340_v11  ;;  %v344_v23 = vpack.c.bf16 %v336_v21, %v334_v19  ;;  %v335_v25 = vld [vmem:[%s2523_s12 + $0x70] sm:$0xff] }
  0x19   : > { %v343_v26 = vpack.c.bf16 %v335_v25, %v333_v24 }
  0x1b   : > { %459 = vmatpush1.bf16.msra.mxu0 %v339_v16 }
  0x1c   : > { %460 = vmatprep.subr.bf16.mxu0 %v342_v20 }
  0x1f   : > { %461 = vmatpush1.bf16.msra.mxu0 %v341_v22 }
  0x20   : > { %462 = vmatprep.subr.bf16.mxu0 %v344_v23 }
  0x23   : > { %463 = vmatpush1.bf16.msra.mxu0 %v343_v26 }
  0x26   : > { %2140 = vmatmul.mubr.msk.bf16.vlgmr.msra.gmra.mrb[0].mxu0 %vm440_vm0, %v2220_v27 }
  0x27   : > { %498 = vmatprep.mubr.bf16.mxu0 %v3342_v0 }
  0x2e   : > { %2141 = vmatmul.mubr.msk.bf16.gmra.mrb[4].mxu0 %vm440_vm0, %v2221_v56 }
  0x2f   : > { %508 = vmatprep.mubr.bf16.mxu0 %v3342_v0 }
  0x8f   : > { %v368_v28 = vpop.permute.xlu0 %367 }
  0x93   : > { %v373_v31 = vpop.permute.xlu0 %372 }
  0xf9   : > { %v490_v29 = vpop.f32.mrb[0].mxu0 }
  0xfa   : > { %v492_v30 = vpop.f32.mrb[1].mxu0  ;;  %v491_v33 = vadd.f32 %v490_v29, %v368_v28 }
  0xfb   : > { %v494_v32 = vpop.f32.mrb[2].mxu0  ;;  %v493_v36 = vadd.f32 %v492_v30, %v368_v28 }
  0xfc   : > { %v495_v34 = vadd.f32 %v494_v32, %v373_v31  ;;  %v496_v35 = vpop.f32.mrb[3].mxu0 }
  0xfd   : > { %v497_v37 = vadd.f32 %v496_v35, %v373_v31 }
  0xfe   : > { %v539_v38 = vpack.c.bf16 %v495_v34, %v491_v33 }
  0xff   : > { %v540_v39 = vpack.c.bf16 %v497_v37, %v493_v36 }
 0x100   : > { %597 = vxpose.xlu1.c.b16.start.end [1/1] (short) %v539_v38, 128 }
 0x101   : > { %678 = vmatprep.subr.bf16.mxu1 %v540_v39 }
 0x102   : > { %679 = vmatpush1.bf16.msra.mxu1 %v539_v38 }
 0x11d   : > { %613 = vxpose.xlu1.c.b16.start.end [1/1] (short) %v540_v39, 128 }
 0x121   : > { %2219 = vset.pattern.permute.xlu1 %v3342_v0 }
 0x166   : > { %v605_v40 = vpop.trf.xlu1 }
 0x167   : > { %2145 = vmatmul.mubr.msk.bf16.vlgmr.msra.gmra.mrb[0].mxu1 %vm629_vm1, %v605_v40 }
 0x168   : > { %720 = vmatprep.mubr.bf16.mxu1 %v3342_v0 }
 0x16a   : > { %v606_v41 = vpop.trf.xlu1 }
 0x16e   : > { %v607_v42 = vpop.trf.xlu1 }
 0x16f   : > { %2146 = vmatmul.mubr.msk.bf16.gmra.mrb[4].mxu1 %vm629_vm1, %v606_v41 }
 0x170   : > { %730 = vmatprep.mubr.bf16.mxu1 %v3342_v0 }
 0x172   : > { %v608_v43 = vpop.trf.xlu1 }
 0x176   : > { %v609_v44 = vpop.trf.xlu1 }
 0x177   : > { %2147 = vmatmul.mubr.msk.bf16.gmra.mrb[8].mxu1 %vm629_vm1, %v607_v42 }
 0x178   : > { %740 = vmatprep.mubr.bf16.mxu1 %v3342_v0 }
 0x17a   : > { %v610_v45 = vpop.trf.xlu1 }
 0x17e   : > { %v611_v46 = vpop.trf.xlu1 }
 0x17f   : > { %2148 = vmatmul.mubr.msk.bf16.gmra.mrb[12].mxu1 %vm629_vm1, %v608_v43 }
 0x180   : > { %750 = vmatprep.mubr.bf16.mxu1 %v3342_v0 }
 0x182   : > { %v612_v47 = vpop.trf.xlu1 }
 0x186   : > { %v621_v48 = vpop.trf.xlu1 }
 0x187   : > { %2149 = vmatmul.mubr.msk.bf16.gmra.mrb[16].mxu1 %vm629_vm1, %v609_v44 }
 0x188   : > { %760 = vmatprep.mubr.bf16.mxu1 %v3342_v0 }
 0x18a   : > { %v622_v49 = vpop.trf.xlu1 }
 0x18e   : > { %v623_v50 = vpop.trf.xlu1 }
 0x18f   : > { %2150 = vmatmul.mubr.msk.bf16.gmra.mrb[20].mxu1 %vm629_vm1, %v610_v45 }
 0x190   : > { %770 = vmatprep.mubr.bf16.mxu1 %v3342_v0 }
 0x192   : > { %v624_v51 = vpop.trf.xlu1 }
 0x196   : > { %v625_v52 = vpop.trf.xlu1 }
 0x197   : > { %2151 = vmatmul.mubr.msk.bf16.gmra.mrb[24].mxu1 %vm629_vm1, %v611_v46 }
 0x198   : > { %780 = vmatprep.mubr.bf16.mxu1 %v3342_v0 }
 0x19a   : > { %v626_v53 = vpop.trf.xlu1 }
 0x19e   : > { %v627_v54 = vpop.trf.xlu1 }
 0x19f   : > { %2152 = vmatmul.mubr.msk.bf16.gmra.mrb[28].mxu1 %vm629_vm1, %v612_v47 }
 0x1a0   : > { %790 = vmatprep.mubr.bf16.mxu1 %v3342_v0 }
 0x1a2   : > { %v628_v55 = vpop.trf.xlu1 }
 0x1a7   : > { %2153 = vmatmul.mubr.msk.bf16.gmra.mrb[32].mxu1 %vm629_vm1, %v621_v48 }
 0x1a8   : > { %800 = vmatprep.mubr.bf16.mxu1 %v3342_v0 }
 0x1af   : > { %2154 = vmatmul.mubr.msk.bf16.gmra.mrb[36].mxu1 %vm629_vm1, %v622_v49 }
 0x1b0   : > { %810 = vmatprep.mubr.bf16.mxu1 %v3342_v0 }
 0x1b7   : > { %2155 = vmatmul.mubr.msk.bf16.gmra.mrb[40].mxu1 %vm629_vm1, %v623_v50 }
 0x1b8   : > { %820 = vmatprep.mubr.bf16.mxu1 %v3342_v0 }
 0x1bf   : > { %2156 = vmatmul.mubr.msk.bf16.gmra.mrb[44].mxu1 %vm629_vm1, %v624_v51 }
 0x1c0   : > { %830 = vmatprep.mubr.bf16.mxu1 %v3342_v0 }
 0x1c7   : > { %2157 = vmatmul.mubr.msk.bf16.gmra.mrb[48].mxu1 %vm629_vm1, %v625_v52 }
 0x1c8   : > { %840 = vmatprep.mubr.bf16.mxu1 %v3342_v0 }
 0x1cf   : > { %2158 = vmatmul.mubr.msk.bf16.gmra.mrb[52].mxu1 %vm629_vm1, %v626_v53 }
 0x1d0   : > { %850 = vmatprep.mubr.bf16.mxu1 %v3342_v0 }
 0x1d7   : > { %2159 = vmatmul.mubr.msk.bf16.gmra.mrb[56].mxu1 %vm629_vm1, %v627_v54 }
 0x1d8   : > { %860 = vmatprep.mubr.bf16.mxu1 %v3342_v0 }
 0x1df   : > { %2160 = vmatmul.mubr.msk.bf16.gmra.mrb[60].mxu1 %vm629_vm1, %v628_v55 }
 0x23a   : > { %v2583_v57 = vpop.f32.mrb[0].mxu1 }
 0x23b   : > { %v2585_v58 = vpop.f32.mrb[1].mxu1 }
 0x23c   : > { %v2587_v59 = vpop.f32.mrb[2].mxu1  ;;  %v871_v60 = vmax.f32 %v2583_v57, %v2585_v58 }
 0x23d   : > { %v2591_v61 = vpop.f32.mrb[3].mxu1 }
 0x23e   : > { %872 = vmax.xlane.f32.xlu0 %v871_v60  ;;  %v874_v62 = vmax.f32 %v2587_v59, %v2591_v61 }
 0x240   : > { %875 = vmax.xlane.f32.xlu1 %v874_v62  ;;  %v2222_v62 = vld [vmem:[%s3335_s1 + $0x10] sm:$0xff]  }
 0x241   : > { %2142 = vmatmul.mubr.msk.bf16.gmra.mrb[8].mxu0 %vm440_vm0, %v2222_v62 }
 0x242   : > { %v2595_v63 = vpop.f32.mrb[4].mxu1  ;;  %518 = vmatprep.mubr.bf16.mxu0 %v3342_v0 }
 0x243   : > { %v2597_v1 = vpop.f32.mrb[5].mxu1 }
 0x244   : > { %v2599_v2 = vpop.f32.mrb[6].mxu1  ;;  %v877_v3 = vmax.f32 %v2595_v63, %v2597_v1 }
 0x245   : > { %v2603_v4 = vpop.f32.mrb[7].mxu1 }
 0x246   : > { %878 = vmax.xlane.f32.xlu0 %v877_v3  ;;  %v880_v5 = vmax.f32 %v2599_v2, %v2603_v4 }
 0x24a   : > { %881 = vmax.xlane.f32.xlu0 %v880_v5  ;;  %v2607_v6 = vpop.f32.mrb[8].mxu1 }
 0x24b   : > { %v2609_v7 = vpop.f32.mrb[9].mxu1 }
 0x24c   : > { %v2611_v8 = vpop.f32.mrb[10].mxu1  ;;  %v883_v9 = vmax.f32 %v2607_v6, %v2609_v7 }
 0x24d   : > { %v2615_v10 = vpop.f32.mrb[11].mxu1 }
 0x24e   : > { %884 = vmax.xlane.f32.xlu0 %v883_v9  ;;  %v886_v11 = vmax.f32 %v2611_v8, %v2615_v10 }
 0x252   : > { %887 = vmax.xlane.f32.xlu0 %v886_v11  ;;  %v2619_v12 = vpop.f32.mrb[12].mxu1 }
 0x253   : > { %v2621_v13 = vpop.f32.mrb[13].mxu1 }
 0x254   : > { %v2623_v14 = vpop.f32.mrb[14].mxu1  ;;  %v889_v15 = vmax.f32 %v2619_v12, %v2621_v13 }
 0x255   : > { %v2627_v16 = vpop.f32.mrb[15].mxu1 }
 0x256   : > { %890 = vmax.xlane.f32.xlu0 %v889_v15  ;;  %v892_v17 = vmax.f32 %v2623_v14, %v2627_v16 }
 0x25a   : > { %893 = vmax.xlane.f32.xlu0 %v892_v17  ;;  %v2631_v18 = vpop.f32.mrb[16].mxu1 }
 0x25b   : > { %v2633_v19 = vpop.f32.mrb[17].mxu1 }
 0x25c   : > { %v2635_v20 = vpop.f32.mrb[18].mxu1  ;;  %v895_v21 = vmax.f32 %v2631_v18, %v2633_v19 }
 0x25d   : > { %v2639_v22 = vpop.f32.mrb[19].mxu1 }
 0x25e   : > { %896 = vmax.xlane.f32.xlu0 %v895_v21  ;;  %v898_v23 = vmax.f32 %v2635_v20, %v2639_v22  ;;  %v2223_v21 = vld [vmem:[%s3335_s1 + $0x18] sm:$0xff]  }
 0x25f   : > { %2143 = vmatmul.mubr.msk.bf16.gmra.mrb[12].mxu0 %vm440_vm0, %v2223_v21 }
 0x260   : > { %528 = vmatprep.mubr.bf16.mxu0 %v3342_v0 }
 0x262   : > { %899 = vmax.xlane.f32.xlu0 %v898_v23  ;;  %v2643_v24 = vpop.f32.mrb[20].mxu1 }
 0x263   : > { %v2645_v25 = vpop.f32.mrb[21].mxu1 }
 0x264   : > { %v2647_v26 = vpop.f32.mrb[22].mxu1  ;;  %v901_v27 = vmax.f32 %v2643_v24, %v2645_v25 }
 0x265   : > { %v2651_v28 = vpop.f32.mrb[23].mxu1 }
 0x266   : > { %902 = vmax.xlane.f32.xlu0 %v901_v27  ;;  %v904_v29 = vmax.f32 %v2647_v26, %v2651_v28 }
 0x268   : > { %905 = vmax.xlane.f32.xlu1 %v904_v29 }
 0x26a   : > { %v2655_v30 = vpop.f32.mrb[24].mxu1 }
 0x26b   : > { %v2657_v31 = vpop.f32.mrb[25].mxu1 }
 0x26c   : > { %v2659_v32 = vpop.f32.mrb[26].mxu1  ;;  %v907_v33 = vmax.f32 %v2655_v30, %v2657_v31 }
 0x26d   : > { %v2663_v34 = vpop.f32.mrb[27].mxu1 }
 0x26e   : > { %908 = vmax.xlane.f32.xlu0 %v907_v33  ;;  %v910_v35 = vmax.f32 %v2659_v32, %v2663_v34 }
 0x270   : > { %911 = vmax.xlane.f32.xlu1 %v910_v35 }
 0x272   : > { %v2667_v36 = vpop.f32.mrb[28].mxu1 }
 0x273   : > { %v2669_v37 = vpop.f32.mrb[29].mxu1 }
 0x274   : > { %v2671_v38 = vpop.f32.mrb[30].mxu1  ;;  %v913_v39 = vmax.f32 %v2667_v36, %v2669_v37 }
 0x275   : > { %v2675_v40 = vpop.f32.mrb[31].mxu1 }
 0x276   : > { %914 = vmax.xlane.f32.xlu0 %v913_v39  ;;  %v916_v41 = vmax.f32 %v2671_v38, %v2675_v40 }
 0x278   : > { %917 = vmax.xlane.f32.xlu1 %v916_v41  ;;  %v2224_v41 = vld [vmem:[%s3335_s1 + $0x20] sm:$0xff]  }
 0x279   : > { %2144 = vmatmul.mubr.msk.bf16.gmra.mrb[16].mxu0 %vm440_vm0, %v2224_v41 }
 0x27a   : > { %v2679_v42 = vpop.f32.mrb[32].mxu1 }
 0x27b   : > { %v2681_v43 = vpop.f32.mrb[33].mxu1 }
 0x27c   : > { %v2683_v44 = vpop.f32.mrb[34].mxu1  ;;  %v919_v45 = vmax.f32 %v2679_v42, %v2681_v43 }
 0x27d   : > { %v2687_v46 = vpop.f32.mrb[35].mxu1 }
 0x27e   : > { %920 = vmax.xlane.f32.xlu0 %v919_v45  ;;  %v922_v47 = vmax.f32 %v2683_v44, %v2687_v46 }
 0x280   : > { %923 = vmax.xlane.f32.xlu1 %v922_v47 }
 0x282   : > { %v2691_v48 = vpop.f32.mrb[36].mxu1 }
 0x283   : > { %v2693_v49 = vpop.f32.mrb[37].mxu1 }
 0x284   : > { %v2695_v50 = vpop.f32.mrb[38].mxu1  ;;  %v925_v51 = vmax.f32 %v2691_v48, %v2693_v49 }
 0x285   : > { %v2699_v52 = vpop.f32.mrb[39].mxu1 }
 0x286   : > { %926 = vmax.xlane.f32.xlu0 %v925_v51  ;;  %v928_v53 = vmax.f32 %v2695_v50, %v2699_v52 }
 0x288   : > { %929 = vmax.xlane.f32.xlu1 %v928_v53 }
 0x28a   : > { %v2703_v54 = vpop.f32.mrb[40].mxu1 }
 0x28b   : > { %v2705_v55 = vpop.f32.mrb[41].mxu1 }
 0x28c   : > { %v2707_v56 = vpop.f32.mrb[42].mxu1  ;;  %v931_v60 = vmax.f32 %v2703_v54, %v2705_v55 }
 0x28d   : > { %v2714_v3 = vpop.f32.mrb[43].mxu1 }
 0x28e   : > { %932 = vmax.xlane.f32.xlu0 %v931_v60  ;;  %v934_v5 = vmax.f32 %v2707_v56, %v2714_v3 }
 0x290   : > { %935 = vmax.xlane.f32.xlu1 %v934_v5 }
 0x292   : > { %v2720_v9 = vpop.f32.mrb[44].mxu1 }
 0x293   : > { %v2722_v11 = vpop.f32.mrb[45].mxu1 }
 0x294   : > { %v2724_v15 = vpop.f32.mrb[46].mxu1  ;;  %v937_v17 = vmax.f32 %v2720_v9, %v2722_v11 }
 0x295   : > { %v2731_v23 = vpop.f32.mrb[47].mxu1 }
 0x296   : > { %938 = vmax.xlane.f32.xlu0 %v937_v17  ;;  %v940_v27 = vmax.f32 %v2724_v15, %v2731_v23 }
 0x298   : > { %941 = vmax.xlane.f32.xlu1 %v940_v27 }
 0x29a   : > { %v2737_v29 = vpop.f32.mrb[48].mxu1 }
 0x29b   : > { %3380 = vst [vmem:[#allocation5_spill] sm:$0xff] %v2737_v29  ;;  %v2739_v33 = vpop.f32.mrb[49].mxu1 }
 0x29c   : > { %3381 = vst [vmem:[#allocation6_spill] sm:$0xff] %v2739_v33  ;;  %v2741_v35 = vpop.f32.mrb[50].mxu1  ;;  %v943_v39 = vmax.f32 %v2737_v29, %v2739_v33 }
 0x29d   : > { %3382 = vst [vmem:[#allocation7_spill] sm:$0xff] %v2741_v35  ;;  %v2748_v45 = vpop.f32.mrb[51].mxu1 }
 0x29e   : > { %3383 = vst [vmem:[#allocation8_spill] sm:$0xff] %v2748_v45  ;;  %944 = vmax.xlane.f32.xlu0 %v943_v39  ;;  %v946_v47 = vmax.f32 %v2741_v35, %v2748_v45 }
 0x2a0   : > { %947 = vmax.xlane.f32.xlu1 %v946_v47 }
 0x2a2   : > { %v2753_v51 = vpop.f32.mrb[52].mxu1 }
 0x2a3   : > { %3384 = vst [vmem:[#allocation9_spill] sm:$0xff] %v2753_v51  ;;  %v2755_v53 = vpop.f32.mrb[53].mxu1 }
 0x2a4   : > { %3385 = vst [vmem:[#allocation10_spill] sm:$0xff] %v2755_v53  ;;  %v2757_v60 = vpop.f32.mrb[54].mxu1  ;;  %v949_v62 = vmax.f32 %v2753_v51, %v2755_v53 }
 0x2a5   : > { %3386 = vst [vmem:[#allocation11_spill] sm:$0xff] %v2757_v60  ;;  %v2761_v5 = vpop.f32.mrb[55].mxu1 }
 0x2a6   : > { %3387 = vst [vmem:[#allocation12_spill] sm:$0xff] %v2761_v5  ;;  %950 = vmax.xlane.f32.xlu0 %v949_v62  ;;  %v952_v17 = vmax.f32 %v2757_v60, %v2761_v5 }
 0x2a8   : > { %953 = vmax.xlane.f32.xlu1 %v952_v17 }
 0x2aa   : > { %v2765_v21 = vpop.f32.mrb[56].mxu1 }
 0x2ab   : > { %3388 = vst [vmem:[#allocation13_spill] sm:$0xff] %v2765_v21  ;;  %v2767_v27 = vpop.f32.mrb[57].mxu1 }
 0x2ac   : > { %3389 = vst [vmem:[#allocation14_spill] sm:$0xff] %v2767_v27  ;;  %v2769_v39 = vpop.f32.mrb[58].mxu1  ;;  %v955_v41 = vmax.f32 %v2765_v21, %v2767_v27 }
 0x2ad   : > { %3390 = vst [vmem:[#allocation15_spill] sm:$0xff] %v2769_v39  ;;  %v2773_v47 = vpop.f32.mrb[59].mxu1 }
 0x2ae   : > { %3391 = vst [vmem:[#allocation16_spill] sm:$0xff] %v2773_v47  ;;  %956 = vmax.xlane.f32.xlu0 %v955_v41  ;;  %v958_v0 = vmax.f32 %v2769_v39, %v2773_v47  ;;  %v357_v41 = vld [vmem:[%s3336_s2 + $0x10] sm:$0xff]  ;;  %v2795_v47 = vpop.f32.mrb[4].mxu0 }
 0x2af   : > { %3396 = vst [vmem:[#allocation21_spill] sm:$0xff] %v2795_v47  ;;  %v2797_v39 = vpop.f32.mrb[5].mxu0 }
 0x2b0   : > { %959 = vmax.xlane.f32.xlu1 %v958_v0  ;;  %v358_v0 = vld [vmem:[%s3336_s2 + $0x18] sm:$0xff]  ;;  %3397 = vst [vmem:[#allocation22_spill] sm:$0xff] %v2797_v39 }
 0x2b2   : > { %v2777_v62 = vpop.f32.mrb[60].mxu1 }
 0x2b3   : > { %3392 = vst [vmem:[#allocation17_spill] sm:$0xff] %v2777_v62  ;;  %v2779_v5 = vpop.f32.mrb[61].mxu1 }
 0x2b4   : > { %3393 = vst [vmem:[#allocation18_spill] sm:$0xff] %v2779_v5  ;;  %v2781_v17 = vpop.f32.mrb[62].mxu1  ;;  %v961_v60 = vmax.f32 %v2777_v62, %v2779_v5  ;;  %v2799_v5 = vpop.f32.mrb[6].mxu0 }
 0x2b5   : > { %3394 = vst [vmem:[#allocation19_spill] sm:$0xff] %v2781_v17  ;;  %v2785_v53 = vpop.f32.mrb[63].mxu1  ;;  %3398 = vst [vmem:[#allocation23_spill] sm:$0xff] %v2799_v5  ;;  %v2801_v62 = vpop.f32.mrb[7].mxu0 }
 0x2b6   : > { %3395 = vst [vmem:[#allocation20_spill] sm:$0xff] %v2785_v53  ;;  %v964_v27 = vmax.f32 %v2781_v17, %v2785_v53  ;;  %962 = vmax.xlane.f32.xlu0 %v961_v60  ;;  %3399 = vst [vmem:[#allocation24_spill] sm:$0xff] %v2801_v62 }
 0x2b8   : > { %965 = vmax.xlane.f32.xlu1 %v964_v27 }
 0x2c9   : > { %382 = vperm.xlu1 %2219, %v358_v0  }
 0x2cb   : > { %v873_v60 = vpop.xlane.xlu0 %872 }
 0x2cc   : > { %377 = vperm.xlu0 %2218, %v357_v41   ;;  %v967_v53 = vsub.f32 %v2583_v57, %v873_v60  ;;  %v968_v0 = vsub.f32 %v2585_v58, %v873_v60 }
 0x2cd   : > { %v876_v27 = vpop.xlane.xlu1 %875 }
 0x2ce   : > { %v969_v21 = vsub.f32 %v2587_v59, %v876_v27  ;;  %v970_v51 = vsub.f32 %v2591_v61, %v876_v27  ;;  %v1031_v45 = vmul.f32 1.442695, %v967_v53  ;;  %v1033_v41 = vmul.f32 1.442695, %v968_v0 }
 0x2d0   : > { %v1035_v35 = vmul.f32 1.442695, %v969_v21  ;;  %v1037_v33 = vmul.f32 1.442695, %v970_v51  ;;  %2229 = vpow2.f32 %v1031_v45 }
 0x2d1   : > { %2231 = vpow2.f32 %v1033_v41 }
 0x2d2   : > { %2233 = vpow2.f32 %v1035_v35 }
 0x2d3   : > { %v879_v17 = vpop.xlane.xlu0 %878  ;;  %2235 = vpow2.f32 %v1037_v33 }
 0x2d4   : > { %v971_v47 = vsub.f32 %v2595_v63, %v879_v17  ;;  %v972_v5 = vsub.f32 %v2597_v1, %v879_v17 }
 0x2d6   : > { %v1039_v29 = vmul.f32 1.442695, %v971_v47  ;;  %v1041_v59 = vmul.f32 1.442695, %v972_v5 }
 0x2d7   : > { %v882_v39 = vpop.xlane.xlu0 %881 }
 0x2d8   : > { %v973_v62 = vsub.f32 %v2599_v2, %v882_v39  ;;  %v974_v57 = vsub.f32 %v2603_v4, %v882_v39  ;;  %2237 = vpow2.f32 %v1039_v29 }
 0x2d9   : > { %2239 = vpow2.f32 %v1041_v59 }
 0x2da   : > { %v1043_v63 = vmul.f32 1.442695, %v973_v62  ;;  %v1045_v60 = vmul.f32 1.442695, %v974_v57  ;;  %v2817_v29 = vpop.eup %2229 }
 0x2db   : > { %v885_v58 = vpop.xlane.xlu0 %884  ;;  %v2819_v35 = vpop.eup %2231 }
 0x2dc   : > { %v975_v61 = vsub.f32 %v2607_v6, %v885_v58  ;;  %v976_v53 = vsub.f32 %v2609_v7, %v885_v58  ;;  %2241 = vpow2.f32 %v1043_v63 }
 0x2dd   : > { %2243 = vpow2.f32 %v1045_v60 }
 0x2de   : > { %v1047_v1 = vmul.f32 1.442695, %v975_v61  ;;  %v1049_v2 = vmul.f32 1.442695, %v976_v53 }
 0x2df   : > { %v888_v21 = vpop.xlane.xlu0 %887 }
 0x2e0   : > { %v977_v4 = vsub.f32 %v2611_v8, %v888_v21  ;;  %v978_v45 = vsub.f32 %v2615_v10, %v888_v21  ;;  %2245 = vpow2.f32 %v1047_v1  ;;  %v2821_v10 = vpop.eup %2233 }
 0x2e1   : > { %2247 = vpow2.f32 %v1049_v2  ;;  %v2823_v62 = vpop.eup %2235 }
 0x2e2   : > { %v1051_v51 = vmul.f32 1.442695, %v977_v4  ;;  %v1053_v5 = vmul.f32 1.442695, %v978_v45  ;;  %v2827_v27 = vpop.eup %2237  ;;  %v1162_v61 = vadd.f32 %v2823_v62, %v2821_v10 }
 0x2e3   : > { %v891_v6 = vpop.xlane.xlu0 %890  ;;  %v2831_v0 = vpop.eup %2239 }
 0x2e4   : > { %v979_v7 = vsub.f32 %v2619_v12, %v891_v6  ;;  %v980_v33 = vsub.f32 %v2621_v13, %v891_v6  ;;  %2249 = vpow2.f32 %v1051_v51  ;;  %v1159_v13 = vadd.f32 %v2819_v35, %v2817_v29 }
 0x2e5   : > { %2251 = vpow2.f32 %v1053_v5  ;;  %v1165_v60 = vadd.f32 %v2831_v0, %v2827_v27 }
 0x2e6   : > { %v1055_v8 = vmul.f32 1.442695, %v979_v7  ;;  %v1057_v39 = vmul.f32 1.442695, %v980_v33  ;;  %v2833_v58 = vpop.eup %2241 }
 0x2e7   : > { %v894_v47 = vpop.xlane.xlu0 %893 }
 0x2e8   : > { %2253 = vpow2.f32 %v1055_v8  ;;  %v981_v17 = vsub.f32 %v2623_v14, %v894_v47  ;;  %v982_v12 = vsub.f32 %v2627_v16, %v894_v47  ;;  %v2837_v14 = vpop.eup %2243 }
 0x2e9   : > { %2255 = vpow2.f32 %v1057_v39 }
 0x2ea   : > { %v1059_v41 = vmul.f32 1.442695, %v981_v17  ;;  %v1061_v57 = vmul.f32 1.442695, %v982_v12  ;;  %v2841_v63 = vpop.eup %2245 }
 0x2eb   : > { %v897_v59 = vpop.xlane.xlu0 %896  ;;  %1160 = vadd.xlane.f32.xlu0 %v1159_v13  ;;  %v2845_v1 = vpop.eup %2247 }
 0x2ec   : > { %2257 = vpow2.f32 %v1059_v41  ;;  %v983_v16 = vsub.f32 %v2631_v18, %v897_v59  ;;  %v984_v53 = vsub.f32 %v2633_v19, %v897_v59  ;;  %v1168_v18 = vadd.f32 %v2837_v14, %v2833_v58 }
 0x2ed   : > { %2259 = vpow2.f32 %v1061_v57  ;;  %1163 = vadd.xlane.f32.xlu1 %v1162_v61  ;;  %v1171_v6 = vadd.f32 %v2845_v1, %v2841_v63 }
 0x2ee   : > { %v1063_v21 = vmul.f32 1.442695, %v983_v16  ;;  %v1065_v2 = vmul.f32 1.442695, %v984_v53  ;;  %v2847_v4 = vpop.eup %2249 }
 0x2ef   : > { %v900_v45 = vpop.xlane.xlu0 %899  ;;  %1166 = vadd.xlane.f32.xlu0 %v1165_v60  ;;  %v2851_v51 = vpop.eup %2251 }
 0x2f0   : > { %2261 = vpow2.f32 %v1063_v21  ;;  %v985_v19 = vsub.f32 %v2635_v20, %v900_v45  ;;  %v986_v5 = vsub.f32 %v2639_v22, %v900_v45  ;;  %v1174_v17 = vadd.f32 %v2851_v51, %v2847_v4 }
 0x2f1   : > { %2263 = vpow2.f32 %v1065_v2  ;;  %1169 = vadd.xlane.f32.xlu1 %v1168_v18 }
 0x2f2   : > { %v2857_v7 = vpop.eup %2253  ;;  %v1067_v33 = vmul.f32 1.442695, %v985_v19  ;;  %v1069_v8 = vmul.f32 1.442695, %v986_v5 }
 0x2f3   : > { %v2859_v39 = vpop.eup %2255  ;;  %v903_v47 = vpop.xlane.xlu0 %902  ;;  %1172 = vadd.xlane.f32.xlu0 %v1171_v6 }
 0x2f4   : > { %2265 = vpow2.f32 %v1067_v33  ;;  %v987_v20 = vsub.f32 %v2643_v24, %v903_v47  ;;  %v988_v22 = vsub.f32 %v2645_v25, %v903_v47  ;;  %v1177_v13 = vadd.f32 %v2859_v39, %v2857_v7 }
 0x2f5   : > { %2267 = vpow2.f32 %v1069_v8  ;;  %v906_v12 = vpop.xlane.xlu1 %905  ;;  %1175 = vadd.xlane.f32.xlu1 %v1174_v17 }
 0x2f6   : > { %v2867_v41 = vpop.eup %2257  ;;  %v1071_v57 = vmul.f32 1.442695, %v987_v20  ;;  %v1073_v59 = vmul.f32 1.442695, %v988_v22  ;;  %v989_v61 = vsub.f32 %v2647_v26, %v906_v12  ;;  %v990_v16 = vsub.f32 %v2651_v28, %v906_v12 }
 0x2f7   : > { %v2871_v53 = vpop.eup %2259  ;;  %1178 = vadd.xlane.f32.xlu0 %v1177_v13 }
 0x2f8   : > { %2269 = vpow2.f32 %v1071_v57  ;;  %v1075_v24 = vmul.f32 1.442695, %v989_v61  ;;  %v1077_v25 = vmul.f32 1.442695, %v990_v16  ;;  %v1180_v60 = vadd.f32 %v2871_v53, %v2867_v41 }
 0x2f9   : > { %2271 = vpow2.f32 %v1073_v59 }
 0x2fa   : > { %v2875_v21 = vpop.eup %2261  ;;  %2273 = vpow2.f32 %v1075_v24  ;;  %1181 = vadd.xlane.f32.xlu1 %v1180_v60 }
 0x2fb   : > { %v2877_v2 = vpop.eup %2263  ;;  %2275 = vpow2.f32 %v1077_v25  ;;  %v909_v26 = vpop.xlane.xlu0 %908 }
 0x2fc   : > { %v991_v28 = vsub.f32 %v2655_v30, %v909_v26  ;;  %v992_v45 = vsub.f32 %v2657_v31, %v909_v26  ;;  %v1183_v18 = vadd.f32 %v2877_v2, %v2875_v21 }
 0x2fd   : > { %v912_v19 = vpop.xlane.xlu1 %911 }
 0x2fe   : > { %v2883_v5 = vpop.eup %2265  ;;  %v1079_v6 = vmul.f32 1.442695, %v991_v28  ;;  %v1081_v33 = vmul.f32 1.442695, %v992_v45  ;;  %v993_v8 = vsub.f32 %v2659_v32, %v912_v19  ;;  %v994_v47 = vsub.f32 %v2663_v34, %v912_v19  ;;  %1184 = vadd.xlane.f32.xlu0 %v1183_v18 }
 0x2ff   : > { %v2887_v17 = vpop.eup %2267 }
 0x300   : > { %2277 = vpow2.f32 %v1079_v6  ;;  %v1083_v20 = vmul.f32 1.442695, %v993_v8  ;;  %v1085_v30 = vmul.f32 1.442695, %v994_v47  ;;  %v1186_v31 = vadd.f32 %v2887_v17, %v2883_v5 }
 0x301   : > { %2279 = vpow2.f32 %v1081_v33 }
 0x302   : > { %v2891_v22 = vpop.eup %2269  ;;  %2281 = vpow2.f32 %v1083_v20  ;;  %1187 = vadd.xlane.f32.xlu1 %v1186_v31 }
 0x303   : > { %v2893_v12 = vpop.eup %2271  ;;  %2283 = vpow2.f32 %v1085_v30  ;;  %v915_v32 = vpop.xlane.xlu0 %914 }
 0x304   : > { %v2895_v13 = vpop.eup %2273  ;;  %v995_v34 = vsub.f32 %v2667_v36, %v915_v32  ;;  %v996_v57 = vsub.f32 %v2669_v37, %v915_v32  ;;  %v1189_v59 = vadd.f32 %v2893_v12, %v2891_v22 }
 0x305   : > { %v2901_v61 = vpop.eup %2275  ;;  %v918_v16 = vpop.xlane.xlu1 %917 }
 0x306   : > { %v1087_v24 = vmul.f32 1.442695, %v995_v34  ;;  %v1089_v25 = vmul.f32 1.442695, %v996_v57  ;;  %v997_v60 = vsub.f32 %v2671_v38, %v918_v16  ;;  %v998_v26 = vsub.f32 %v2675_v40, %v918_v16  ;;  %1190 = vadd.xlane.f32.xlu0 %v1189_v59 }
 0x307   : > { %v1192_v28 = vadd.f32 %v2901_v61, %v2895_v13 }
 0x308   : > { %2285 = vpow2.f32 %v1087_v24  ;;  %v1091_v36 = vmul.f32 1.442695, %v997_v60  ;;  %v1093_v45 = vmul.f32 1.442695, %v998_v26 }
 0x309   : > { %2287 = vpow2.f32 %v1089_v25  ;;  %1193 = vadd.xlane.f32.xlu1 %v1192_v28 }
 0x30a   : > { %v2907_v37 = vpop.eup %2277  ;;  %2289 = vpow2.f32 %v1091_v36 }
 0x30b   : > { %v2909_v18 = vpop.eup %2279  ;;  %2291 = vpow2.f32 %v1093_v45  ;;  %v921_v19 = vpop.xlane.xlu0 %920 }
 0x30c   : > { %v2911_v6 = vpop.eup %2281  ;;  %v999_v38 = vsub.f32 %v2679_v42, %v921_v19  ;;  %v1000_v40 = vsub.f32 %v2681_v43, %v921_v19  ;;  %v1195_v33 = vadd.f32 %v2909_v18, %v2907_v37 }
 0x30d   : > { %v2917_v8 = vpop.eup %2283  ;;  %v924_v47 = vpop.xlane.xlu1 %923 }
 0x30e   : > { %v1095_v20 = vmul.f32 1.442695, %v999_v38  ;;  %v1097_v30 = vmul.f32 1.442695, %v1000_v40  ;;  %v1001_v31 = vsub.f32 %v2683_v44, %v924_v47  ;;  %v1002_v32 = vsub.f32 %v2687_v46, %v924_v47  ;;  %1196 = vadd.xlane.f32.xlu0 %v1195_v33 }
 0x30f   : > { %v1198_v34 = vadd.f32 %v2917_v8, %v2911_v6 }
 0x310   : > { %2293 = vpow2.f32 %v1095_v20  ;;  %v1099_v42 = vmul.f32 1.442695, %v1001_v31  ;;  %v1101_v57 = vmul.f32 1.442695, %v1002_v32 }
 0x311   : > { %2295 = vpow2.f32 %v1097_v30  ;;  %1199 = vadd.xlane.f32.xlu1 %v1198_v34 }
 0x312   : > { %v2923_v43 = vpop.eup %2285  ;;  %2297 = vpow2.f32 %v1099_v42 }
 0x313   : > { %v2925_v59 = vpop.eup %2287  ;;  %2299 = vpow2.f32 %v1101_v57  ;;  %v927_v16 = vpop.xlane.xlu0 %926 }
 0x314   : > { %v2927_v24 = vpop.eup %2289  ;;  %v1003_v44 = vsub.f32 %v2691_v48, %v927_v16  ;;  %v1004_v46 = vsub.f32 %v2693_v49, %v927_v16  ;;  %v1201_v25 = vadd.f32 %v2925_v59, %v2923_v43 }
 0x315   : > { %v2933_v60 = vpop.eup %2291  ;;  %v930_v26 = vpop.xlane.xlu1 %929 }
 0x316   : > { %v1103_v28 = vmul.f32 1.442695, %v1003_v44  ;;  %v1105_v36 = vmul.f32 1.442695, %v1004_v46  ;;  %v1005_v45 = vsub.f32 %v2695_v50, %v930_v26  ;;  %v1006_v19 = vsub.f32 %v2699_v52, %v930_v26  ;;  %1202 = vadd.xlane.f32.xlu0 %v1201_v25 }
 0x317   : > { %v1204_v38 = vadd.f32 %v2933_v60, %v2927_v24 }
 0x318   : > { %2301 = vpow2.f32 %v1103_v28  ;;  %v1107_v48 = vmul.f32 1.442695, %v1005_v45  ;;  %v1109_v40 = vmul.f32 1.442695, %v1006_v19 }
 0x319   : > { %2303 = vpow2.f32 %v1105_v36  ;;  %1205 = vadd.xlane.f32.xlu1 %v1204_v38 }
 0x31a   : > { %v2939_v49 = vpop.eup %2293  ;;  %2305 = vpow2.f32 %v1107_v48 }
 0x31b   : > { %v2941_v33 = vpop.eup %2295  ;;  %2307 = vpow2.f32 %v1109_v40  ;;  %v933_v47 = vpop.xlane.xlu0 %932 }
 0x31c   : > { %v2943_v20 = vpop.eup %2297  ;;  %v1007_v50 = vsub.f32 %v2703_v54, %v933_v47  ;;  %v1008_v52 = vsub.f32 %v2705_v55, %v933_v47  ;;  %v1207_v30 = vadd.f32 %v2941_v33, %v2939_v49 }
 0x31d   : > { %v2949_v31 = vpop.eup %2299  ;;  %v936_v32 = vpop.xlane.xlu1 %935 }
 0x31e   : > { %v1111_v34 = vmul.f32 1.442695, %v1007_v50  ;;  %v1113_v42 = vmul.f32 1.442695, %v1008_v52  ;;  %v1009_v57 = vsub.f32 %v2707_v56, %v936_v32  ;;  %v1010_v16 = vsub.f32 %v2714_v3, %v936_v32  ;;  %1208 = vadd.xlane.f32.xlu0 %v1207_v30 }
 0x31f   : > { %v1210_v44 = vadd.f32 %v2949_v31, %v2943_v20 }
 0x320   : > { %2309 = vpow2.f32 %v1111_v34  ;;  %v1115_v54 = vmul.f32 1.442695, %v1009_v57  ;;  %v1117_v46 = vmul.f32 1.442695, %v1010_v16 }
 0x321   : > { %2311 = vpow2.f32 %v1113_v42  ;;  %1211 = vadd.xlane.f32.xlu1 %v1210_v44  ;;  %v3401_v42 = vld [vmem:[#allocation6_spill] sm:$0xff] }
 0x322   : > { %v2955_v55 = vpop.eup %2301  ;;  %2313 = vpow2.f32 %v1115_v54 }
 0x323   : > { %v2957_v25 = vpop.eup %2303  ;;  %2315 = vpow2.f32 %v1117_v46  ;;  %v939_v26 = vpop.xlane.xlu0 %938 }
 0x324   : > { %v2959_v28 = vpop.eup %2305  ;;  %v1011_v56 = vsub.f32 %v2720_v9, %v939_v26  ;;  %v1012_v3 = vsub.f32 %v2722_v11, %v939_v26  ;;  %v1213_v36 = vadd.f32 %v2957_v25, %v2955_v55 }
 0x325   : > { %v2965_v45 = vpop.eup %2307  ;;  %v942_v19 = vpop.xlane.xlu1 %941 }
 0x326   : > { %v1119_v38 = vmul.f32 1.442695, %v1011_v56  ;;  %v1121_v48 = vmul.f32 1.442695, %v1012_v3  ;;  %v1013_v40 = vsub.f32 %v2724_v15, %v942_v19  ;;  %v1014_v47 = vsub.f32 %v2731_v23, %v942_v19  ;;  %1214 = vadd.xlane.f32.xlu0 %v1213_v36  ;;  %v3400_v15 = vld [vmem:[#allocation5_spill] sm:$0xff]  ;;  %v3402_v56 = vld [vmem:[#allocation7_spill] sm:$0xff] }
 0x327   : > { %v1216_v50 = vadd.f32 %v2965_v45, %v2959_v28  ;;  %v3403_v36 = vld [vmem:[#allocation8_spill] sm:$0xff] }
 0x328   : > { %2317 = vpow2.f32 %v1119_v38  ;;  %v1123_v9 = vmul.f32 1.442695, %v1013_v40  ;;  %v1125_v52 = vmul.f32 1.442695, %v1014_v47 }
 0x329   : > { %2319 = vpow2.f32 %v1121_v48  ;;  %1217 = vadd.xlane.f32.xlu1 %v1216_v50 }
 0x32a   : > { %v2971_v11 = vpop.eup %2309  ;;  %2321 = vpow2.f32 %v1123_v9 }
 0x32b   : > { %v2973_v30 = vpop.eup %2311  ;;  %2323 = vpow2.f32 %v1125_v52  ;;  %v945_v32 = vpop.xlane.xlu0 %944 }
 0x32c   : > { %v2975_v34 = vpop.eup %2313  ;;  %v1015_v23 = vsub.f32 %v3400_v15, %v945_v32  ;;  %v1016_v57 = vsub.f32 %v3401_v42, %v945_v32  ;;  %v1219_v16 = vadd.f32 %v2973_v30, %v2971_v11  ;;  %v3406_v32 = vld [vmem:[#allocation9_spill] sm:$0xff] }
 0x32d   : > { %v2981_v44 = vpop.eup %2315  ;;  %v948_v54 = vpop.xlane.xlu1 %947 }
 0x32e   : > { %v1127_v46 = vmul.f32 1.442695, %v1015_v23  ;;  %v1129_v26 = vmul.f32 1.442695, %v1016_v57  ;;  %v1017_v3 = vsub.f32 %v3402_v56, %v948_v54  ;;  %v1018_v19 = vsub.f32 %v3403_v36, %v948_v54  ;;  %1220 = vadd.xlane.f32.xlu0 %v1219_v16  ;;  %v3407_v23 = vld [vmem:[#allocation10_spill] sm:$0xff]  ;;  %v3409_v56 = vld [vmem:[#allocation11_spill] sm:$0xff] }
 0x32f   : > { %v1222_v38 = vadd.f32 %v2981_v44, %v2975_v34  ;;  %v3410_v36 = vld [vmem:[#allocation12_spill] sm:$0xff] }
 0x330   : > { %2325 = vpow2.f32 %v1127_v46  ;;  %v1131_v48 = vmul.f32 1.442695, %v1017_v3  ;;  %v1133_v40 = vmul.f32 1.442695, %v1018_v19 }
 0x331   : > { %2327 = vpow2.f32 %v1129_v26  ;;  %1223 = vadd.xlane.f32.xlu1 %v1222_v38 }
 0x332   : > { %v2987_v47 = vpop.eup %2317  ;;  %2329 = vpow2.f32 %v1131_v48 }
 0x333   : > { %3404 = vst [vmem:[#allocation5_spill] sm:$0xff] %v2987_v47  ;;  %v2989_v50 = vpop.eup %2319  ;;  %2331 = vpow2.f32 %v1133_v40  ;;  %v951_v9 = vpop.xlane.xlu0 %950 }
 0x334   : > { %v2991_v52 = vpop.eup %2321  ;;  %v1019_v15 = vsub.f32 %v3406_v32, %v951_v9  ;;  %v1020_v42 = vsub.f32 %v3407_v23, %v951_v9  ;;  %v1225_v57 = vadd.f32 %v2989_v50, %v2987_v47  ;;  %v3418_v47 = vld [vmem:[#allocation16_spill] sm:$0xff] }
 0x335   : > { %3405 = vst [vmem:[#allocation6_spill] sm:$0xff] %v2991_v52  ;;  %v2997_v16 = vpop.eup %2323  ;;  %v954_v54 = vpop.xlane.xlu1 %953 }
 0x336   : > { %3408 = vst [vmem:[#allocation7_spill] sm:$0xff] %v2997_v16  ;;  %v1135_v46 = vmul.f32 1.442695, %v1019_v15  ;;  %v1137_v26 = vmul.f32 1.442695, %v1020_v42  ;;  %v1021_v3 = vsub.f32 %v3409_v56, %v954_v54  ;;  %v1022_v19 = vsub.f32 %v3410_v36, %v954_v54  ;;  %1226 = vadd.xlane.f32.xlu0 %v1225_v57  ;;  %v3414_v42 = vld [vmem:[#allocation13_spill] sm:$0xff] }
 0x337   : > { %v1228_v38 = vadd.f32 %v2997_v16, %v2991_v52  ;;  %v3415_v57 = vld [vmem:[#allocation14_spill] sm:$0xff] }
 0x338   : > { %2333 = vpow2.f32 %v1135_v46  ;;  %v1139_v48 = vmul.f32 1.442695, %v1021_v3  ;;  %v1141_v40 = vmul.f32 1.442695, %v1022_v19 }
 0x339   : > { %2335 = vpow2.f32 %v1137_v26  ;;  %1229 = vadd.xlane.f32.xlu1 %v1228_v38  ;;  %v3417_v38 = vld [vmem:[#allocation15_spill] sm:$0xff] }
 0x33a   : > { %v3003_v9 = vpop.eup %2325  ;;  %2337 = vpow2.f32 %v1139_v48 }
 0x33b   : > { %3411 = vst [vmem:[#allocation8_spill] sm:$0xff] %v3003_v9  ;;  %v3005_v32 = vpop.eup %2327  ;;  %2339 = vpow2.f32 %v1141_v40  ;;  %v957_v15 = vpop.xlane.xlu0 %956 }
 0x33c   : > { %3412 = vst [vmem:[#allocation9_spill] sm:$0xff] %v3005_v32  ;;  %v3007_v23 = vpop.eup %2329  ;;  %v1023_v54 = vsub.f32 %v3414_v42, %v957_v15  ;;  %v1024_v56 = vsub.f32 %v3415_v57, %v957_v15  ;;  %v1231_v46 = vadd.f32 %v3005_v32, %v3003_v9 }
 0x33d   : > { %3413 = vst [vmem:[#allocation10_spill] sm:$0xff] %v3007_v23  ;;  %v3013_v3 = vpop.eup %2331  ;;  %v960_v26 = vpop.xlane.xlu1 %959 }
 0x33e   : > { %3416 = vst [vmem:[#allocation11_spill] sm:$0xff] %v3013_v3  ;;  %v1143_v36 = vmul.f32 1.442695, %v1023_v54  ;;  %v1145_v19 = vmul.f32 1.442695, %v1024_v56  ;;  %v1025_v48 = vsub.f32 %v3417_v38, %v960_v26  ;;  %v1026_v52 = vsub.f32 %v3418_v47, %v960_v26  ;;  %1232 = vadd.xlane.f32.xlu0 %v1231_v46  ;;  %v3420_v38 = vld [vmem:[#allocation17_spill] sm:$0xff] }
 0x33f   : > { %v1234_v40 = vadd.f32 %v3013_v3, %v3007_v23  ;;  %v3421_v46 = vld [vmem:[#allocation18_spill] sm:$0xff]  ;;  %v3423_v23 = vld [vmem:[#allocation20_spill] sm:$0xff] }
 0x340   : > { %2341 = vpow2.f32 %v1143_v36  ;;  %v1147_v42 = vmul.f32 1.442695, %v1025_v48  ;;  %v1149_v16 = vmul.f32 1.442695, %v1026_v52 }
 0x341   : > { %2343 = vpow2.f32 %v1145_v19  ;;  %1235 = vadd.xlane.f32.xlu1 %v1234_v40 }
 0x342   : > { %v3019_v15 = vpop.eup %2333  ;;  %2345 = vpow2.f32 %v1147_v42  ;;  %v3422_v42 = vld [vmem:[#allocation19_spill] sm:$0xff] }
 0x343   : > { %3419 = vst [vmem:[#allocation12_spill] sm:$0xff] %v3019_v15  ;;  %v3021_v57 = vpop.eup %2335  ;;  %2347 = vpow2.f32 %v1149_v16  ;;  %v963_v54 = vpop.xlane.xlu0 %962 }
 0x344   : > { %v3023_v56 = vpop.eup %2337  ;;  %v1027_v47 = vsub.f32 %v3420_v38, %v963_v54  ;;  %v1028_v26 = vsub.f32 %v3421_v46, %v963_v54  ;;  %v1237_v36 = vadd.f32 %v3021_v57, %v3019_v15  ;;  %v3425_v15 = vld [vmem:[#allocation23_spill] sm:$0xff] }
 0x345   : > { %v3029_v48 = vpop.eup %2339  ;;  %v966_v52 = vpop.xlane.xlu1 %965 }
 0x346   : > { %v1151_v19 = vmul.f32 1.442695, %v1027_v47  ;;  %v1153_v40 = vmul.f32 1.442695, %v1028_v26  ;;  %1238 = vadd.xlane.f32.xlu0 %v1237_v36  ;;  %v1029_v9 = vsub.f32 %v3422_v42, %v966_v52  ;;  %v1030_v16 = vsub.f32 %v3423_v23, %v966_v52  ;;  %v3427_v26 = vld [vmem:[#allocation24_spill] sm:$0xff] }
 0x347   : > { %v1240_v3 = vadd.f32 %v3029_v48, %v3023_v56 }
 0x348   : > { %2349 = vpow2.f32 %v1151_v19  ;;  %v1155_v38 = vmul.f32 1.442695, %v1029_v9  ;;  %v1157_v32 = vmul.f32 1.442695, %v1030_v16  ;;  %v3430_v19 = vld [vmem:[#allocation21_spill] sm:$0xff] }
 0x349   : > { %2351 = vpow2.f32 %v1153_v40  ;;  %1241 = vadd.xlane.f32.xlu1 %v1240_v3  ;;  %v383_v54 = vpop.permute.xlu1 %382  ;;  %v3432_v40 = vld [vmem:[#allocation22_spill] sm:$0xff] }
 0x34a   : > { %v3035_v46 = vpop.eup %2341  ;;  %2353 = vpow2.f32 %v1155_v38  ;;  %v3038_v47 = vadd.f32 %v3425_v15, %v383_v54  ;;  %v507_v36 = vadd.f32 %v3427_v26, %v383_v54 }
 0x34b   : > { %3424 = vst [vmem:[#allocation13_spill] sm:$0xff] %v3035_v46  ;;  %v3041_v42 = vpop.eup %2343  ;;  %2355 = vpow2.f32 %v1157_v32  ;;  %v378_v23 = vpop.permute.xlu0 %377 }
 0x34c   : > { %3426 = vst [vmem:[#allocation14_spill] sm:$0xff] %v3038_v47  ;;  %3428 = vst [vmem:[#allocation15_spill] sm:$0xff] %v3041_v42  ;;  %v3043_v52 = vpop.eup %2345  ;;  %v3046_v9 = vadd.f32 %v3430_v19, %v378_v23  ;;  %v503_v3 = vadd.f32 %v3432_v40, %v378_v23  ;;  %v1243_v16 = vadd.f32 %v3041_v42, %v3035_v46 }
 0x34d   : > { %3429 = vst [vmem:[#allocation16_spill] sm:$0xff] %v3043_v52  ;;  %v3051_v38 = vpop.eup %2347 }
 0x34e   : > { %3431 = vst [vmem:[#allocation17_spill] sm:$0xff] %v3046_v9  ;;  %3433 = vst [vmem:[#allocation18_spill] sm:$0xff] %v3051_v38  ;;  %v542_v54 = vpack.c.bf16 %v507_v36, %v503_v3  ;;  %1244 = vadd.xlane.f32.xlu0 %v1243_v16  ;;  %v1246_v32 = vadd.f32 %v3051_v38, %v3043_v52  ;;  %v359_v3 = vld [vmem:[%s3336_s2 + $0x20] sm:$0xff]  ;;  %v3072_v16 = vpop.f32.mrb[8].mxu0  ;;  %v362_v9 = vld [vmem:[%s3336_s2 + $0x38] sm:$0xff] }
 0x34f   : > { %3438 = vst [vmem:[#allocation21_spill] sm:$0xff] %v3072_v16 }
 0x350   : > { %1247 = vadd.xlane.f32.xlu1 %v1246_v32  ;;  %1530 = vmatprep.mubr.bf16.mxu0 %v542_v54  ;;  %v3074_v54 = vpop.f32.mrb[9].mxu0  ;;  %v360_v32 = vld [vmem:[%s3336_s2 + $0x28] sm:$0xff] }
 0x351   : > { %3439 = vst [vmem:[#allocation22_spill] sm:$0xff] %v3074_v54  ;;  %v3082_v15 = vpop.f32.mrb[10].mxu0 }
 0x352   : > { %v3057_v26 = vpop.eup %2349  ;;  %3440 = vst [vmem:[#allocation25_spill] sm:$0xff] %v3082_v15 }
 0x353   : > { %3434 = vst [vmem:[#allocation19_spill] sm:$0xff] %v3057_v26  ;;  %v3059_v19 = vpop.eup %2351 }
 0x354   : > { %3435 = vst [vmem:[#allocation20_spill] sm:$0xff] %v3059_v19  ;;  %v3061_v23 = vpop.eup %2353  ;;  %v1249_v40 = vadd.f32 %v3059_v19, %v3057_v26  ;;  %v1700_v26 = vld [vmem:[%s3338_s4] sm:$0xff] }
 0x355   : > { %3436 = vst [vmem:[#allocation23_spill] sm:$0xff] %v3061_v23  ;;  %v3065_v46 = vpop.eup %2355 }
 0x356   : > { %3437 = vst [vmem:[#allocation24_spill] sm:$0xff] %v3065_v46  ;;  %1250 = vadd.xlane.f32.xlu0 %v1249_v40  ;;  %v1252_v36 = vadd.f32 %v3065_v46, %v3061_v23  ;;  %v361_v40 = vld [vmem:[%s3336_s2 + $0x30] sm:$0xff] }
 0x358   : > { %1253 = vadd.xlane.f32.xlu1 %v1252_v36  ;;  %v3084_v36 = vpop.f32.mrb[11].mxu0 }
 0x359   : > { %3441 = vst [vmem:[#allocation26_spill] sm:$0xff] %v3084_v36  ;;  %v3092_v47 = vpop.f32.mrb[12].mxu0 }
 0x35a   : > { %3442 = vst [vmem:[#allocation27_spill] sm:$0xff] %v3092_v47  ;;  %v3094_v23 = vpop.f32.mrb[13].mxu0 }
 0x35b   : > { %3443 = vst [vmem:[#allocation28_spill] sm:$0xff] %v3094_v23  ;;  %v3096_v46 = vpop.f32.mrb[14].mxu0 }
 0x35c   : > { %3444 = vst [vmem:[#allocation29_spill] sm:$0xff] %v3096_v46 }
 0x369   : > { %387 = vperm.xlu1 %2219, %v359_v3   ;;  %v363_v3 = vld [vmem:[%s3336_s2 + $0x40] sm:$0xff] }
 0x36c   : > { %392 = vperm.xlu0 %2218, %v360_v32   ;;  %v364_v32 = vld [vmem:[%s3336_s2 + $0x48] sm:$0xff] }
 0x36d   : > { %397 = vperm.xlu1 %2219, %v361_v40   ;;  %v3101_v40 = vpop.f32.mrb[15].mxu0 }
 0x36e   : > { %3445 = vst [vmem:[#allocation30_spill] sm:$0xff] %v3101_v40  ;;  %v3106_v19 = vpop.f32.mrb[16].mxu0  ;;  %v1702_v40 = vld [vmem:[%s3338_s4 + $0x10] sm:$0xff] }
 0x36f   : > { %3446 = vst [vmem:[#allocation31_spill] sm:$0xff] %v3106_v19  ;;  %v3108_v36 = vpop.f32.mrb[17].mxu0 }
 0x370   : > { %402 = vperm.xlu0 %2218, %v362_v9   ;;  %3447 = vst [vmem:[#allocation32_spill] sm:$0xff] %v3108_v36  ;;  %v3110_v23 = vpop.f32.mrb[18].mxu0  ;;  %v1701_v9 = vld [vmem:[%s3338_s4 + $0x8] sm:$0xff]  ;;  %v3375_v36 = vlaneseq }
 0x371   : > { %407 = vperm.xlu1 %2219, %v363_v3   ;;  %3448 = vst [vmem:[#allocation33_spill] sm:$0xff] %v3110_v23  ;;  %v3115_v3 = vpop.f32.mrb[19].mxu0 }
 0x372   : > { %3449 = vst [vmem:[#allocation34_spill] sm:$0xff] %v3115_v3  ;;  %vm3133_vm2 = vcmp.lt.s32.totalorder %v3375_v36, 256 }
 0x374   : > { %412 = vperm.xlu0 %2218, %v364_v32   ;;  %v1703_v32 = vld [vmem:[%s3338_s4 + $0x18] sm:$0xff] }
 0x375   : > { %1710 = vperm.xlu1 %2219, %v1700_v26   ;;  %v1704_v26 = vld [vmem:[%s3338_s4 + $0x20] sm:$0xff] }
 0x378   : > { %1715 = vperm.xlu0 %2218, %v1701_v9   ;;  %v1161_v46 = vpop.xlane.xlu0 %1160  ;;  %v1705_v9 = vld [vmem:[%s3338_s4 + $0x28] sm:$0xff] }
 0x379   : > { %2357 = vrcp.f32 %v1161_v46  ;;  %1720 = vperm.xlu1 %2219, %v1702_v40   ;;  %v1706_v40 = vld [vmem:[%s3338_s4 + $0x30] sm:$0xff] }
 0x37a   : > { %v1164_v23 = vpop.xlane.xlu1 %1163 }
 0x37b   : > { %2359 = vrcp.f32 %v1164_v23  ;;  %v3450_v23 = vmov 0 }
 0x37c   : > { %1725 = vperm.xlu0 %2218, %v1703_v32   ;;  %v1167_v3 = vpop.xlane.xlu0 %1166  ;;  %v3451_v23 = vsel %vm3133_vm2, 4294967295, %v3450_v23  ;;  %v2448_v32 = vmov 0.0  }
 0x37d   : > { %2361 = vrcp.f32 %v1167_v3  ;;  %1730 = vperm.xlu1 %2219, %v1704_v26   ;;  %3452 = vst [vmem:[#allocation35_spill] sm:$0xff] %v3451_v23  ;;  %v1707_v3 = vld [vmem:[%s3338_s4 + $0x38] sm:$0xff]  ;;  %579 = vst.msk [vmem:[#allocation4] sm:$0x3] %vm3133_vm2, %v2448_v32 }
 0x37e   : > { %v1170_v46 = vpop.xlane.xlu1 %1169 }
 0x37f   : > { %2363 = vrcp.f32 %v1170_v46 }
 0x380   : > { %1735 = vperm.xlu0 %2218, %v1705_v9   ;;  %v1173_v19 = vpop.xlane.xlu0 %1172 }
 0x381   : > { %2365 = vrcp.f32 %v1173_v19  ;;  %1740 = vperm.xlu1 %2219, %v1706_v40  }
 0x382   : > { %v1176_v26 = vpop.xlane.xlu1 %1175 }
 0x383   : > { %v2358_v47 = vpop.eup %2357  ;;  %2367 = vrcp.f32 %v1176_v26 }
 0x384   : > { %1745 = vperm.xlu0 %2218, %v1707_v3   ;;  %v1179_v9 = vpop.xlane.xlu0 %1178  ;;  %v1288_v36 = vmul.f32 %v2358_v47, %v2819_v35  ;;  %v1287_v16 = vmul.f32 %v2358_v47, %v2817_v29 }
 0x385   : > { %v2360_v46 = vpop.eup %2359  ;;  %2369 = vrcp.f32 %v1179_v9 }
 0x386   : > { %v1290_v19 = vmul.f32 %v2360_v46, %v2823_v62  ;;  %v1289_v40 = vmul.f32 %v2360_v46, %v2821_v10 }
 0x387   : > { %v2362_v15 = vpop.eup %2361  ;;  %v1182_v54 = vpop.xlane.xlu1 %1181 }
 0x388   : > { %2371 = vrcp.f32 %v1182_v54  ;;  %v1467_v23 = vpack.c.bf16 %v1290_v19, %v1288_v36  ;;  %v1466_v52 = vpack.c.bf16 %v1289_v40, %v1287_v16  ;;  %v1292_v3 = vmul.f32 %v2362_v15, %v2831_v0 }
 0x389   : > { %v2364_v32 = vpop.eup %2363  ;;  %v1291_v9 = vmul.f32 %v2362_v15, %v2827_v27 }
 0x38a   : > { %1498 = vmatprep.subr.bf16.mxu0 %v1467_v23  ;;  %v1294_v26 = vmul.f32 %v2364_v32, %v2837_v14  ;;  %v1293_v35 = vmul.f32 %v2364_v32, %v2833_v58  ;;  %v1389_v32 = vadd.f32 %v1290_v19, %v1288_v36 }
 0x38b   : > { %v2366_v62 = vpop.eup %2365  ;;  %v1185_v38 = vpop.xlane.xlu0 %1184  ;;  %1499 = vmatpush1.bf16.msra.mxu0 %v1466_v52 }
 0x38c   : > { %v1469_v10 = vpack.c.bf16 %v1294_v26, %v1292_v3  ;;  %v1468_v46 = vpack.c.bf16 %v1293_v35, %v1291_v9  ;;  %2373 = vrcp.f32 %v1185_v38  ;;  %v1296_v29 = vmul.f32 %v2366_v62, %v2845_v1 }
 0x38d   : > { %v2368_v42 = vpop.eup %2367  ;;  %v1295_v0 = vmul.f32 %v2366_v62, %v2841_v63  ;;  %v1352_v62 = vadd.f32 %v1289_v40, %v1287_v16 }
 0x38e   : > { %1500 = vmatprep.subr.bf16.mxu0 %v1469_v10  ;;  %v1298_v47 = vmul.f32 %v2368_v42, %v2851_v51  ;;  %v1297_v14 = vmul.f32 %v2368_v42, %v2847_v4 }
 0x38f   : > { %v1188_v54 = vpop.xlane.xlu1 %1187  ;;  %1501 = vmatpush1.bf16.msra.mxu0 %v1468_v46  ;;  %v2370_v27 = vpop.eup %2369 }
 0x390   : > { %2375 = vrcp.f32 %v1188_v54  ;;  %v1471_v58 = vpack.c.bf16 %v1298_v47, %v1296_v29  ;;  %v1470_v15 = vpack.c.bf16 %v1297_v14, %v1295_v0  ;;  %v1300_v38 = vmul.f32 %v2370_v27, %v2859_v39 }
 0x391   : > { %v1299_v51 = vmul.f32 %v2370_v27, %v2857_v7  ;;  %v1390_v39 = vadd.f32 %v1389_v32, %v1292_v3 }
 0x392   : > { %v2372_v52 = vpop.eup %2371  ;;  %1502 = vmatprep.subr.bf16.mxu0 %v1471_v58  ;;  %v1353_v58 = vadd.f32 %v1352_v62, %v1291_v9 }
 0x393   : > { %v1191_v23 = vpop.xlane.xlu0 %1190  ;;  %1503 = vmatpush1.bf16.msra.mxu0 %v1470_v15  ;;  %v3156_v1 = vmul.f32 %v2372_v52, %v2871_v53  ;;  %v1301_v63 = vmul.f32 %v2372_v52, %v2867_v41  ;;  %v1391_v52 = vadd.f32 %v1390_v39, %v1294_v26 }
 0x394   : > { %2377 = vrcp.f32 %v1191_v23  ;;  %v1354_v23 = vadd.f32 %v1353_v58, %v1293_v35 }
 0x395   : > { %v1473_v4 = vpack.c.bf16 %v3156_v1, %v1300_v38  ;;  %v1472_v42 = vpack.c.bf16 %v1301_v63, %v1299_v51 }
 0x396   : > { %v1194_v10 = vpop.xlane.xlu1 %1193  ;;  %v2374_v46 = vpop.eup %2373 }
 0x397   : > { %2379 = vrcp.f32 %v1194_v10  ;;  %1504 = vmatprep.subr.bf16.mxu0 %v1473_v4  ;;  %v1304_v15 = vmul.f32 %v2374_v46, %v2877_v2  ;;  %v1303_v41 = vmul.f32 %v2374_v46, %v2875_v21  ;;  %v1392_v21 = vadd.f32 %v1391_v52, %v1296_v29 }
 0x398   : > { %1505 = vmatpush1.bf16.msra.mxu0 %v1472_v42  ;;  %v1355_v4 = vadd.f32 %v1354_v23, %v1295_v0 }
 0x399   : > { %v1393_v10 = vadd.f32 %v1392_v21, %v1298_v47 }
 0x39a   : > { %v2376_v54 = vpop.eup %2375  ;;  %v1356_v46 = vadd.f32 %v1355_v4, %v1297_v14 }
 0x39b   : > { %v1197_v53 = vpop.xlane.xlu0 %1196  ;;  %v1306_v7 = vmul.f32 %v2376_v54, %v2887_v17  ;;  %v1305_v27 = vmul.f32 %v2376_v54, %v2883_v5  ;;  %v1394_v0 = vadd.f32 %v1393_v10, %v1300_v38 }
 0x39c   : > { %2381 = vrcp.f32 %v1197_v53  ;;  %v1357_v54 = vadd.f32 %v1356_v46, %v1299_v51 }
 0x39d   : > { %v1475_v36 = vpack.c.bf16 %v1306_v7, %v1304_v15  ;;  %v1474_v16 = vpack.c.bf16 %v1305_v27, %v1303_v41 }
 0x39e   : > { %v1200_v19 = vpop.xlane.xlu1 %1199  ;;  %v2378_v40 = vpop.eup %2377 }
 0x39f   : > { %2383 = vrcp.f32 %v1200_v19  ;;  %1506 = vmatprep.subr.bf16.mxu0 %v1475_v36  ;;  %v1308_v9 = vmul.f32 %v2378_v40, %v2893_v12  ;;  %v1307_v42 = vmul.f32 %v2378_v40, %v2891_v22  ;;  %v1395_v36 = vadd.f32 %v1394_v0, %v3156_v1 }
 0x3a0   : > { %1507 = vmatpush1.bf16.msra.mxu0 %v1474_v16  ;;  %v1358_v16 = vadd.f32 %v1357_v54, %v1301_v63 }
 0x3a1   : > { %v2380_v3 = vpop.eup %2379 }
 0x3a2   : > { %v1310_v2 = vmul.f32 %v2380_v3, %v2901_v61  ;;  %v1309_v17 = vmul.f32 %v2380_v3, %v2895_v13  ;;  %v1359_v19 = vadd.f32 %v1358_v16, %v1303_v41 }
 0x3a3   : > { %v1203_v5 = vpop.xlane.xlu0 %1202 }
 0x3a4   : > { %v1477_v32 = vpack.c.bf16 %v1310_v2, %v1308_v9  ;;  %2385 = vrcp.f32 %v1203_v5  ;;  %v1476_v62 = vpack.c.bf16 %v1309_v17, %v1307_v42  ;;  %v1360_v40 = vadd.f32 %v1359_v19, %v1305_v27 }
 0x3a6   : > { %1508 = vmatprep.subr.bf16.mxu0 %v1477_v32  ;;  %v1206_v26 = vpop.xlane.xlu1 %1205  ;;  %v2382_v35 = vpop.eup %2381  ;;  %v1361_v1 = vadd.f32 %v1360_v40, %v1307_v42  ;;  %v3453_v40 = vld [vmem:[#allocation7_spill] sm:$0xff] }
 0x3a7   : > { %2387 = vrcp.f32 %v1206_v26  ;;  %1509 = vmatpush1.bf16.msra.mxu0 %v1476_v62  ;;  %v1312_v61 = vmul.f32 %v2382_v35, %v2909_v18  ;;  %v1311_v39 = vmul.f32 %v2382_v35, %v2907_v37 }
 0x3a9   : > { %v2384_v12 = vpop.eup %2383 }
 0x3aa   : > { %v1314_v13 = vmul.f32 %v2384_v12, %v2917_v8  ;;  %v1313_v29 = vmul.f32 %v2384_v12, %v2911_v6  ;;  %v1396_v8 = vadd.f32 %v1395_v36, %v1304_v15 }
 0x3ab   : > { %v1209_v22 = vpop.xlane.xlu0 %1208 }
 0x3ac   : > { %v1479_v58 = vpack.c.bf16 %v1314_v13, %v1312_v61  ;;  %2389 = vrcp.f32 %v1209_v22  ;;  %v1478_v53 = vpack.c.bf16 %v1313_v29, %v1311_v39  ;;  %v1397_v51 = vadd.f32 %v1396_v8, %v1306_v7 }
 0x3ae   : > { %1510 = vmatprep.subr.bf16.mxu0 %v1479_v58  ;;  %v1212_v47 = vpop.xlane.xlu1 %1211  ;;  %v2386_v14 = vpop.eup %2385  ;;  %v1398_v21 = vadd.f32 %v1397_v51, %v1308_v9 }
 0x3af   : > { %2391 = vrcp.f32 %v1212_v47  ;;  %1511 = vmatpush1.bf16.msra.mxu0 %v1478_v53  ;;  %v1316_v6 = vmul.f32 %v2386_v14, %v2925_v59  ;;  %v1315_v23 = vmul.f32 %v2386_v14, %v2923_v43 }
 0x3b0   : > { %v1399_v41 = vadd.f32 %v1398_v21, %v1310_v2 }
 0x3b1   : > { %v2388_v18 = vpop.eup %2387 }
 0x3b2   : > { %v1318_v38 = vmul.f32 %v2388_v18, %v2933_v60  ;;  %v1317_v37 = vmul.f32 %v2388_v18, %v2927_v24  ;;  %v1362_v60 = vadd.f32 %v1361_v1, %v1309_v17  ;;  %v1400_v43 = vadd.f32 %v1399_v41, %v1312_v61 }
 0x3b3   : > { %v1215_v52 = vpop.xlane.xlu0 %1214 }
 0x3b4   : > { %v1481_v3 = vpack.c.bf16 %v1318_v38, %v1316_v6  ;;  %2393 = vrcp.f32 %v1215_v52  ;;  %v1480_v63 = vpack.c.bf16 %v1317_v37, %v1315_v23  ;;  %v1363_v5 = vadd.f32 %v1362_v60, %v1311_v39 }
 0x3b5   : > { %v1401_v10 = vadd.f32 %v1400_v43, %v1314_v13 }
 0x3b6   : > { %1512 = vmatprep.subr.bf16.mxu0 %v1481_v3  ;;  %v1218_v4 = vpop.xlane.xlu1 %1217  ;;  %v2390_v15 = vpop.eup %2389  ;;  %v1364_v2 = vadd.f32 %v1363_v5, %v1313_v29  ;;  %v3456_v5 = vld [vmem:[#allocation9_spill] sm:$0xff] }
 0x3b7   : > { %2395 = vrcp.f32 %v1218_v4  ;;  %1513 = vmatpush1.bf16.msra.mxu0 %v1480_v63  ;;  %v1320_v24 = vmul.f32 %v2390_v15, %v2941_v33  ;;  %v1319_v42 = vmul.f32 %v2390_v15, %v2939_v49  ;;  %v1402_v17 = vadd.f32 %v1401_v10, %v1316_v6  ;;  %v3455_v63 = vld [vmem:[#allocation5_spill] sm:$0xff]  ;;  %v3459_v10 = vld [vmem:[#allocation8_spill] sm:$0xff] }
 0x3b9   : > { %v2392_v59 = vpop.eup %2391  ;;  %v1403_v54 = vadd.f32 %v1402_v17, %v1318_v38 }
 0x3ba   : > { %v1322_v7 = vmul.f32 %v2392_v59, %v2949_v31  ;;  %v1321_v27 = vmul.f32 %v2392_v59, %v2943_v20  ;;  %v1365_v31 = vadd.f32 %v1364_v2, %v1315_v23  ;;  %v3454_v23 = vld [vmem:[#allocation6_spill] sm:$0xff] }
 0x3bb   : > { %v1221_v9 = vpop.xlane.xlu0 %1220  ;;  %v1404_v58 = vadd.f32 %v1403_v54, %v1320_v24 }
 0x3bc   : > { %v1483_v32 = vpack.c.bf16 %v1322_v7, %v1320_v24  ;;  %2397 = vrcp.f32 %v1221_v9  ;;  %v1482_v62 = vpack.c.bf16 %v1321_v27, %v1319_v42  ;;  %v1366_v22 = vadd.f32 %v1365_v31, %v1317_v37 }
 0x3be   : > { %1514 = vmatprep.subr.bf16.mxu0 %v1483_v32  ;;  %v1224_v26 = vpop.xlane.xlu1 %1223  ;;  %v2394_v35 = vpop.eup %2393  ;;  %v1367_v53 = vadd.f32 %v1366_v22, %v1319_v42  ;;  %v3457_v42 = vld [vmem:[#allocation11_spill] sm:$0xff]  ;;  %v3460_v22 = vld [vmem:[#allocation12_spill] sm:$0xff] }
 0x3bf   : > { %2399 = vrcp.f32 %v1224_v26  ;;  %1515 = vmatpush1.bf16.msra.mxu0 %v1482_v62  ;;  %v1324_v20 = vmul.f32 %v2394_v35, %v2957_v25  ;;  %v1323_v61 = vmul.f32 %v2394_v35, %v2955_v55  ;;  %v1405_v55 = vadd.f32 %v1404_v58, %v1322_v7  ;;  %v3458_v62 = vld [vmem:[#allocation10_spill] sm:$0xff] }
 0x3c0   : > { %v1368_v14 = vadd.f32 %v1367_v53, %v1321_v27 }
 0x3c1   : > { %v2396_v33 = vpop.eup %2395  ;;  %v1406_v8 = vadd.f32 %v1405_v55, %v1324_v20 }
 0x3c2   : > { %v1326_v46 = vmul.f32 %v2396_v33, %v2965_v45  ;;  %v1325_v12 = vmul.f32 %v2396_v33, %v2959_v28  ;;  %v1369_v19 = vadd.f32 %v1368_v14, %v1323_v61 }
 0x3c3   : > { %v1227_v49 = vpop.xlane.xlu0 %1226 }
 0x3c4   : > { %v1485_v0 = vpack.c.bf16 %v1326_v46, %v1324_v20  ;;  %2401 = vrcp.f32 %v1227_v49  ;;  %v1484_v13 = vpack.c.bf16 %v1325_v12, %v1323_v61  ;;  %v1407_v51 = vadd.f32 %v1406_v8, %v1326_v46 }
 0x3c6   : > { %1516 = vmatprep.subr.bf16.mxu0 %v1485_v0  ;;  %v1230_v29 = vpop.xlane.xlu1 %1229  ;;  %v2398_v39 = vpop.eup %2397 }
 0x3c7   : > { %2403 = vrcp.f32 %v1230_v29  ;;  %1517 = vmatpush1.bf16.msra.mxu0 %v1484_v13  ;;  %v1328_v45 = vmul.f32 %v2398_v39, %v2973_v30  ;;  %v1327_v16 = vmul.f32 %v2398_v39, %v2971_v11 }
 0x3c9   : > { %v2400_v25 = vpop.eup %2399  ;;  %v1408_v11 = vadd.f32 %v1407_v51, %v1328_v45 }
 0x3ca   : > { %v1330_v28 = vmul.f32 %v2400_v25, %v2981_v44  ;;  %v1329_v47 = vmul.f32 %v2400_v25, %v2975_v34  ;;  %v1370_v44 = vadd.f32 %v1369_v19, %v1325_v12 }
 0x3cb   : > { %v1233_v36 = vpop.xlane.xlu0 %1232 }
 0x3cc   : > { %v1487_v18 = vpack.c.bf16 %v1330_v28, %v1328_v45  ;;  %2405 = vrcp.f32 %v1233_v36  ;;  %v1486_v6 = vpack.c.bf16 %v1329_v47, %v1327_v16  ;;  %v1371_v21 = vadd.f32 %v1370_v44, %v1327_v16 }
 0x3cd   : > { %v1409_v24 = vadd.f32 %v1408_v11, %v1330_v28 }
 0x3ce   : > { %1518 = vmatprep.subr.bf16.mxu0 %v1487_v18  ;;  %v1236_v38 = vpop.xlane.xlu1 %1235  ;;  %v2402_v37 = vpop.eup %2401  ;;  %v1372_v7 = vadd.f32 %v1371_v21, %v1329_v47  ;;  %v3462_v18 = vld [vmem:[#allocation13_spill] sm:$0xff]  ;;  %v3466_v21 = vld [vmem:[#allocation22_spill] sm:$0xff] }
 0x3cf   : > { %2407 = vrcp.f32 %v1236_v38  ;;  %1519 = vmatpush1.bf16.msra.mxu0 %v1486_v6  ;;  %v1332_v34 = vmul.f32 %v2402_v37, %v2989_v50  ;;  %v1331_v4 = vmul.f32 %v2402_v37, %v3455_v63  ;;  %v3463_v38 = vld [vmem:[#allocation18_spill] sm:$0xff]  ;;  %v3467_v63 = vld [vmem:[#allocation25_spill] sm:$0xff] }
 0x3d1   : > { %v2404_v30 = vpop.eup %2403  ;;  %v1410_v27 = vadd.f32 %v1409_v24, %v1332_v34  ;;  %v1373_v43 = vadd.f32 %v1372_v7, %v1331_v4 }
 0x3d2   : > { %v1334_v52 = vmul.f32 %v2404_v30, %v3453_v40  ;;  %v1333_v3 = vmul.f32 %v2404_v30, %v3454_v23  ;;  %v3464_v30 = vld [vmem:[#allocation16_spill] sm:$0xff] }
 0x3d3   : > { %v1239_v1 = vpop.xlane.xlu0 %1238 }
 0x3d4   : > { %2409 = vrcp.f32 %v1239_v1  ;;  %v1489_v15 = vpack.c.bf16 %v1334_v52, %v1332_v34  ;;  %v1488_v59 = vpack.c.bf16 %v1333_v3, %v1331_v4  ;;  %v1411_v17 = vadd.f32 %v1410_v27, %v1334_v52 }
 0x3d5   : > { %v1374_v31 = vadd.f32 %v1373_v43, %v1333_v3  ;;  %v3465_v3 = vld [vmem:[#allocation21_spill] sm:$0xff] }
 0x3d6   : > { %1520 = vmatprep.subr.bf16.mxu0 %v1489_v15  ;;  %v1242_v41 = vpop.xlane.xlu1 %1241  ;;  %v2406_v60 = vpop.eup %2405  ;;  %v3468_v15 = vld [vmem:[#allocation26_spill] sm:$0xff] }
 0x3d7   : > { %2411 = vrcp.f32 %v1242_v41  ;;  %1521 = vmatpush1.bf16.msra.mxu0 %v1488_v59  ;;  %v1336_v9 = vmul.f32 %v2406_v60, %v3456_v5  ;;  %v1335_v2 = vmul.f32 %v2406_v60, %v3459_v10  ;;  %v3469_v5 = vld [vmem:[#allocation20_spill] sm:$0xff] }
 0x3d8   : > { %v3472_v10 = vld [vmem:[#allocation28_spill] sm:$0xff] }
 0x3d9   : > { %v2408_v50 = vpop.eup %2407  ;;  %v1412_v49 = vadd.f32 %v1411_v17, %v1336_v9  ;;  %v1375_v61 = vadd.f32 %v1374_v31, %v1335_v2  ;;  %v3474_v31 = vld [vmem:[#allocation30_spill] sm:$0xff] }
 0x3da   : > { %v1338_v32 = vmul.f32 %v2408_v50, %v3457_v42  ;;  %v1337_v26 = vmul.f32 %v2408_v50, %v3458_v62  ;;  %v3470_v42 = vld [vmem:[#allocation19_spill] sm:$0xff] }
 0x3db   : > { %v1245_v35 = vpop.xlane.xlu0 %1244 }
 0x3dc   : > { %2413 = vrcp.f32 %v1245_v35  ;;  %v1491_v33 = vpack.c.bf16 %v1338_v32, %v1336_v9  ;;  %v1490_v46 = vpack.c.bf16 %v1337_v26, %v1335_v2  ;;  %v1413_v58 = vadd.f32 %v1412_v49, %v1338_v32 }
 0x3dd   : > { %v1248_v20 = vpop.xlane.xlu1 %1247  ;;  %v1376_v53 = vadd.f32 %v1375_v61, %v1337_v26  ;;  %v3471_v26 = vld [vmem:[#allocation27_spill] sm:$0xff] }
 0x3de   : > { %v2410_v12 = vpop.eup %2409  ;;  %1522 = vmatprep.subr.bf16.mxu0 %v1491_v33  ;;  %2415 = vrcp.f32 %v1248_v20  ;;  %v3473_v33 = vld [vmem:[#allocation29_spill] sm:$0xff] }
 0x3df   : > { %1523 = vmatpush1.bf16.msra.mxu0 %v1490_v46  ;;  %v1340_v54 = vmul.f32 %v2410_v12, %v3021_v57  ;;  %v1339_v13 = vmul.f32 %v2410_v12, %v3460_v22  ;;  %v3461_v57 = vld [vmem:[#allocation15_spill] sm:$0xff]  ;;  %v3475_v12 = vld [vmem:[#allocation24_spill] sm:$0xff] }
 0x3e1   : > { %v2412_v0 = vpop.eup %2411  ;;  %v1414_v28 = vadd.f32 %v1413_v58, %v1340_v54  ;;  %v1377_v55 = vadd.f32 %v1376_v53, %v1339_v13 }
 0x3e2   : > { %v1342_v29 = vmul.f32 %v2412_v0, %v3029_v48  ;;  %v1341_v39 = vmul.f32 %v2412_v0, %v3023_v56  ;;  %v3476_v0 = vld [vmem:[#allocation23_spill] sm:$0xff] }
 0x3e3   : > { %v1251_v25 = vpop.xlane.xlu0 %1250 }
 0x3e4   : > { %2417 = vrcp.f32 %v1251_v25  ;;  %v1493_v45 = vpack.c.bf16 %v1342_v29, %v1340_v54  ;;  %v1492_v14 = vpack.c.bf16 %v1341_v39, %v1339_v13  ;;  %v1415_v19 = vadd.f32 %v1414_v28, %v1342_v29  ;;  %v3477_v28 = vld [vmem:[#allocation31_spill] sm:$0xff] }
 0x3e5   : > { %v1254_v47 = vpop.xlane.xlu1 %1253  ;;  %v1378_v56 = vadd.f32 %v1377_v55, %v1341_v39  ;;  %v3478_v55 = vld [vmem:[#allocation32_spill] sm:$0xff] }
 0x3e6   : > { %v2414_v36 = vpop.eup %2413  ;;  %1524 = vmatprep.subr.bf16.mxu0 %v1493_v45  ;;  %2419 = vrcp.f32 %v1254_v47 }
 0x3e7   : > { %1525 = vmatpush1.bf16.msra.mxu0 %v1492_v14  ;;  %v1344_v16 = vmul.f32 %v2414_v36, %v3461_v57  ;;  %v1343_v8 = vmul.f32 %v2414_v36, %v3462_v18  ;;  %v3479_v36 = vld [vmem:[#allocation33_spill] sm:$0xff] }
 0x3e8   : > { %v2416_v48 = vpop.eup %2415 }
 0x3e9   : > { %v388_v6 = vpop.permute.xlu1 %387  ;;  %v1346_v37 = vmul.f32 %v2416_v48, %v3463_v38  ;;  %v1345_v51 = vmul.f32 %v2416_v48, %v3464_v30  ;;  %v1416_v34 = vadd.f32 %v1415_v19, %v1344_v16  ;;  %v1379_v52 = vadd.f32 %v1378_v56, %v1343_v8 }
 0x3ea   : > { %v511_v11 = vadd.f32 %v3465_v3, %v388_v6  ;;  %v513_v1 = vadd.f32 %v3466_v21, %v388_v6  ;;  %v3484_v21 = vlaneseq }
 0x3eb   : > { %v393_v44 = vpop.permute.xlu0 %392  ;;  %v1495_v40 = vpack.c.bf16 %v1346_v37, %v1344_v16  ;;  %v1494_v23 = vpack.c.bf16 %v1345_v51, %v1343_v8  ;;  %v1417_v50 = vadd.f32 %v1416_v34, %v1346_v37  ;;  %v1380_v27 = vadd.f32 %v1379_v52, %v1345_v51  ;;  %v3480_v16 = vld [vmem:[#allocation34_spill] sm:$0xff] }
 0x3ec   : > { %v515_v4 = vadd.f32 %v3467_v63, %v393_v44  ;;  %v517_v59 = vadd.f32 %v3468_v15, %v393_v44  ;;  %v2449_v37 = vmov 1966171168   ;;  %v3481_v34 = vld [vmem:[#allocation14_spill] sm:$0xff] }
 0x3ed   : > { %1526 = vmatprep.subr.bf16.mxu0 %v1495_v40  ;;  %v398_v41 = vpop.permute.xlu1 %397  ;;  %v1430_v30 = vunpack.c.l.s4 %v2449_v37  ;;  %v3482_v40 = vld [vmem:[#allocation17_spill] sm:$0xff] }
 0x3ee   : > { %v2418_v60 = vpop.eup %2417  ;;  %v543_v24 = vpack.c.bf16 %v515_v4, %v511_v11  ;;  %v544_v7 = vpack.c.bf16 %v517_v59, %v513_v1  ;;  %1527 = vmatpush1.bf16.msra.mxu0 %v1494_v23  ;;  %v521_v35 = vadd.f32 %v3471_v26, %v398_v41  ;;  %v523_v2 = vadd.f32 %v3472_v10, %v398_v41 }
 0x3ef   : > { %v403_v43 = vpop.permute.xlu0 %402  ;;  %v1348_v9 = vmul.f32 %v2418_v60, %v3469_v5  ;;  %v1347_v32 = vmul.f32 %v2418_v60, %v3470_v42  ;;  %v3483_v52 = vpack.c.bf16 %v3481_v34, %v3482_v40  ;;  %v1431_v11 = vunpack.c.0.s8 %v1430_v30 }
 0x3f0   : > { %v2420_v62 = vpop.eup %2419  ;;  %v525_v17 = vadd.f32 %v3473_v33, %v403_v43  ;;  %v527_v20 = vadd.f32 %v3474_v31, %v403_v43  ;;  %v1433_v1 = vshrl.u32 %v3484_v21, 7  ;;  %v1606_v31 = vld [vmem:[%s2523_s12] sm:$0xff]  ;;  %v1615_v21 = vld [vmem:[%s2523_s12 + $0x48] sm:$0xff] }
 0x3f1   : > { %v408_v46 = vpop.permute.xlu1 %407  ;;  %v1350_v49 = vmul.f32 %v2420_v62, %v3475_v12  ;;  %v1418_v61 = vadd.f32 %v1417_v50, %v1348_v9  ;;  %v1349_v54 = vmul.f32 %v2420_v62, %v3476_v0  ;;  %v1381_v22 = vadd.f32 %v1380_v27, %v1347_v32  ;;  %v1351_v27 = vld [vmem:[#allocation4] sm:$0x3]  ;;  %v1608_v12 = vld [vmem:[%s2523_s12 + $0x10] sm:$0xff] }
 0x3f2   : > { %v545_v13 = vpack.c.bf16 %v525_v17, %v521_v35  ;;  %v546_v29 = vpack.c.bf16 %v527_v20, %v523_v2  ;;  %v531_v47 = vadd.f32 %v3477_v28, %v408_v46  ;;  %v533_v14 = vadd.f32 %v3478_v55, %v408_v46  ;;  %v1610_v55 = vld [vmem:[%s2523_s12 + $0x20] sm:$0xff] }
 0x3f3   : > { %v413_v39 = vpop.permute.xlu0 %412  ;;  %v1419_v58 = vadd.f32 %v1418_v61, %v1350_v49  ;;  %v1497_v53 = vpack.c.bf16 %v1350_v49, %v1348_v9  ;;  %v1382_v25 = vadd.f32 %v1381_v22, %v1349_v54  ;;  %v1496_v45 = vpack.c.bf16 %v1349_v54, %v1347_v32  ;;  %v1607_v49 = vld [vmem:[%s2523_s12 + $0x8] sm:$0xff]  ;;  %v1609_v54 = vld [vmem:[%s2523_s12 + $0x18] sm:$0xff] }
 0x3f4   : > { %v535_v57 = vadd.f32 %v3479_v36, %v413_v39  ;;  %v537_v18 = vadd.f32 %v3480_v16, %v413_v39  ;;  %v1434_v41 = vsub.s32 %v1431_v11, %v1433_v1  ;;  %v1648_v26 = vsub.s32 1, %v1433_v1  ;;  %v1611_v16 = vld [vmem:[%s2523_s12 + $0x28] sm:$0xff]  ;;  %v1616_v11 = vld [vmem:[%s2523_s12 + $0x50] sm:$0xff] }
 0x3f5   : > { %v1420_v8 = vrot.slane %v1419_v58, 4  ;;  %1528 = vmatprep.subr.bf16.mxu0 %v1497_v53  ;;  %v1383_v48 = vrot.slane %v1382_v25, 4 }
 0x3f6   : > { %v547_v19 = vpack.c.bf16 %v535_v57, %v531_v47  ;;  %v548_v56 = vpack.c.bf16 %v537_v18, %v533_v14  ;;  %1529 = vmatpush1.bf16.msra.mxu0 %v1496_v45  ;;  %v1612_v57 = vld [vmem:[%s2523_s12 + $0x30] sm:$0xff] }
 0x3f7   : > { %v1421_v6 = vadd.f32 %v1420_v8, %v1419_v58  ;;  %v1384_v38 = vadd.f32 %v1383_v48, %v1382_v25  ;;  %v1613_v48 = vld [vmem:[%s2523_s12 + $0x38] sm:$0xff] }
 0x3f9   : > { %v1422_v51 = vrot.slane %v1421_v6, 2  ;;  %v1385_v44 = vrot.slane %v1384_v38, 2  ;;  %1531 = vmatmul.mubr.bf16.vlgmr.msra.gmra.mrb[20].mxu0 %v3483_v52  ;;  %v1614_v52 = vld [vmem:[%s2523_s12 + $0x40] sm:$0xff] }
 0x3fa   : > { %1540 = vmatprep.mubr.bf16.mxu0 %v544_v7  ;;  %v3486_v7 = vmov 0  }
 0x3fb   : > { %v1423_v23 = vadd.f32 %v1422_v51, %v1421_v6  ;;  %v1386_v3 = vadd.f32 %v1385_v44, %v1384_v38 }
 0x3fd   : > { %v1424_v63 = vrot.slane %v1423_v23, 1  ;;  %v1387_v4 = vrot.slane %v1386_v3, 1 }
 0x3ff   : > { %v1425_v15 = vadd.f32 %v1424_v63, %v1423_v23  ;;  %v1388_v59 = vadd.f32 %v1387_v4, %v1386_v3  ;;  %v1617_v4 = vld [vmem:[%s2523_s12 + $0x58] sm:$0xff] }
 0x401   : > { %v1428_v60 = vcombine.low %v1388_v59, %v1425_v15  ;;  %1541 = vmatmul.mubr.bf16.gmra.mrb[24].mxu0 %v543_v24  ;;  %v1644_v24 = vsub.s32 0, %v1433_v1 }
 0x402   : > { %1550 = vmatprep.mubr.bf16.mxu0 %v546_v29 }
 0x403   : > { %v1435_v50 = vrot.slane %v1428_v60, %v1434_v41 }
 0x405   : > { %v1442_v43 = vrot.slane %v1435_v50, %v1434_v41 }
 0x407   : > { %v1444_v5 = vadd.f32 %v1442_v43, %v1351_v27 }
 0x409   : > { %1449 = vst.msk [vmem:[#allocation4] sm:$0x3] %vm3133_vm2, %v1444_v5  ;;  %1551 = vmatmul.mubr.bf16.gmra.mrb[28].mxu0 %v545_v13 }
 0x40a   : > { %1560 = vmatprep.mubr.bf16.mxu0 %v548_v56 }
 0x410   : > { %v1622_v42 = vld [vmem:[#allocation4] sm:$0x3] }
 0x411   : > { %1561 = vmatmul.mubr.bf16.gmra.mrb[32].mxu0 %v547_v19  ;;  %v1623_v32 = vadd.f32 1e-09, %v1622_v42 }
 0x412   : > { %1813 = vmatprep.mubr.bf16.mxu0 %v3486_v7 }
 0x413   : > { %2421 = vrcp.f32 %v1623_v32  ;;  %v1618_v32 = vld [vmem:[%s2523_s12 + $0x60] sm:$0xff] }
 0x41d   : > { %v2422_v62 = vpop.eup %2421 }
 0x41e   : > { %v3229_v35 = vrot.slane %v2422_v62, %v1644_v24  ;;  %v3231_v2 = vrot.slane %v2422_v62, %v1648_v26  ;;  %v1620_v26 = vld [vmem:[%s2523_s12 + $0x70] sm:$0xff] }
 0x4cc   : > { %v1532_v10 = vpop.f32.mrb[20].mxu0 }
 0x4cd   : > { %v1652_v33 = vmul.f32 %v3229_v35, %v1532_v10  ;;  %v1534_v17 = vpop.f32.mrb[21].mxu0  ;;  %v1619_v10 = vld [vmem:[%s2523_s12 + $0x68] sm:$0xff] }
 0x4ce   : > { %v1653_v20 = vmul.f32 %v3231_v2, %v1534_v17  ;;  %v1536_v46 = vpop.f32.mrb[22].mxu0 }
 0x4cf   : > { %v1654_v61 = vmul.f32 %v3229_v35, %v1536_v46  ;;  %v1538_v0 = vpop.f32.mrb[23].mxu0  ;;  %v1668_v13 = vsub.f32 %v1606_v31, %v1652_v33  ;;  %v1621_v31 = vld [vmem:[%s2523_s12 + $0x78] sm:$0xff] }
 0x4d0   : > { %v1655_v22 = vmul.f32 %v3231_v2, %v1538_v0  ;;  %v1669_v39 = vsub.f32 %v1607_v49, %v1653_v20 }
 0x4d1   : > { %v1670_v29 = vsub.f32 %v1608_v12, %v1654_v61 }
 0x4d2   : > { %v1671_v58 = vsub.f32 %v1609_v54, %v1655_v22  ;;  %v2225_v22 = vld [vmem:[%s3337_s3] sm:$0xff]  }
 0x4d3   : > { %v1684_v53 = vpack.c.bf16 %v1670_v29, %v1668_v13  ;;  %v2228_v13 = vld [vmem:[%s3337_s3 + $0x18] sm:$0xff]   ;;  %v1711_v29 = vpop.permute.xlu1 %1710 }
 0x4d4   : > { %v1542_v25 = vpop.f32.mrb[24].mxu0  ;;  %v1685_v45 = vpack.c.bf16 %v1671_v58, %v1669_v39 }
 0x4d5   : > { %v1656_v28 = vmul.f32 %v3229_v35, %v1542_v25  ;;  %v1544_v47 = vpop.f32.mrb[25].mxu0  ;;  %v1716_v25 = vpop.permute.xlu0 %1715 }
 0x4d6   : > { %v1657_v14 = vmul.f32 %v3231_v2, %v1544_v47  ;;  %v1546_v36 = vpop.f32.mrb[26].mxu0  ;;  %1781 = vmatprep.subr.bf16.mxu0 %v1685_v45 }
 0x4d7   : > { %v1658_v18 = vmul.f32 %v3229_v35, %v1546_v36  ;;  %v1548_v8 = vpop.f32.mrb[27].mxu0  ;;  %1782 = vmatpush1.bf16.msra.mxu0 %v1684_v53  ;;  %v1672_v56 = vsub.f32 %v1610_v55, %v1656_v28 }
 0x4d8   : > { %v1659_v19 = vmul.f32 %v3231_v2, %v1548_v8  ;;  %v1673_v38 = vsub.f32 %v1611_v16, %v1657_v14 }
 0x4d9   : > { %v1674_v6 = vsub.f32 %v1612_v57, %v1658_v18 }
 0x4da   : > { %v1675_v37 = vsub.f32 %v1613_v48, %v1659_v19 }
 0x4db   : > { %v1686_v30 = vpack.c.bf16 %v1674_v6, %v1672_v56  ;;  %v1721_v6 = vpop.permute.xlu1 %1720 }
 0x4dc   : > { %v1552_v51 = vpop.f32.mrb[28].mxu0  ;;  %v1687_v44 = vpack.c.bf16 %v1675_v37, %v1673_v38 }
 0x4dd   : > { %v1660_v34 = vmul.f32 %v3229_v35, %v1552_v51  ;;  %v1554_v40 = vpop.f32.mrb[29].mxu0 }
 0x4de   : > { %v1661_v23 = vmul.f32 %v3231_v2, %v1554_v40  ;;  %v1556_v3 = vpop.f32.mrb[30].mxu0  ;;  %1783 = vmatprep.subr.bf16.mxu0 %v1687_v44  ;;  %v1726_v44 = vpop.permute.xlu0 %1725 }
 0x4df   : > { %v1662_v1 = vmul.f32 %v3229_v35, %v1556_v3  ;;  %v1558_v63 = vpop.f32.mrb[31].mxu0  ;;  %1784 = vmatpush1.bf16.msra.mxu0 %v1686_v30  ;;  %v1676_v59 = vsub.f32 %v1614_v52, %v1660_v34 }
 0x4e0   : > { %v1663_v15 = vmul.f32 %v3231_v2, %v1558_v63  ;;  %v1677_v60 = vsub.f32 %v1615_v21, %v1661_v23 }
 0x4e1   : > { %v1678_v41 = vsub.f32 %v1616_v11, %v1662_v1 }
 0x4e2   : > { %v1679_v50 = vsub.f32 %v1617_v4, %v1663_v15 }
 0x4e3   : > { %v1688_v27 = vpack.c.bf16 %v1678_v41, %v1676_v59 }
 0x4e4   : > { %v1562_v43 = vpop.f32.mrb[32].mxu0  ;;  %v1689_v5 = vpack.c.bf16 %v1679_v50, %v1677_v60  ;;  %v1731_v50 = vpop.permute.xlu1 %1730 }
 0x4e5   : > { %v1664_v9 = vmul.f32 %v3229_v35, %v1562_v43  ;;  %v1564_v42 = vpop.f32.mrb[33].mxu0 }
 0x4e6   : > { %v1665_v24 = vmul.f32 %v3231_v2, %v1564_v42  ;;  %v1566_v62 = vpop.f32.mrb[34].mxu0  ;;  %1785 = vmatprep.subr.bf16.mxu0 %v1689_v5  ;;  %v1736_v42 = vpop.permute.xlu0 %1735 }
 0x4e7   : > { %v1666_v33 = vmul.f32 %v3229_v35, %v1566_v62  ;;  %v1568_v17 = vpop.f32.mrb[35].mxu0  ;;  %1786 = vmatpush1.bf16.msra.mxu0 %v1688_v27  ;;  %v1680_v46 = vsub.f32 %v1618_v32, %v1664_v9  ;;  %v2226_v35 = vld [vmem:[%s3337_s3 + $0x8] sm:$0xff]  }
 0x4e8   : > { %v1667_v20 = vmul.f32 %v3231_v2, %v1568_v17  ;;  %v1681_v49 = vsub.f32 %v1619_v10, %v1665_v24  ;;  %v2227_v2 = vld [vmem:[%s3337_s3 + $0x10] sm:$0xff]  }
 0x4e9   : > { %v1682_v12 = vsub.f32 %v1620_v26, %v1666_v33 }
 0x4ea   : > { %v1683_v61 = vsub.f32 %v1621_v31, %v1667_v20 }
 0x4eb   : > { %v1690_v0 = vpack.c.bf16 %v1682_v12, %v1680_v46 }
 0x4ec   : > { %v1691_v54 = vpack.c.bf16 %v1683_v61, %v1681_v49 }
 0x4ee   : > { %1787 = vmatprep.subr.bf16.mxu0 %v1691_v54  ;;  %v1741_v54 = vpop.permute.xlu1 %1740 }
 0x4ef   : > { %1788 = vmatpush1.bf16.msra.mxu0 %v1690_v0 }
 0x4f2   : > { %2165 = vmatmul.mubr.msk.bf16.vlgmr.msra.gmra.mrb[36].mxu0 %vm440_vm0, %v2225_v22 }
 0x4f3   : > { %1823 = vmatprep.mubr.bf16.mxu0 %v3486_v7 }
 0x4fa   : > { %2166 = vmatmul.mubr.msk.bf16.gmra.mrb[40].mxu0 %vm440_vm0, %v2226_v35 }
 0x4fb   : > { %1833 = vmatprep.mubr.bf16.mxu0 %v3486_v7 }
 0x502   : > { %2167 = vmatmul.mubr.msk.bf16.gmra.mrb[44].mxu0 %vm440_vm0, %v2227_v2 }
 0x503   : > { %1843 = vmatprep.mubr.bf16.mxu0 %v3486_v7 }
 0x50a   : > { %2168 = vmatmul.mubr.msk.bf16.gmra.mrb[48].mxu0 %vm440_vm0, %v2228_v13 }
 0x5c5   : > { %v1815_v39 = vpop.f32.mrb[36].mxu0 }
 0x5c6   : > { %v1816_v58 = vadd.f32 %v1815_v39, %v1711_v29  ;;  %v1817_v53 = vpop.f32.mrb[37].mxu0 }
 0x5c7   : > { %v1818_v45 = vadd.f32 %v1817_v53, %v1711_v29  ;;  %v1819_v28 = vpop.f32.mrb[38].mxu0  ;;  %v1746_v29 = vpop.permute.xlu0 %1745 }
 0x5c8   : > { %v1820_v7 = vadd.f32 %v1819_v28, %v1716_v25  ;;  %v1821_v47 = vpop.f32.mrb[39].mxu0  ;;  %v1943_v55 = vmul.f32 %v1816_v58, %v1816_v58 }
 0x5c9   : > { %v2183_v14 = vpack.c.bf16 %v1818_v45, %v1816_v58  ;;  %v1822_v36 = vadd.f32 %v1821_v47, %v1716_v25  ;;  %v1910_v57 = vadd.f32 %v1818_v45, %v1816_v58  ;;  %v1944_v16 = vmul.f32 %v1818_v45, %v1818_v45 }
 0x5ca   : > { %v1945_v18 = vmul.f32 %v1820_v7, %v1820_v7 }
 0x5cb   : > { %1902 = vst [vmem:[%s3291_s10] sm:$0xff] %v2183_v14  ;;  %v2184_v8 = vpack.c.bf16 %v1822_v36, %v1820_v7  ;;  %v1946_v48 = vmul.f32 %v1822_v36, %v1822_v36  ;;  %1911 = vadd.xlane.f32.xlu1 %v1910_v57  ;;  %v1913_v19 = vadd.f32 %v1822_v36, %v1820_v7 }
 0x5cc   : > { %v1959_v56 = vadd.f32 %v1944_v16, %v1943_v55 }
 0x5cd   : > { %1903 = vst [vmem:[%s3291_s10 + $0x8] sm:$0xff] %v2184_v8  ;;  %v1825_v38 = vpop.f32.mrb[40].mxu0  ;;  %1914 = vadd.xlane.f32.xlu0 %v1913_v19  ;;  %v1962_v37 = vadd.f32 %v1946_v48, %v1945_v18 }
 0x5ce   : > { %v1826_v30 = vadd.f32 %v1825_v38, %v1721_v6  ;;  %v1827_v51 = vpop.f32.mrb[41].mxu0 }
 0x5cf   : > { %v1828_v34 = vadd.f32 %v1827_v51, %v1721_v6  ;;  %v1829_v40 = vpop.f32.mrb[42].mxu0  ;;  %1963 = vadd.xlane.f32.xlu1 %v1962_v37 }
 0x5d0   : > { %v1947_v52 = vmul.f32 %v1826_v30, %v1826_v30  ;;  %v1830_v23 = vadd.f32 %v1829_v40, %v1726_v44  ;;  %v1831_v3 = vpop.f32.mrb[43].mxu0 }
 0x5d1   : > { %v2185_v11 = vpack.c.bf16 %v1828_v34, %v1826_v30  ;;  %v1948_v21 = vmul.f32 %v1828_v34, %v1828_v34  ;;  %v1832_v1 = vadd.f32 %v1831_v3, %v1726_v44  ;;  %1960 = vadd.xlane.f32.xlu0 %v1959_v56  ;;  %v1916_v63 = vadd.f32 %v1828_v34, %v1826_v30 }
 0x5d2   : > { %v1949_v4 = vmul.f32 %v1830_v23, %v1830_v23 }
 0x5d3   : > { %1904 = vst [vmem:[%s3291_s10 + $0x10] sm:$0xff] %v2185_v11  ;;  %v2186_v15 = vpack.c.bf16 %v1832_v1, %v1830_v23  ;;  %v1950_v59 = vmul.f32 %v1832_v1, %v1832_v1  ;;  %v1919_v41 = vadd.f32 %v1832_v1, %v1830_v23  ;;  %v1965_v60 = vadd.f32 %v1948_v21, %v1947_v52 }
 0x5d5   : > { %1905 = vst [vmem:[%s3291_s10 + $0x18] sm:$0xff] %v2186_v15  ;;  %v1835_v27 = vpop.f32.mrb[44].mxu0  ;;  %1920 = vadd.xlane.f32.xlu1 %v1919_v41  ;;  %1917 = vadd.xlane.f32.xlu0 %v1916_v63  ;;  %v1968_v43 = vadd.f32 %v1950_v59, %v1949_v4 }
 0x5d6   : > { %v1836_v5 = vadd.f32 %v1835_v27, %v1731_v50  ;;  %v1837_v9 = vpop.f32.mrb[45].mxu0 }
 0x5d7   : > { %v1838_v32 = vadd.f32 %v1837_v9, %v1731_v50  ;;  %v1839_v24 = vpop.f32.mrb[46].mxu0 }
 0x5d8   : > { %v1951_v62 = vmul.f32 %v1836_v5, %v1836_v5  ;;  %v1840_v26 = vadd.f32 %v1839_v24, %v1736_v42  ;;  %v1841_v10 = vpop.f32.mrb[47].mxu0 }
 0x5d9   : > { %v2187_v33 = vpack.c.bf16 %v1838_v32, %v1836_v5  ;;  %v1952_v17 = vmul.f32 %v1838_v32, %v1838_v32  ;;  %v1842_v31 = vadd.f32 %v1841_v10, %v1736_v42  ;;  %1969 = vadd.xlane.f32.xlu1 %v1968_v43  ;;  %1966 = vadd.xlane.f32.xlu0 %v1965_v60 }
 0x5da   : > { %v1953_v20 = vmul.f32 %v1840_v26, %v1840_v26  ;;  %v1922_v46 = vadd.f32 %v1838_v32, %v1836_v5 }
 0x5db   : > { %1906 = vst [vmem:[%s3291_s10 + $0x20] sm:$0xff] %v2187_v33  ;;  %v2188_v12 = vpack.c.bf16 %v1842_v31, %v1840_v26  ;;  %v1954_v49 = vmul.f32 %v1842_v31, %v1842_v31  ;;  %v1925_v61 = vadd.f32 %v1842_v31, %v1840_v26  ;;  %v1971_v0 = vadd.f32 %v1952_v17, %v1951_v62 }
 0x5dd   : > { %1907 = vst [vmem:[%s3291_s10 + $0x28] sm:$0xff] %v2188_v12  ;;  %v1845_v22 = vpop.f32.mrb[48].mxu0  ;;  %1926 = vadd.xlane.f32.xlu1 %v1925_v61  ;;  %1923 = vadd.xlane.f32.xlu0 %v1922_v46  ;;  %v1974_v35 = vadd.f32 %v1954_v49, %v1953_v20 }
 0x5de   : > { %v1846_v2 = vadd.f32 %v1845_v22, %v1741_v54  ;;  %v1847_v13 = vpop.f32.mrb[49].mxu0 }
 0x5df   : > { %v1848_v39 = vadd.f32 %v1847_v13, %v1741_v54  ;;  %v1849_v58 = vpop.f32.mrb[50].mxu0 }
 0x5e0   : > { %v1955_v53 = vmul.f32 %v1846_v2, %v1846_v2  ;;  %v1850_v25 = vadd.f32 %v1849_v58, %v1746_v29  ;;  %v1851_v45 = vpop.f32.mrb[51].mxu0 }
 0x5e1   : > { %v2189_v28 = vpack.c.bf16 %v1848_v39, %v1846_v2  ;;  %v1956_v7 = vmul.f32 %v1848_v39, %v1848_v39  ;;  %v1852_v47 = vadd.f32 %v1851_v45, %v1746_v29  ;;  %1975 = vadd.xlane.f32.xlu1 %v1974_v35  ;;  %1972 = vadd.xlane.f32.xlu0 %v1971_v0 }
 0x5e2   : > { %v1957_v55 = vmul.f32 %v1850_v25, %v1850_v25  ;;  %v1928_v14 = vadd.f32 %v1848_v39, %v1846_v2 }
 0x5e3   : > { %1908 = vst [vmem:[%s3291_s10 + $0x30] sm:$0xff] %v2189_v28  ;;  %v2190_v36 = vpack.c.bf16 %v1852_v47, %v1850_v25  ;;  %v1958_v57 = vmul.f32 %v1852_v47, %v1852_v47  ;;  %v1931_v16 = vadd.f32 %v1852_v47, %v1850_v25  ;;  %v1977_v18 = vadd.f32 %v1956_v7, %v1955_v53 }
 0x5e5   : > { %1909 = vst [vmem:[%s3291_s10 + $0x38] sm:$0xff] %v2190_v36  ;;  %1932 = vadd.xlane.f32.xlu1 %v1931_v16  ;;  %1929 = vadd.xlane.f32.xlu0 %v1928_v14  ;;  %v1980_v8 = vadd.f32 %v1958_v57, %v1957_v55 }
 0x5e9   : > { %1981 = vadd.xlane.f32.xlu1 %v1980_v8  ;;  %1978 = vadd.xlane.f32.xlu0 %v1977_v18 }
 0x658   : > { %v1912_v48 = vpop.xlane.xlu1 %1911 }
 0x659   : > { %1935 = vst.msk [vmem:[%s310_s13] sm:$0xff] %vm1934_vm3, %v1912_v48 }
 0x65a   : > { %v1915_v19 = vpop.xlane.xlu0 %1914 }
 0x65b   : > { %1936 = vst.msk [vmem:[%s310_s13 + $0x8] sm:$0xff] %vm1934_vm3, %v1915_v19 }
 0x65c   : > { %v1964_v56 = vpop.xlane.xlu1 %1963 }
 0x65d   : > { %1984 = vst.msk [vmem:[%s315_s16 + $0x8] sm:$0xff] %vm1934_vm3, %v1964_v56 }
 0x65e   : > { %v1961_v6 = vpop.xlane.xlu0 %1960 }
 0x65f   : > { %1983 = vst.msk [vmem:[%s315_s16] sm:$0xff] %vm1934_vm3, %v1961_v6 }
 0x662   : > { %v1918_v38 = vpop.xlane.xlu0 %1917  ;;  %v1921_v37 = vpop.xlane.xlu1 %1920 }
 0x663   : > { %1937 = vst.msk [vmem:[%s310_s13 + $0x10] sm:$0xff] %vm1934_vm3, %v1918_v38  ;;  %1938 = vst.msk [vmem:[%s310_s13 + $0x18] sm:$0xff] %vm1934_vm3, %v1921_v37 }
 0x666   : > { %v1967_v30 = vpop.xlane.xlu0 %1966  ;;  %v1970_v51 = vpop.xlane.xlu1 %1969 }
 0x667   : > { %1985 = vst.msk [vmem:[%s315_s16 + $0x10] sm:$0xff] %vm1934_vm3, %v1967_v30  ;;  %1986 = vst.msk [vmem:[%s315_s16 + $0x18] sm:$0xff] %vm1934_vm3, %v1970_v51 }
 0x66a   : > { %v1924_v44 = vpop.xlane.xlu0 %1923  ;;  %v1927_v34 = vpop.xlane.xlu1 %1926 }
 0x66b   : > { %1939 = vst.msk [vmem:[%s310_s13 + $0x20] sm:$0xff] %vm1934_vm3, %v1924_v44  ;;  %1940 = vst.msk [vmem:[%s310_s13 + $0x28] sm:$0xff] %vm1934_vm3, %v1927_v34 }
 0x66e   : > { %v1973_v40 = vpop.xlane.xlu0 %1972  ;;  %v1976_v52 = vpop.xlane.xlu1 %1975 }
 0x66f   : > { %1987 = vst.msk [vmem:[%s315_s16 + $0x20] sm:$0xff] %vm1934_vm3, %v1973_v40  ;;  %1988 = vst.msk [vmem:[%s315_s16 + $0x28] sm:$0xff] %vm1934_vm3, %v1976_v52 }
 0x672   : > { %v1930_v23 = vpop.xlane.xlu0 %1929  ;;  %v1933_v3 = vpop.xlane.xlu1 %1932 }
 0x673   : > { %1941 = vst.msk [vmem:[%s310_s13 + $0x30] sm:$0xff] %vm1934_vm3, %v1930_v23  ;;  %1942 = vst.msk [vmem:[%s310_s13 + $0x38] sm:$0xff] %vm1934_vm3, %v1933_v3 }
 0x676   : > { %v1979_v11 = vpop.xlane.xlu0 %1978  ;;  %v1982_v21 = vpop.xlane.xlu1 %1981 }
 0x677   : > { %1989 = vst.msk [vmem:[%s315_s16 + $0x30] sm:$0xff] %vm1934_vm3, %v1979_v11  ;;  %1990 = vst.msk [vmem:[%s315_s16 + $0x38] sm:$0xff] %vm1934_vm3, %v1982_v21 }
 0x678 PF: > { %s18_s26 = sadd.s32 1, %s2445_s26   ;;  %s3487_s24 = smov %s2441_s25 }
 0x679   : > { %p15_p5 = scmp.ge.s32.totalorder %s18_s26, 6   ;;  %s3488_s25 = smov %s3490_s27 }
 0x67b   :  { %17 = sbr.rel (!%p15_p5) target bundleno = 2 (0x2), region = 103 }

</bundles_post_ra>
